<compile_context>
chip_gen: v5e
topology: v5e:2x2
jax: 0.10.0
libtpu: 0.0.40
codegen_flags: <defaults>
</compile_context>

<pallas_src>
import functools
import math

import jax
import jax.numpy as jnp
from jax.experimental import pallas as pl
from jax.experimental.pallas import tpu as pltpu

EPS = 1e-5                 # nn.LayerNorm default eps
N_BLOCKS = 2               # wmha, swmha
VECS_PER_BLOCK = 7         # ln_a(gamma,beta), attn bias, ln_m(gamma,beta), ff b1, ff b2


# ----------------------------------------------------------------------------
# Elementwise helpers
# ----------------------------------------------------------------------------
def _gelu(x):
    # tanh-approx GELU: 0.5*x*(1 + tanh(sqrt(2/pi)*(x + 0.044715*x^3))).
    # tanh executes on the otherwise-idle EUP slot.
    c = 0.7978845608028654
    return 0.5 * x * (1.0 + jnp.tanh(c * (x + 0.044715 * x * x * x)))


# ----------------------------------------------------------------------------
# Kernel: two emptyPointSwinBlocks (= 4 residual pre-norm sublayers) per tile
# ----------------------------------------------------------------------------
def _swin_block_kernel(x_ref, w32_ref, w128_ref, vec_ref, o_ref, *, dim, mlp_dim):
    # Channels-on-sublanes layout: every activation tensor is (channels, tokens),
    # tokens (multiple of 128) on lanes -> lane-dense VALU work and stores.
    #
    # x_ref    : (dim, tile_t)        f32   token tile (x^T)
    # w32_ref  : (2*(dim+mlp), dim)   bf16  rows: [Wa_1 | W1_1 | Wa_2 | W1_2]
    # w128_ref : (2*dim, mlp)         bf16  rows: [W2_1 | W2_2]
    # vec_ref  : (mlp, 14)            f32   columns (per block): ln_a_g, ln_a_b,
    #                                       attn_b, ln_m_g, ln_m_b, ff_b1, ff_b2
    D, M = dim, mlp_dim
    f32 = jnp.float32
    cdt = jnp.bfloat16   # MXU operand dtype; accumulation stays f32

    def vcol(i, n):
        return vec_ref[0:n, i:i + 1]                     # (n, 1) per-channel column

    def layernorm(y, g, b):
        # Fused statistics (single pass over y): var = E[y^2] - mean^2.
        mean = jnp.mean(y, axis=0, keepdims=True)        # reduce over channels (sublanes)
        ex2 = jnp.mean(y * y, axis=0, keepdims=True)
        inv = jax.lax.rsqrt(ex2 - mean * mean + EPS)     # EUP
        return (y - mean) * inv * g + b

    y = x_ref[...].astype(f32)                           # (D, tile_t)

    for blk in range(N_BLOCKS):                          # wmha, then swmha
        r0 = blk * (D + M)
        v0 = blk * VECS_PER_BLOCK

        # Residual(PreNorm(dim, emptyWSA)):  LN -> Conv1d(dim,dim,k=1) -> +x
        h = layernorm(y, vcol(v0 + 0, D), vcol(v0 + 1, D))
        wa = w32_ref[r0:r0 + D, :]                       # (D, D) bf16, torch (out,in)
        y = y + (jnp.dot(wa, h.astype(cdt), preferred_element_type=f32)
                 + vcol(v0 + 2, D))

        # Residual(PreNorm(dim, FeedForward)): LN -> Linear -> GELU -> Linear -> +x
        h = layernorm(y, vcol(v0 + 3, D), vcol(v0 + 4, D))
        w1 = w32_ref[r0 + D:r0 + D + M, :]               # (M, D) bf16
        u = _gelu(jnp.dot(w1, h.astype(cdt), preferred_element_type=f32)
                  + vcol(v0 + 5, M))                     # (M, tile_t), lane-dense
        w2 = w128_ref[blk * D:(blk + 1) * D, :]          # (D, M) bf16
        y = y + (jnp.dot(w2, u.astype(cdt), preferred_element_type=f32)
                 + vcol(v0 + 6, D))

    o_ref[...] = y.astype(o_ref.dtype)                   # lane-dense store


# ----------------------------------------------------------------------------
# Wrapper
# ----------------------------------------------------------------------------
def _pick_tile_t(total_tokens, target=1024, min_steps=4):
    """Largest multiple-of-128 divisor of T that is <= target and gives >= min_steps
    grid steps when possible.

    Moderate tiles keep per-step VMEM to a few MB (safe under v5e's 16 MiB /
    v7x's 32 MiB scoped defaults) and a multi-step grid gives dual-TC v7x
    parallel work plus DMA/compute overlap; 512-1024-token tiles already sit
    near the roofline so nothing is lost vs giant tiles on v5e/v6e.
    Falls back to the full extent (always a legal block) if T % 128 != 0.
    """
    if total_tokens % 128 != 0:
        return total_tokens
    cap = min(target, max(128, (total_tokens // min_steps) // 128 * 128))
    cand = max(cap, 128)
    while cand >= 128:
        if total_tokens % cand == 0:
            return cand
        cand -= 128
    return total_tokens


def swin_attention_block(x, packed, *, tile_t=None):
    """x: (B, L, dim) NLC, as in the PyTorch module. Returns (B, L, dim)."""
    w32, w128, vecs = packed
    B, L, D = x.shape
    M = w128.shape[1]
    T = B * L
    assert D % 8 == 0, "channel dim must be a multiple of 8 (sublane tiling)"

    # Channels-on-sublanes presentation; the wrapper transposes are pure layout
    # plumbing on a small (T, D) slab, not compute.
    xt = jnp.transpose(x.reshape(T, D))                  # (D, T)

    if tile_t is None:
        tile_t = _pick_tile_t(T)
    assert T % tile_t == 0
    grid = (T // tile_t,)

    flops = int(T * N_BLOCKS * (2 * D * D + 4 * D * M))
    transcendentals = int(T * N_BLOCKS * (M + 2))        # tanh per GELU elem + 2 rsqrt/token
    bytes_accessed = int(xt.size * 4 * 2 + w32.size * 2 + w128.size * 2 + vecs.size * 4)

    out_t = pl.pallas_call(
        functools.partial(_swin_block_kernel, dim=D, mlp_dim=M),
        out_shape=jax.ShapeDtypeStruct((D, T), x.dtype),
        grid=grid,
        in_specs=[
            pl.BlockSpec((D, tile_t), lambda i: (0, i)),
            pl.BlockSpec(w32.shape, lambda i: (0, 0)),    # packed weight slab (K = dim)
            pl.BlockSpec(w128.shape, lambda i: (0, 0)),   # packed weight slab (K = mlp)
            pl.BlockSpec(vecs.shape, lambda i: (0, 0)),   # packed bias/LN column slab
        ],
        out_specs=pl.BlockSpec((D, tile_t), lambda i: (0, i)),
        compiler_params=pltpu.CompilerParams(dimension_semantics=("parallel",)),
        cost_estimate=pl.CostEstimate(flops=flops,
                                      transcendentals=transcendentals,
                                      bytes_accessed=bytes_accessed),
    )(xt, w32, w128, vecs)
    return jnp.transpose(out_t).reshape(B, L, D)


# ----------------------------------------------------------------------------
# Parameters: PyTorch-shaped init + packing into 3 slabs
# ----------------------------------------------------------------------------
def init_params(key, dim, mlp_dim):
    ks = iter(jax.random.split(key, 6 * N_BLOCKS + 1))
    nk = lambda: next(ks)

    def linear(out_f, in_f):        # PyTorch default U(-1/sqrt(in), 1/sqrt(in))
        bound = 1.0 / math.sqrt(in_f)
        w = jax.random.uniform(nk(), (out_f, in_f), jnp.float32, -bound, bound)
        b = jax.random.uniform(nk(), (out_f,), jnp.float32, -bound, bound)
        return w, b

    blocks = []
    for _ in range(N_BLOCKS):                              # wmha, swmha
        wa, ba = linear(dim, dim)                          # emptyWSA Conv1d(dim,dim,1)
        w1, b1 = linear(mlp_dim, dim)                      # FeedForward Linear(dim,mlp)
        w2, b2 = linear(dim, mlp_dim)                      # FeedForward Linear(mlp,dim)
        blocks.append(dict(
            ln_a_g=jnp.ones((dim,), jnp.float32), ln_a_b=jnp.zeros((dim,), jnp.float32),
            wa=wa, ba=ba,
            ln_m_g=jnp.ones((dim,), jnp.float32), ln_m_b=jnp.zeros((dim,), jnp.float32),
            w1=w1, b1=b1, w2=w2, b2=b2))
    return blocks


def pack_params(blocks, dim, mlp_dim):
    """Pack the 20 tensors into 2 bf16 weight slabs + 1 f32 per-channel column slab.

    Weights stay in their torch (out, in) orientation because the kernel works
    on x^T (channels on sublanes): y = W @ h.
    """
    D, M = dim, mlp_dim
    assert M >= D
    w32_rows, w128_rows, cols = [], [], []

    def pad_col(v):
        return jnp.pad(v, (0, M - v.shape[0]))[:, None]    # (M, 1)

    for blk in blocks:
        w32_rows.append(blk["wa"])             # (D, D)  y += Wa @ h   (Conv1d k=1)
        w32_rows.append(blk["w1"])             # (M, D)  u  = W1 @ h
        w128_rows.append(blk["w2"])            # (D, M)  y += W2 @ u
        cols += [pad_col(blk["ln_a_g"]), pad_col(blk["ln_a_b"]), pad_col(blk["ba"]),
                 pad_col(blk["ln_m_g"]), pad_col(blk["ln_m_b"]), pad_col(blk["b1"]),
                 pad_col(blk["b2"])]

    w32 = jnp.concatenate(w32_rows, axis=0).astype(jnp.bfloat16)   # (2*(D+M), D)
    w128 = jnp.concatenate(w128_rows, axis=0).astype(jnp.bfloat16)  # (2*D, M)
    vecs = jnp.concatenate(cols, axis=1)                            # (M, 14) f32
    return w32, w128, vecs


# ----------------------------------------------------------------------------
# Plain-JAX reference (same math: tanh GELU, bf16 matmul operands, f32 accum)
# ----------------------------------------------------------------------------
def reference(x, blocks):
    B, L, D = x.shape
    y = x.reshape(B * L, D).astype(jnp.float32)
    bf16, f32 = jnp.bfloat16, jnp.float32

    def ln(y, g, b):
        mean = jnp.mean(y, axis=-1, keepdims=True)
        var = jnp.mean(jnp.square(y - mean), axis=-1, keepdims=True)
        return (y - mean) * jax.lax.rsqrt(var + EPS) * g + b

    for blk in blocks:
        h = ln(y, blk["ln_a_g"], blk["ln_a_b"])
        y = y + (jnp.dot(h.astype(bf16), blk["wa"].T.astype(bf16),
                         preferred_element_type=f32) + blk["ba"])
        h = ln(y, blk["ln_m_g"], blk["ln_m_b"])
        u = _gelu(jnp.dot(h.astype(bf16), blk["w1"].T.astype(bf16),
                          preferred_element_type=f32) + blk["b1"])
        y = y + (jnp.dot(u.astype(bf16), blk["w2"].T.astype(bf16),
                         preferred_element_type=f32) + blk["b2"])
    return y.reshape(B, L, D)


# ----------------------------------------------------------------------------
# Demo
# ----------------------------------------------------------------------------
if __name__ == "__main__":
    B, L, DIM = 2, 1024, 32
    MLP = 4 * DIM          # mlp_dim=None in the module -> dim * 4
    # TODO(synk): PyTorch nn.GELU default is exact erf; tanh approximation is
    # used here per perf guidance (difference ~1e-3, below bf16 matmul noise).

    key = jax.random.PRNGKey(0)
    kx, kp = jax.random.split(key)
    x = jax.random.normal(kx, (B, L, DIM), jnp.float32)   # NLC, as the module expects
    blocks = init_params(kp, DIM, MLP)
    packed = pack_params(blocks, DIM, MLP)

    fwd = jax.jit(lambda a: swin_attention_block(a, packed))
    out = fwd(x)
    jax.block_until_ready(out)

    assert out.shape == (B, L, DIM)
    assert bool(jnp.all(jnp.isfinite(out)))

    ref = reference(x, blocks)
    max_err = float(jnp.max(jnp.abs(out - ref)))
    assert max_err < 5e-3, f"max abs error {max_err}"

    print("KERNEL_OK")
</pallas_src>

<mosaic_0001>
module attributes {stable_mosaic.version = 11 : i64} {
  func.func @_swin_block_kernel(%arg0: i32, %arg1: memref<32x512xf32, #tpu.memory_space<vmem>>, %arg2: memref<320x32xbf16, #tpu.memory_space<vmem>>, %arg3: memref<64x128xbf16, #tpu.memory_space<vmem>>, %arg4: memref<128x14xf32, #tpu.memory_space<vmem>>, %arg5: memref<32x512xf32, #tpu.memory_space<vmem>>) attributes {dimension_semantics = [#tpu.dimension_semantics<parallel>], iteration_bounds = array<i64: 4>, scalar_prefetch = 0 : i64, scratch_operands = 0 : i64, tpu.core_type = #tpu.core_type<tc>, window_params = [{transform_indices = @transform_0, window_bounds = array<i64: 32, 512>}, {pipeline_mode = #tpu.pipeline_mode<synchronous>, transform_indices = @transform_1, window_bounds = array<i64: 320, 32>}, {pipeline_mode = #tpu.pipeline_mode<synchronous>, transform_indices = @transform_2, window_bounds = array<i64: 64, 128>}, {pipeline_mode = #tpu.pipeline_mode<synchronous>, transform_indices = @transform_3, window_bounds = array<i64: 128, 14>}, {transform_indices = @transform_4, window_bounds = array<i64: 32, 512>}]} {
    %c0 = arith.constant 0 : index
    %c0_0 = arith.constant 0 : index
    %0 = vector.load %arg1[%c0, %c0_0] : memref<32x512xf32, #tpu.memory_space<vmem>>, vector<32x512xf32>
    %c0_1 = arith.constant 0 : index
    %c0_2 = arith.constant 0 : index
    %1 = vector.load %arg4[%c0_1, %c0_2] : memref<128x14xf32, #tpu.memory_space<vmem>>, vector<32x1xf32>
    %c0_3 = arith.constant 0 : index
    %c1 = arith.constant 1 : index
    %2 = vector.load %arg4[%c0_3, %c1] : memref<128x14xf32, #tpu.memory_space<vmem>>, vector<32x1xf32>
    %cst = arith.constant dense<0.000000e+00> : vector<512xf32>
    %3 = vector.multi_reduction <add>, %0, %cst [0] : vector<32x512xf32> to vector<512xf32>
    %4 = vector.shape_cast %3 : vector<512xf32> to vector<1x512xf32>
    %cst_4 = arith.constant 3.200000e+01 : f32
    %5 = vector.broadcast %cst_4 : f32 to vector<1x512xf32>
    %6 = arith.divf %4, %5 : vector<1x512xf32>
    %7 = arith.mulf %0, %0 : vector<32x512xf32>
    %cst_5 = arith.constant dense<0.000000e+00> : vector<512xf32>
    %8 = vector.multi_reduction <add>, %7, %cst_5 [0] : vector<32x512xf32> to vector<512xf32>
    %9 = vector.shape_cast %8 : vector<512xf32> to vector<1x512xf32>
    %cst_6 = arith.constant 3.200000e+01 : f32
    %10 = vector.broadcast %cst_6 : f32 to vector<1x512xf32>
    %11 = arith.divf %9, %10 : vector<1x512xf32>
    %12 = arith.mulf %6, %6 : vector<1x512xf32>
    %13 = arith.subf %11, %12 : vector<1x512xf32>
    %cst_7 = arith.constant 9.99999974E-6 : f32
    %14 = vector.broadcast %cst_7 : f32 to vector<1x512xf32>
    %15 = arith.addf %13, %14 : vector<1x512xf32>
    %16 = math.rsqrt %15 : vector<1x512xf32>
    %17 = vector.broadcast %6 : vector<1x512xf32> to vector<32x512xf32>
    %18 = arith.subf %0, %17 : vector<32x512xf32>
    %19 = vector.broadcast %16 : vector<1x512xf32> to vector<32x512xf32>
    %20 = arith.mulf %18, %19 : vector<32x512xf32>
    %21 = vector.broadcast %1 : vector<32x1xf32> to vector<32x512xf32>
    %22 = arith.mulf %20, %21 : vector<32x512xf32>
    %23 = vector.broadcast %2 : vector<32x1xf32> to vector<32x512xf32>
    %24 = arith.addf %22, %23 : vector<32x512xf32>
    %c0_8 = arith.constant 0 : index
    %c0_9 = arith.constant 0 : index
    %25 = vector.load %arg2[%c0_8, %c0_9] : memref<320x32xbf16, #tpu.memory_space<vmem>>, vector<32x32xbf16>
    %26 = arith.truncf %24 : vector<32x512xf32> to vector<32x512xbf16>
    %cst_10 = arith.constant dense<0.000000e+00> : vector<32x512xf32>
    %27 = tpu.matmul %25, %26, %cst_10 {dimension_numbers = #tpu.dot_dimension_numbers<[1], [0], [0], [1], [0, 0, 1, 1], [], []>} : vector<32x32xbf16>, vector<32x512xbf16>, vector<32x512xf32> -> vector<32x512xf32>
    %c0_11 = arith.constant 0 : index
    %c2 = arith.constant 2 : index
    %28 = vector.load %arg4[%c0_11, %c2] : memref<128x14xf32, #tpu.memory_space<vmem>>, vector<32x1xf32>
    %29 = vector.broadcast %28 : vector<32x1xf32> to vector<32x512xf32>
    %30 = arith.addf %27, %29 : vector<32x512xf32>
    %31 = arith.addf %0, %30 : vector<32x512xf32>
    %c0_12 = arith.constant 0 : index
    %c3 = arith.constant 3 : index
    %32 = vector.load %arg4[%c0_12, %c3] : memref<128x14xf32, #tpu.memory_space<vmem>>, vector<32x1xf32>
    %c0_13 = arith.constant 0 : index
    %c4 = arith.constant 4 : index
    %33 = vector.load %arg4[%c0_13, %c4] : memref<128x14xf32, #tpu.memory_space<vmem>>, vector<32x1xf32>
    %cst_14 = arith.constant dense<0.000000e+00> : vector<512xf32>
    %34 = vector.multi_reduction <add>, %31, %cst_14 [0] : vector<32x512xf32> to vector<512xf32>
    %35 = vector.shape_cast %34 : vector<512xf32> to vector<1x512xf32>
    %cst_15 = arith.constant 3.200000e+01 : f32
    %36 = vector.broadcast %cst_15 : f32 to vector<1x512xf32>
    %37 = arith.divf %35, %36 : vector<1x512xf32>
    %38 = arith.mulf %31, %31 : vector<32x512xf32>
    %cst_16 = arith.constant dense<0.000000e+00> : vector<512xf32>
    %39 = vector.multi_reduction <add>, %38, %cst_16 [0] : vector<32x512xf32> to vector<512xf32>
    %40 = vector.shape_cast %39 : vector<512xf32> to vector<1x512xf32>
    %cst_17 = arith.constant 3.200000e+01 : f32
    %41 = vector.broadcast %cst_17 : f32 to vector<1x512xf32>
    %42 = arith.divf %40, %41 : vector<1x512xf32>
    %43 = arith.mulf %37, %37 : vector<1x512xf32>
    %44 = arith.subf %42, %43 : vector<1x512xf32>
    %cst_18 = arith.constant 9.99999974E-6 : f32
    %45 = vector.broadcast %cst_18 : f32 to vector<1x512xf32>
    %46 = arith.addf %44, %45 : vector<1x512xf32>
    %47 = math.rsqrt %46 : vector<1x512xf32>
    %48 = vector.broadcast %37 : vector<1x512xf32> to vector<32x512xf32>
    %49 = arith.subf %31, %48 : vector<32x512xf32>
    %50 = vector.broadcast %47 : vector<1x512xf32> to vector<32x512xf32>
    %51 = arith.mulf %49, %50 : vector<32x512xf32>
    %52 = vector.broadcast %32 : vector<32x1xf32> to vector<32x512xf32>
    %53 = arith.mulf %51, %52 : vector<32x512xf32>
    %54 = vector.broadcast %33 : vector<32x1xf32> to vector<32x512xf32>
    %55 = arith.addf %53, %54 : vector<32x512xf32>
    %c32 = arith.constant 32 : index
    %c0_19 = arith.constant 0 : index
    %56 = vector.load %arg2[%c32, %c0_19] : memref<320x32xbf16, #tpu.memory_space<vmem>>, vector<128x32xbf16>
    %57 = arith.truncf %55 : vector<32x512xf32> to vector<32x512xbf16>
    %cst_20 = arith.constant dense<0.000000e+00> : vector<128x512xf32>
    %58 = tpu.matmul %56, %57, %cst_20 {dimension_numbers = #tpu.dot_dimension_numbers<[1], [0], [0], [1], [0, 0, 1, 1], [], []>} : vector<128x32xbf16>, vector<32x512xbf16>, vector<128x512xf32> -> vector<128x512xf32>
    %c0_21 = arith.constant 0 : index
    %c5 = arith.constant 5 : index
    %59 = vector.load %arg4[%c0_21, %c5] : memref<128x14xf32, #tpu.memory_space<vmem>>, vector<128x1xf32>
    %60 = vector.broadcast %59 : vector<128x1xf32> to vector<128x512xf32>
    %61 = arith.addf %58, %60 : vector<128x512xf32>
    %cst_22 = arith.constant 5.000000e-01 : f32
    %62 = vector.broadcast %cst_22 : f32 to vector<128x512xf32>
    %63 = arith.mulf %62, %61 : vector<128x512xf32>
    %cst_23 = arith.constant 4.471500e-02 : f32
    %64 = vector.broadcast %cst_23 : f32 to vector<128x512xf32>
    %65 = arith.mulf %64, %61 : vector<128x512xf32>
    %66 = arith.mulf %65, %61 : vector<128x512xf32>
    %67 = arith.mulf %66, %61 : vector<128x512xf32>
    %68 = arith.addf %61, %67 : vector<128x512xf32>
    %cst_24 = arith.constant 0.797884583 : f32
    %69 = vector.broadcast %cst_24 : f32 to vector<128x512xf32>
    %70 = arith.mulf %69, %68 : vector<128x512xf32>
    %71 = math.tanh %70 : vector<128x512xf32>
    %cst_25 = arith.constant 1.000000e+00 : f32
    %72 = vector.broadcast %cst_25 : f32 to vector<128x512xf32>
    %73 = arith.addf %72, %71 : vector<128x512xf32>
    %74 = arith.mulf %63, %73 : vector<128x512xf32>
    %c0_26 = arith.constant 0 : index
    %c0_27 = arith.constant 0 : index
    %75 = vector.load %arg3[%c0_26, %c0_27] : memref<64x128xbf16, #tpu.memory_space<vmem>>, vector<32x128xbf16>
    %76 = arith.truncf %74 : vector<128x512xf32> to vector<128x512xbf16>
    %cst_28 = arith.constant dense<0.000000e+00> : vector<32x512xf32>
    %77 = tpu.matmul %75, %76, %cst_28 {dimension_numbers = #tpu.dot_dimension_numbers<[1], [0], [0], [1], [0, 0, 1, 1], [], []>} : vector<32x128xbf16>, vector<128x512xbf16>, vector<32x512xf32> -> vector<32x512xf32>
    %c0_29 = arith.constant 0 : index
    %c6 = arith.constant 6 : index
    %78 = vector.load %arg4[%c0_29, %c6] : memref<128x14xf32, #tpu.memory_space<vmem>>, vector<32x1xf32>
    %79 = vector.broadcast %78 : vector<32x1xf32> to vector<32x512xf32>
    %80 = arith.addf %77, %79 : vector<32x512xf32>
    %81 = arith.addf %31, %80 : vector<32x512xf32>
    %c0_30 = arith.constant 0 : index
    %c7 = arith.constant 7 : index
    %82 = vector.load %arg4[%c0_30, %c7] : memref<128x14xf32, #tpu.memory_space<vmem>>, vector<32x1xf32>
    %c0_31 = arith.constant 0 : index
    %c8 = arith.constant 8 : index
    %83 = vector.load %arg4[%c0_31, %c8] : memref<128x14xf32, #tpu.memory_space<vmem>>, vector<32x1xf32>
    %cst_32 = arith.constant dense<0.000000e+00> : vector<512xf32>
    %84 = vector.multi_reduction <add>, %81, %cst_32 [0] : vector<32x512xf32> to vector<512xf32>
    %85 = vector.shape_cast %84 : vector<512xf32> to vector<1x512xf32>
    %cst_33 = arith.constant 3.200000e+01 : f32
    %86 = vector.broadcast %cst_33 : f32 to vector<1x512xf32>
    %87 = arith.divf %85, %86 : vector<1x512xf32>
    %88 = arith.mulf %81, %81 : vector<32x512xf32>
    %cst_34 = arith.constant dense<0.000000e+00> : vector<512xf32>
    %89 = vector.multi_reduction <add>, %88, %cst_34 [0] : vector<32x512xf32> to vector<512xf32>
    %90 = vector.shape_cast %89 : vector<512xf32> to vector<1x512xf32>
    %cst_35 = arith.constant 3.200000e+01 : f32
    %91 = vector.broadcast %cst_35 : f32 to vector<1x512xf32>
    %92 = arith.divf %90, %91 : vector<1x512xf32>
    %93 = arith.mulf %87, %87 : vector<1x512xf32>
    %94 = arith.subf %92, %93 : vector<1x512xf32>
    %cst_36 = arith.constant 9.99999974E-6 : f32
    %95 = vector.broadcast %cst_36 : f32 to vector<1x512xf32>
    %96 = arith.addf %94, %95 : vector<1x512xf32>
    %97 = math.rsqrt %96 : vector<1x512xf32>
    %98 = vector.broadcast %87 : vector<1x512xf32> to vector<32x512xf32>
    %99 = arith.subf %81, %98 : vector<32x512xf32>
    %100 = vector.broadcast %97 : vector<1x512xf32> to vector<32x512xf32>
    %101 = arith.mulf %99, %100 : vector<32x512xf32>
    %102 = vector.broadcast %82 : vector<32x1xf32> to vector<32x512xf32>
    %103 = arith.mulf %101, %102 : vector<32x512xf32>
    %104 = vector.broadcast %83 : vector<32x1xf32> to vector<32x512xf32>
    %105 = arith.addf %103, %104 : vector<32x512xf32>
    %c160 = arith.constant 160 : index
    %c0_37 = arith.constant 0 : index
    %106 = vector.load %arg2[%c160, %c0_37] : memref<320x32xbf16, #tpu.memory_space<vmem>>, vector<32x32xbf16>
    %107 = arith.truncf %105 : vector<32x512xf32> to vector<32x512xbf16>
    %cst_38 = arith.constant dense<0.000000e+00> : vector<32x512xf32>
    %108 = tpu.matmul %106, %107, %cst_38 {dimension_numbers = #tpu.dot_dimension_numbers<[1], [0], [0], [1], [0, 0, 1, 1], [], []>} : vector<32x32xbf16>, vector<32x512xbf16>, vector<32x512xf32> -> vector<32x512xf32>
    %c0_39 = arith.constant 0 : index
    %c9 = arith.constant 9 : index
    %109 = vector.load %arg4[%c0_39, %c9] : memref<128x14xf32, #tpu.memory_space<vmem>>, vector<32x1xf32>
    %110 = vector.broadcast %109 : vector<32x1xf32> to vector<32x512xf32>
    %111 = arith.addf %108, %110 : vector<32x512xf32>
    %112 = arith.addf %81, %111 : vector<32x512xf32>
    %c0_40 = arith.constant 0 : index
    %c10 = arith.constant 10 : index
    %113 = vector.load %arg4[%c0_40, %c10] : memref<128x14xf32, #tpu.memory_space<vmem>>, vector<32x1xf32>
    %c0_41 = arith.constant 0 : index
    %c11 = arith.constant 11 : index
    %114 = vector.load %arg4[%c0_41, %c11] : memref<128x14xf32, #tpu.memory_space<vmem>>, vector<32x1xf32>
    %cst_42 = arith.constant dense<0.000000e+00> : vector<512xf32>
    %115 = vector.multi_reduction <add>, %112, %cst_42 [0] : vector<32x512xf32> to vector<512xf32>
    %116 = vector.shape_cast %115 : vector<512xf32> to vector<1x512xf32>
    %cst_43 = arith.constant 3.200000e+01 : f32
    %117 = vector.broadcast %cst_43 : f32 to vector<1x512xf32>
    %118 = arith.divf %116, %117 : vector<1x512xf32>
    %119 = arith.mulf %112, %112 : vector<32x512xf32>
    %cst_44 = arith.constant dense<0.000000e+00> : vector<512xf32>
    %120 = vector.multi_reduction <add>, %119, %cst_44 [0] : vector<32x512xf32> to vector<512xf32>
    %121 = vector.shape_cast %120 : vector<512xf32> to vector<1x512xf32>
    %cst_45 = arith.constant 3.200000e+01 : f32
    %122 = vector.broadcast %cst_45 : f32 to vector<1x512xf32>
    %123 = arith.divf %121, %122 : vector<1x512xf32>
    %124 = arith.mulf %118, %118 : vector<1x512xf32>
    %125 = arith.subf %123, %124 : vector<1x512xf32>
    %cst_46 = arith.constant 9.99999974E-6 : f32
    %126 = vector.broadcast %cst_46 : f32 to vector<1x512xf32>
    %127 = arith.addf %125, %126 : vector<1x512xf32>
    %128 = math.rsqrt %127 : vector<1x512xf32>
    %129 = vector.broadcast %118 : vector<1x512xf32> to vector<32x512xf32>
    %130 = arith.subf %112, %129 : vector<32x512xf32>
    %131 = vector.broadcast %128 : vector<1x512xf32> to vector<32x512xf32>
    %132 = arith.mulf %130, %131 : vector<32x512xf32>
    %133 = vector.broadcast %113 : vector<32x1xf32> to vector<32x512xf32>
    %134 = arith.mulf %132, %133 : vector<32x512xf32>
    %135 = vector.broadcast %114 : vector<32x1xf32> to vector<32x512xf32>
    %136 = arith.addf %134, %135 : vector<32x512xf32>
    %c192 = arith.constant 192 : index
    %c0_47 = arith.constant 0 : index
    %137 = vector.load %arg2[%c192, %c0_47] : memref<320x32xbf16, #tpu.memory_space<vmem>>, vector<128x32xbf16>
    %138 = arith.truncf %136 : vector<32x512xf32> to vector<32x512xbf16>
    %cst_48 = arith.constant dense<0.000000e+00> : vector<128x512xf32>
    %139 = tpu.matmul %137, %138, %cst_48 {dimension_numbers = #tpu.dot_dimension_numbers<[1], [0], [0], [1], [0, 0, 1, 1], [], []>} : vector<128x32xbf16>, vector<32x512xbf16>, vector<128x512xf32> -> vector<128x512xf32>
    %c0_49 = arith.constant 0 : index
    %c12 = arith.constant 12 : index
    %140 = vector.load %arg4[%c0_49, %c12] : memref<128x14xf32, #tpu.memory_space<vmem>>, vector<128x1xf32>
    %141 = vector.broadcast %140 : vector<128x1xf32> to vector<128x512xf32>
    %142 = arith.addf %139, %141 : vector<128x512xf32>
    %cst_50 = arith.constant 5.000000e-01 : f32
    %143 = vector.broadcast %cst_50 : f32 to vector<128x512xf32>
    %144 = arith.mulf %143, %142 : vector<128x512xf32>
    %cst_51 = arith.constant 4.471500e-02 : f32
    %145 = vector.broadcast %cst_51 : f32 to vector<128x512xf32>
    %146 = arith.mulf %145, %142 : vector<128x512xf32>
    %147 = arith.mulf %146, %142 : vector<128x512xf32>
    %148 = arith.mulf %147, %142 : vector<128x512xf32>
    %149 = arith.addf %142, %148 : vector<128x512xf32>
    %cst_52 = arith.constant 0.797884583 : f32
    %150 = vector.broadcast %cst_52 : f32 to vector<128x512xf32>
    %151 = arith.mulf %150, %149 : vector<128x512xf32>
    %152 = math.tanh %151 : vector<128x512xf32>
    %cst_53 = arith.constant 1.000000e+00 : f32
    %153 = vector.broadcast %cst_53 : f32 to vector<128x512xf32>
    %154 = arith.addf %153, %152 : vector<128x512xf32>
    %155 = arith.mulf %144, %154 : vector<128x512xf32>
    %c32_54 = arith.constant 32 : index
    %c0_55 = arith.constant 0 : index
    %156 = vector.load %arg3[%c32_54, %c0_55] : memref<64x128xbf16, #tpu.memory_space<vmem>>, vector<32x128xbf16>
    %157 = arith.truncf %155 : vector<128x512xf32> to vector<128x512xbf16>
    %cst_56 = arith.constant dense<0.000000e+00> : vector<32x512xf32>
    %158 = tpu.matmul %156, %157, %cst_56 {dimension_numbers = #tpu.dot_dimension_numbers<[1], [0], [0], [1], [0, 0, 1, 1], [], []>} : vector<32x128xbf16>, vector<128x512xbf16>, vector<32x512xf32> -> vector<32x512xf32>
    %c0_57 = arith.constant 0 : index
    %c13 = arith.constant 13 : index
    %159 = vector.load %arg4[%c0_57, %c13] : memref<128x14xf32, #tpu.memory_space<vmem>>, vector<32x1xf32>
    %160 = vector.broadcast %159 : vector<32x1xf32> to vector<32x512xf32>
    %161 = arith.addf %158, %160 : vector<32x512xf32>
    %162 = arith.addf %112, %161 : vector<32x512xf32>
    %c0_58 = arith.constant 0 : index
    %c0_59 = arith.constant 0 : index
    %163 = vector.load %arg5[%c0_58, %c0_59] : memref<32x512xf32, #tpu.memory_space<vmem>>, vector<32x512xf32>
    tpu.vector_store %arg5[%c0_58, %c0_59], %162 {strides = array<i32>} : memref<32x512xf32, #tpu.memory_space<vmem>>, vector<32x512xf32>,
    return
  }
  func.func @transform_0(%arg0: i32) -> (i32, i32) {
    %c0_i32 = arith.constant 0 : i32
    %c0_i32_0 = arith.constant 0 : i32
    return %c0_i32, %arg0 : i32, i32
  }
  func.func @transform_1(%arg0: i32) -> (i32, i32) {
    %c0_i32 = arith.constant 0 : i32
    %c0_i32_0 = arith.constant 0 : i32
    %c0_i32_1 = arith.constant 0 : i32
    return %c0_i32, %c0_i32_0 : i32, i32
  }
  func.func @transform_2(%arg0: i32) -> (i32, i32) {
    %c0_i32 = arith.constant 0 : i32
    %c0_i32_0 = arith.constant 0 : i32
    %c0_i32_1 = arith.constant 0 : i32
    return %c0_i32, %c0_i32_0 : i32, i32
  }
  func.func @transform_3(%arg0: i32) -> (i32, i32) {
    %c0_i32 = arith.constant 0 : i32
    %c0_i32_0 = arith.constant 0 : i32
    %c0_i32_1 = arith.constant 0 : i32
    return %c0_i32, %c0_i32_0 : i32, i32
  }
  func.func @transform_4(%arg0: i32) -> (i32, i32) {
    %c0_i32 = arith.constant 0 : i32
    %c0_i32_0 = arith.constant 0 : i32
    return %c0_i32, %arg0 : i32, i32
  }
}

</mosaic_0001>

<bundles_post_ra>
// kernel: _lambda_.1
= control target key start
LH: loop header
LB: loop body
LE: loop exit
PB: predicated region body
PF: predicated region fallthrough
CT: control target
= control target key end

     0   :  { %s4524_s15 = smov 0   ;;  %s4526_s16 = smov 0   ;;  %s7322_s0 = inlined_call_operand.vmem [shape: f32[32,2048], index: 0, kind: input, shape index: {}]   ;;  %s7323_s1 = inlined_call_operand.vmem [shape: bf16[320,32], index: 1, kind: input, shape index: {}]   ;;  %s7324_s2 = inlined_call_operand.vmem [shape: bf16[64,128], index: 2, kind: input, shape index: {}]   ;;  %s7325_s3 = inlined_call_operand.vmem [shape: f32[128,14], index: 3, kind: input, shape index: {}]   ;;  %s7326_s4 = inlined_call_operand.vmem [shape: f32[32,2048], index: 4, kind: output, shape index: {}]  }
   0x1   :  { %s4528_s17 = smov 0  }
   0x2 LB: > { %s3846_s18 = sadd.s32 4294967295, %s4482_s17   ;;  %s4541_s19 = sadd.s32 1, %s4482_s17   ;;  %s4482_s17 = sphi %s4528_s17, %s7790_s17   ;;  %s4478_s16 = sphi %s4526_s16, %s7789_s16   ;;  %s4474_s15 = sphi %s4524_s15, %s7788_s15  }
   0x3   : > { %s18_s20 = ssub.s32 %s4482_s17, %s4541_s19  ;;  %s21_s21 = sadd.s32 1, %s4478_s16 }
   0x4   : > { %p19_p0 = scmp.eq.s32.totalorder %s18_s20, 0  ;;  %p28_p1 = scmp.ne.s32.totalorder %s4478_s16, %s4474_s15 }
   0x5   : > { %p29_p2 = scmp.eq.s32.totalorder %s4482_s17, 0  ;;  %p121_p3 = scmp.eq.s32.totalorder %s3846_s18, 3 }
   0x6   : > { %s4552_s22 = scalar_select %p19_p0, %s4478_s16, %s21_s21  }
   0x7   : > { %p30_p4 = por %p29_p2, %p28_p1  ;;  %p4554_p5 = por %p121_p3, %p28_p1 }
   0x8   : > { %p3849_p6 = scmp.ge.s32.totalorder %s4482_s17, 4 }
   0xa   : > { %152 = sbr.rel (%p3849_p6) target bundleno = 35 (0x23), region = 28 }
   0xf   : > { %155 = sbr.rel (!%p30_p4) target bundleno = 35 (0x23), region = 32  ;;  %s157_s24 = sand.u32 (%p30_p4), 1, %s4478_s16  }
  0x10   : > { %s4037_s25 = sshll.u32 (%p30_p4), %s4482_s17, 5  ;;  %s3850_s26 = sshll.u32 (%p30_p4), %s157_s24, 7 }
  0x11   : > { %s4564_s29 = scalar_lea.vmem (%p30_p4), %s7322_s0, %s4037_s25  ;;  %s159_s30 = scalar_lea.vmem (%p30_p4), [#allocation2], %s3850_s26 }
  0x12   : > { %v175_v0 = vld [vmem:[%s4564_s29] sm:$0xff] (%p30_p4)  ;;  %v177_v1 = vld [vmem:[%s4564_s29 + $0x8] sm:$0xff] (%p30_p4)  ;;  %v179_v2 = vld [vmem:[%s4564_s29 + $0x10] sm:$0xff] (%p30_p4) }
  0x13   : > { %176 = vst [vmem:[%s159_s30] sm:$0xff] (%p30_p4), %v175_v0  ;;  %v181_v3 = vld [vmem:[%s4564_s29 + $0x18] sm:$0xff] (%p30_p4)  ;;  %v183_v4 = vld [vmem:[%s4564_s29 + $0x80] sm:$0xff] (%p30_p4)  ;;  %v185_v5 = vld [vmem:[%s4564_s29 + $0x88] sm:$0xff] (%p30_p4) }
  0x14   : > { %178 = vst [vmem:[%s159_s30 + $0x8] sm:$0xff] %v177_v1  ;;  %v187_v6 = vld [vmem:[%s4564_s29 + $0x90] sm:$0xff]  ;;  %v189_v7 = vld [vmem:[%s4564_s29 + $0x98] sm:$0xff]  ;;  %v191_v8 = vld [vmem:[%s4564_s29 + $0x100] sm:$0xff] }
  0x15   : > { %180 = vst [vmem:[%s159_s30 + $0x10] sm:$0xff] %v179_v2  ;;  %v193_v9 = vld [vmem:[%s4564_s29 + $0x108] sm:$0xff]  ;;  %v195_v10 = vld [vmem:[%s4564_s29 + $0x110] sm:$0xff]  ;;  %v197_v11 = vld [vmem:[%s4564_s29 + $0x118] sm:$0xff] }
  0x16   : > { %182 = vst [vmem:[%s159_s30 + $0x18] sm:$0xff] %v181_v3  ;;  %v199_v12 = vld [vmem:[%s4564_s29 + $0x180] sm:$0xff]  ;;  %v201_v13 = vld [vmem:[%s4564_s29 + $0x188] sm:$0xff]  ;;  %v203_v14 = vld [vmem:[%s4564_s29 + $0x190] sm:$0xff] }
  0x17   : > { %184 = vst [vmem:[%s159_s30 + $0x20] sm:$0xff] %v183_v4  ;;  %v205_v15 = vld [vmem:[%s4564_s29 + $0x198] sm:$0xff] }
  0x18   : > { %186 = vst [vmem:[%s159_s30 + $0x28] sm:$0xff] %v185_v5 }
  0x19   : > { %188 = vst [vmem:[%s159_s30 + $0x30] sm:$0xff] %v187_v6 }
  0x1a   : > { %190 = vst [vmem:[%s159_s30 + $0x38] sm:$0xff] %v189_v7 }
  0x1b   : > { %192 = vst [vmem:[%s159_s30 + $0x40] sm:$0xff] %v191_v8 }
  0x1c   : > { %194 = vst [vmem:[%s159_s30 + $0x48] sm:$0xff] %v193_v9 }
  0x1d   : > { %196 = vst [vmem:[%s159_s30 + $0x50] sm:$0xff] %v195_v10 }
  0x1e   : > { %198 = vst [vmem:[%s159_s30 + $0x58] sm:$0xff] %v197_v11 }
  0x1f   : > { %200 = vst [vmem:[%s159_s30 + $0x60] sm:$0xff] %v199_v12 }
  0x20   : > { %202 = vst [vmem:[%s159_s30 + $0x68] sm:$0xff] %v201_v13 }
  0x21   : > { %204 = vst [vmem:[%s159_s30 + $0x70] sm:$0xff] %v203_v14 }
  0x22   : > { %206 = vst [vmem:[%s159_s30 + $0x78] sm:$0xff] %v205_v15 }
  0x23 PF: > { %p3853_p7 = scmp.ge.s32.totalorder %s4482_s17, 1  ;;  %p211_p8 = scmp.lt.s32.totalorder %s4482_s17, 5 }
  0x25   : > { %p212_p9 = pnand %p3853_p7, %p211_p8 }
  0x27   : > { %215 = sbr.rel (%p212_p9) target bundleno = 1705 (0x6a9), region = 55 }
  0x2c   : > { %v4587_v16 = vld [vmem:[%s7325_s3 + $0x10] sm:$0xff]  ;;  %v4484_v17 = vmov 1   ;;  %v4485_v18 = vmov 0   ;;  %v4594_v19 = vld [vmem:[%s7325_s3] sm:$0xff]  ;;  %v4600_v20 = vld [vmem:[%s7325_s3 + $0x18] sm:$0xff]  ;;  %s218_s13 = sand.u32 1, %s4474_s15  }
  0x2d   : > { %4103 = vset.pattern.permute.xlu1 %v4484_v17  ;;  %4102 = vset.pattern.permute.xlu0 %v4485_v18  ;;  %v4607_v21 = vld [vmem:[%s7325_s3 + $0x8] sm:$0xff]  ;;  %s4613_s14 = sshll.u32 %s218_s13, 7  ;;  %v4486_v39 = vmov 32.0   ;;  %vm558_vm13 = vcmask 261120  }
  0x2e   : > { %497 = vperm.xlu1 %4103, %v4587_v16   ;;  %464 = vperm.xlu0 %4102, %v4587_v16   ;;  %s4616_s20 = scalar_lea.vmem [#allocation2], %s4613_s14  ;;  %4146 = vrcp.f32 %v4486_v39  ;;  %s7256_s10 = scalar_lea.vmem [#allocation3], %s4613_s14 }
  0x2f   : > { %4104 = vset.pattern.permute.xlu2 %v4485_v18  ;;  %v4619_v22 = vld [vmem:[%s4616_s20] sm:$0xff]  ;;  %v4625_v24 = vld [vmem:[%s4616_s20 + $0x8] sm:$0xff]  ;;  %v4639_v30 = vld [vmem:[%s4616_s20 + $0x10] sm:$0xff]  ;;  %s4062_s14 = sshll.u32 (%p4554_p5), %s3846_s18, 5 }
  0x30   : > { %454 = vperm.xlu2 %4104, %v4594_v19   ;;  %v4622_v23 = vld [vmem:[%s4616_s20 + $0x20] sm:$0xff]  ;;  %v312_v26 = vmul.f32 %v4619_v22, %v4619_v22  ;;  %v4634_v28 = vld [vmem:[%s4616_s20 + $0x28] sm:$0xff]  ;;  %v313_v29 = vmul.f32 %v4625_v24, %v4625_v24  ;;  %v4642_v31 = vld [vmem:[%s4616_s20 + $0x30] sm:$0xff]  ;;  %v314_v56 = vmul.f32 %v4639_v30, %v4639_v30  ;;  %s3742_s23 = scalar_lea.vmem (%p4554_p5), %s7326_s4, %s4062_s14 }
  0x31   : > { %v265_v25 = vadd.f32 %v4622_v23, %v4619_v22  ;;  %v316_v27 = vmul.f32 %v4622_v23, %v4622_v23  ;;  %v4645_v32 = vld [vmem:[%s4616_s20 + $0x40] sm:$0xff]  ;;  %v4648_v33 = vld [vmem:[%s4616_s20 + $0x48] sm:$0xff]  ;;  %v274_v34 = vadd.f32 %v4634_v28, %v4625_v24  ;;  %v317_v35 = vmul.f32 %v4634_v28, %v4634_v28  ;;  %v4655_v36 = vld [vmem:[%s4616_s20 + $0x50] sm:$0xff] }
  0x32   : > { %v283_v37 = vadd.f32 %v4642_v31, %v4639_v30  ;;  %v320_v40 = vmul.f32 %v4645_v32, %v4645_v32  ;;  %v4663_v42 = vld [vmem:[%s4616_s20 + $0x60] sm:$0xff]  ;;  %v4666_v43 = vld [vmem:[%s4616_s20 + $0x68] sm:$0xff]  ;;  %v321_v45 = vmul.f32 %v4648_v33, %v4648_v33  ;;  %v4672_v47 = vld [vmem:[%s4616_s20 + $0x70] sm:$0xff]  ;;  %v318_v61 = vmul.f32 %v4642_v31, %v4642_v31 }
  0x33   : > { %v266_v38 = vadd.f32 %v265_v25, %v4645_v32  ;;  %v328_v41 = vadd.f32 %v316_v27, %v312_v26  ;;  %v275_v44 = vadd.f32 %v274_v34, %v4648_v33  ;;  %v337_v46 = vadd.f32 %v317_v35, %v313_v29  ;;  %v4685_v57 = vld [vmem:[%s4616_s20 + $0x18] sm:$0xff] }
  0x34   : > { %v284_v48 = vadd.f32 %v283_v37, %v4655_v36  ;;  %v324_v50 = vmul.f32 %v4663_v42, %v4663_v42  ;;  %v325_v52 = vmul.f32 %v4666_v43, %v4666_v43  ;;  %v4688_v58 = vld [vmem:[%s4616_s20 + $0x38] sm:$0xff]  ;;  %v322_v62 = vmul.f32 %v4655_v36, %v4655_v36  ;;  %v4147_v3 = vpop.eup %4146 }
  0x35   : > { %v267_v49 = vadd.f32 %v266_v38, %v4663_v42  ;;  %v329_v51 = vadd.f32 %v328_v41, %v320_v40  ;;  %v276_v53 = vadd.f32 %v275_v44, %v4666_v43  ;;  %v338_v54 = vadd.f32 %v337_v46, %v321_v45  ;;  %v4695_v2 = vld [vmem:[%s4616_s20 + $0x58] sm:$0xff] }
  0x36   : > { %501 = vperm.xlu1 %4103, %v4600_v20   ;;  %469 = vperm.xlu0 %4102, %v4600_v20   ;;  %v285_v55 = vadd.f32 %v284_v48, %v4672_v47  ;;  %v326_v5 = vmul.f32 %v4672_v47, %v4672_v47  ;;  %v346_v6 = vadd.f32 %v318_v61, %v314_v56  ;;  %v302_v8 = vmul.f32 32.0, %v4147_v3  ;;  %v4702_v11 = vld [vmem:[%s4616_s20 + $0x78] sm:$0xff] }
  0x37   : > { %v268_v59 = vrot.slane %v267_v49, 4  ;;  %v330_v60 = vadd.f32 %v329_v51, %v324_v50  ;;  %v277_v63 = vrot.slane %v276_v53, 4  ;;  %v339_v0 = vadd.f32 %v338_v54, %v325_v52 }
  0x38   : > { %459 = vperm.xlu2 %4104, %v4607_v21   ;;  %v286_v1 = vrot.slane %v285_v55, 4  ;;  %v292_v7 = vadd.f32 %v4688_v58, %v4685_v57  ;;  %v347_v14 = vadd.f32 %v346_v6, %v322_v62  ;;  %v303_v26 = vsub.f32 1.0, %v302_v8 }
  0x39   : > { %v269_v4 = vadd.f32 %v268_v59, %v267_v49  ;;  %v331_v9 = vrot.slane %v330_v60, 4  ;;  %v278_v10 = vadd.f32 %v277_v63, %v276_v53  ;;  %v340_v12 = vrot.slane %v339_v0, 4 }
  0x3a   : > { %v287_v13 = vadd.f32 %v286_v1, %v285_v55  ;;  %v293_v15 = vadd.f32 %v292_v7, %v4695_v2  ;;  %v348_v18 = vadd.f32 %v347_v14, %v326_v5  ;;  %v304_v41 = vmul.f32 %v4147_v3, %v303_v26 }
  0x3b   : > { %v332_v27 = vadd.f32 %v331_v9, %v330_v60  ;;  %v279_v29 = vrot.slane %v278_v10, 2  ;;  %v341_v34 = vadd.f32 %v340_v12, %v339_v0  ;;  %v315_v51 = vmul.f32 %v4685_v57, %v4685_v57 }
  0x3c   : > { %v294_v25 = vadd.f32 %v293_v15, %v4702_v11  ;;  %v288_v35 = vrot.slane %v287_v13, 2  ;;  %v349_v37 = vrot.slane %v348_v18, 4  ;;  %v305_v53 = vadd.f32 %v4147_v3, %v304_v41 }
  0x3d   : > { %v333_v44 = vrot.slane %v332_v27, 2  ;;  %v280_v45 = vadd.f32 %v279_v29, %v278_v10  ;;  %v342_v46 = vrot.slane %v341_v34, 2  ;;  %v319_v56 = vmul.f32 %v4688_v58, %v4688_v58 }
  0x3e   : > { %4105 = vset.pattern.permute.xlu0 %v4484_v17  ;;  %493 = vperm.xlu1 %4103, %v4607_v21   ;;  %v270_v17 = vrot.slane %v269_v4, 2  ;;  %v295_v38 = vrot.slane %v294_v25, 4  ;;  %v350_v40 = vadd.f32 %v349_v37, %v348_v18  ;;  %v289_v48 = vadd.f32 %v288_v35, %v287_v13 }
  0x3f   : > { %489 = vperm.xlu0 %4105, %v4594_v19   ;;  %v334_v54 = vadd.f32 %v333_v44, %v332_v27  ;;  %v281_v55 = vrot.slane %v280_v45, 1  ;;  %v343_v59 = vadd.f32 %v342_v46, %v341_v34  ;;  %v323_v62 = vmul.f32 %v4695_v2, %v4695_v2 }
  0x40   : > { %v271_v39 = vadd.f32 %v270_v17, %v269_v4  ;;  %v296_v49 = vadd.f32 %v295_v38, %v294_v25  ;;  %v351_v50 = vrot.slane %v350_v40, 2  ;;  %v290_v60 = vrot.slane %v289_v48, 1 }
  0x41   : > { %vm306_vm0 = vweird.f32 %v4147_v3  ;;  %v327_v0 = vmul.f32 %v4702_v11, %v4702_v11  ;;  %v355_v1 = vadd.f32 %v319_v56, %v315_v51  ;;  %v335_v5 = vrot.slane %v334_v54, 1 }
  0x42   : > { %v272_v52 = vrot.slane %v271_v39, 1  ;;  %v297_v61 = vrot.slane %v296_v49, 2  ;;  %v352_v63 = vadd.f32 %v351_v50, %v350_v40  ;;  %v4714_v7 = vsel %vm306_vm0, %v4147_v3, %v305_v53 }
  0x43   : > { %v356_v6 = vadd.f32 %v355_v1, %v323_v62  ;;  %7475 = vst [vmem:[#allocation4_spill] sm:$0xff] %v4714_v7  ;;  %v282_v8 = vadd.f32 %v281_v55, %v280_v45  ;;  %v344_v9 = vrot.slane %v343_v59, 1  ;;  %v291_v12 = vadd.f32 %v290_v60, %v289_v48 }
  0x44   : > { %v273_v4 = vadd.f32 %v272_v52, %v271_v39  ;;  %v298_v10 = vadd.f32 %v297_v61, %v296_v49  ;;  %v353_v13 = vrot.slane %v352_v63, 1  ;;  %v336_v17 = vadd.f32 %v335_v5, %v334_v54 }
  0x45   : > { %v357_v14 = vadd.f32 %v356_v6, %v327_v0  ;;  %v4720_v25 = vmul.f32 %v4714_v7, %v282_v8  ;;  %v345_v26 = vadd.f32 %v344_v9, %v343_v59  ;;  %v4723_v29 = vmul.f32 %v4714_v7, %v291_v12 }
  0x46   : > { %v4717_v15 = vmul.f32 %v4714_v7, %v273_v4  ;;  %v299_v27 = vrot.slane %v298_v10, 1  ;;  %v354_v3 = vadd.f32 %v353_v13, %v352_v63  ;;  %v364_v35 = vmul.f32 %v336_v17, %v4714_v7 }
  0x47   : > { %v358_v18 = vrot.slane %v357_v14, 4  ;;  %v365_v39 = vmul.f32 %v345_v26, %v4714_v7  ;;  %v369_v40 = vmul.f32 %v4720_v25, %v4720_v25  ;;  %v370_v45 = vmul.f32 %v4723_v29, %v4723_v29 }
  0x48   : > { %v368_v37 = vmul.f32 %v4717_v15, %v4717_v15  ;;  %v300_v41 = vadd.f32 %v299_v27, %v298_v10  ;;  %v366_v44 = vmul.f32 %v354_v3, %v4714_v7 }
  0x49   : > { %v359_v34 = vadd.f32 %v358_v18, %v357_v14  ;;  %v373_v50 = vsub.f32 %v365_v39, %v369_v40 }
  0x4a   : > { %v372_v48 = vsub.f32 %v364_v35, %v368_v37  ;;  %v4735_v51 = vmul.f32 %v4714_v7, %v300_v41  ;;  %v374_v52 = vsub.f32 %v366_v44, %v370_v45  ;;  %v428_v44 = vsub.f32 %v4645_v32, %v4717_v15 }
  0x4b   : > { %v360_v38 = vrot.slane %v359_v34, 2  ;;  %v377_v55 = vadd.f32 1e-05, %v373_v50 }
  0x4c   : > { %v376_v54 = vadd.f32 1e-05, %v372_v48  ;;  %v371_v56 = vmul.f32 %v4735_v51, %v4735_v51  ;;  %v378_v59 = vadd.f32 1e-05, %v374_v52  ;;  %v430_v48 = vsub.f32 %v4655_v36, %v4723_v29 }
  0x4d   : > { %v361_v46 = vadd.f32 %v360_v38, %v359_v34  ;;  %vm396_vm3 = vweird.f32 %v377_v55 }
  0x4e   : > { %4148 = vrsqrt.f32 %v376_v54  ;;  %vm386_vm1 = vweird.f32 %v376_v54  ;;  %vm406_vm5 = vweird.f32 %v378_v59 }
  0x4f   : > { %v362_v49 = vrot.slane %v361_v46, 1  ;;  %4150 = vrsqrt.f32 %v377_v55 }
  0x50   : > { %4152 = vrsqrt.f32 %v378_v59 }
  0x51   : > { %v363_v53 = vadd.f32 %v362_v49, %v361_v46  ;;  %v429_v46 = vsub.f32 %v4648_v33, %v4720_v25  ;;  %v431_v49 = vsub.f32 %v4695_v2, %v4735_v51 }
  0x53   : > { %v367_v60 = vmul.f32 %v363_v53, %v4714_v7 }
  0x54   : > { %v4149_v63 = vpop.eup %4148 }
  0x55   : > { %v375_v61 = vsub.f32 %v367_v60, %v371_v56  ;;  %v4151_v0 = vpop.eup %4150  ;;  %v381_v4 = vmul.f32 %v4149_v63, %v376_v54  ;;  %vm387_vm2 = vweird.f32 %v4149_v63  ;;  %v432_v60 = vsub.f32 %v4663_v42, %v4717_v15 }
  0x56   : > { %v4153_v1 = vpop.eup %4152  ;;  %v391_v5 = vmul.f32 %v4151_v0, %v377_v55  ;;  %vm397_vm4 = vweird.f32 %v4151_v0  ;;  %vm388_vm7 = vmor %vm386_vm1, %vm387_vm2 }
  0x57   : > { %v379_v62 = vadd.f32 1e-05, %v375_v61  ;;  %v401_v8 = vmul.f32 %v4153_v1, %v378_v59  ;;  %v382_v10 = vmul.f32 %v4149_v63, %v381_v4  ;;  %vm407_vm6 = vweird.f32 %v4153_v1  ;;  %vm398_vm10 = vmor %vm396_vm3, %vm397_vm4 }
  0x58   : > { %v392_v12 = vmul.f32 %v4151_v0, %v391_v5  ;;  %vm408_vm11 = vmor %vm406_vm5, %vm407_vm6  ;;  %v433_v61 = vsub.f32 %v4666_v43, %v4720_v25  ;;  %v420_v5 = vsub.f32 %v4619_v22, %v4717_v15 }
  0x59   : > { %4154 = vrsqrt.f32 %v379_v62  ;;  %v402_v13 = vmul.f32 %v4153_v1, %v401_v8  ;;  %v383_v17 = vmul.f32 0.5, %v382_v10  ;;  %vm416_vm8 = vweird.f32 %v379_v62 }
  0x5a   : > { %v393_v18 = vmul.f32 0.5, %v392_v12  ;;  %v426_v10 = vsub.f32 %v4642_v31, %v4723_v29  ;;  %v427_v12 = vsub.f32 %v4688_v58, %v4735_v51 }
  0x5b   : > { %v403_v26 = vmul.f32 0.5, %v402_v13  ;;  %v384_v3 = vsub.f32 1.5, %v383_v17 }
  0x5c   : > { %v394_v34 = vsub.f32 1.5, %v393_v18 }
  0x5d   : > { %v404_v35 = vsub.f32 1.5, %v403_v26  ;;  %v385_v38 = vmul.f32 %v4149_v63, %v384_v3 }
  0x5e   : > { %v395_v39 = vmul.f32 %v4151_v0, %v394_v34 }
  0x5f   : > { %v4155_v6 = vpop.eup %4154  ;;  %v405_v40 = vmul.f32 %v4153_v1, %v404_v35  ;;  %v389_v45 = vsel %vm388_vm7, %v4149_v63, %v385_v38  ;;  %v435_v63 = vsub.f32 %v4702_v11, %v4735_v51  ;;  %v423_v38 = vsub.f32 %v4685_v57, %v4735_v51 }
  0x60   : > { %v411_v9 = vmul.f32 %v4155_v6, %v379_v62  ;;  %vm417_vm9 = vweird.f32 %v4155_v6  ;;  %v399_v50 = vsel %vm398_vm10, %v4151_v0, %v395_v39  ;;  %v444_v56 = vmul.f32 %v428_v44, %v389_v45 }
  0x61   : > { %vm418_vm12 = vmor %vm416_vm8, %vm417_vm9  ;;  %v409_v52 = vsel %vm408_vm11, %v4153_v1, %v405_v40  ;;  %v434_v62 = vsub.f32 %v4672_v47, %v4723_v29  ;;  %v445_v0 = vmul.f32 %v429_v46, %v399_v50  ;;  %v448_v13 = vmul.f32 %v432_v60, %v389_v45 }
  0x62   : > { %v412_v14 = vmul.f32 %v4155_v6, %v411_v9  ;;  %v446_v1 = vmul.f32 %v430_v48, %v409_v52  ;;  %v425_v9 = vsub.f32 %v4634_v28, %v4720_v25  ;;  %v436_v34 = vmul.f32 %v420_v5, %v389_v45 }
  0x63   : > { %v450_v17 = vmul.f32 %v434_v62, %v409_v52  ;;  %v442_v46 = vmul.f32 %v426_v10, %v409_v52 }
  0x64   : > { %v413_v27 = vmul.f32 0.5, %v412_v14  ;;  %v449_v14 = vmul.f32 %v433_v61, %v399_v50  ;;  %v441_v44 = vmul.f32 %v425_v9, %v399_v50 }
  0x66   : > { %v414_v37 = vsub.f32 1.5, %v413_v27 }
  0x68   : > { %v415_v41 = vmul.f32 %v4155_v6, %v414_v37  ;;  %v422_v37 = vsub.f32 %v4639_v30, %v4723_v29 }
  0x6a   : > { %v419_v53 = vsel %vm418_vm12, %v4155_v6, %v415_v41  ;;  %v424_v6 = vsub.f32 %v4622_v23, %v4717_v15  ;;  %v421_v15 = vsub.f32 %v4625_v24, %v4720_v25  ;;  %v438_v5 = vmul.f32 %v422_v37, %v409_v52 }
  0x6b   : > { %v447_v4 = vmul.f32 %v431_v49, %v419_v53  ;;  %v451_v18 = vmul.f32 %v435_v63, %v419_v53  ;;  %v443_v48 = vmul.f32 %v427_v12, %v419_v53 }
  0x6c   : > { %v440_v35 = vmul.f32 %v424_v6, %v389_v45  ;;  %v437_v51 = vmul.f32 %v421_v15, %v399_v50  ;;  %v439_v6 = vmul.f32 %v423_v38, %v419_v53 }
  0x8a   : > { %v4748_v59 = vpop.permute.xlu2 %454 }
  0x8b   : > { %v473_v53 = vmul.f32 %v4748_v59, %v437_v51 }
  0x92   : > { %v460_v25 = vpop.permute.xlu2 %459 }
  0x93   : > { %v479_v50 = vmul.f32 %v460_v25, %v443_v48 }
  0xa0   : > { %v498_v54 = vpop.permute.xlu1 %497  ;;  %v465_v55 = vpop.permute.xlu0 %464 }
  0xa1   : > { %v480_v8 = vmul.f32 %v465_v55, %v444_v56  ;;  %v481_v26 = vmul.f32 %v465_v55, %v445_v0  ;;  %v482_v27 = vmul.f32 %v465_v55, %v446_v1  ;;  %v483_v3 = vmul.f32 %v465_v55, %v447_v4 }
  0xa2   : > { %v4487_v4 = vmov 2  }
  0xa3   : > { %v512_v41 = vadd.f32 %v498_v54, %v480_v8  ;;  %v513_v45 = vadd.f32 %v498_v54, %v481_v26  ;;  %v514_v61 = vadd.f32 %v498_v54, %v482_v27  ;;  %v515_v62 = vadd.f32 %v498_v54, %v483_v3  ;;  %4107 = vset.pattern.permute.xlu1 %v4487_v4 }
  0xa4   : > { %537 = vperm.xlu1 %4107, %v4607_v21   ;;  %4108 = vset.pattern.permute.xlu0 %v4487_v4  ;;  %v472_v54 = vmul.f32 %v4748_v59, %v436_v34  ;;  %v475_v26 = vmul.f32 %v4748_v59, %v439_v6 }
  0xa5   : > { %545 = vperm.xlu0 %4108, %v4600_v20   ;;  %4106 = vset.pattern.permute.xlu2 %v4487_v4 }
  0xa6   : > { %533 = vperm.xlu2 %4106, %v4594_v19  }
  0xa8   : > { %v502_v39 = vpop.permute.xlu1 %501  ;;  %v470_v40 = vpop.permute.xlu0 %469 }
  0xa9   : > { %v484_v49 = vmul.f32 %v470_v40, %v448_v13  ;;  %v485_v56 = vmul.f32 %v470_v40, %v449_v14  ;;  %v486_v55 = vmul.f32 %v470_v40, %v450_v17  ;;  %v487_v60 = vmul.f32 %v470_v40, %v451_v18 }
  0xaa   : > { %v476_v13 = vmul.f32 %v460_v25, %v440_v35  ;;  %v477_v14 = vmul.f32 %v460_v25, %v441_v44  ;;  %v478_v17 = vmul.f32 %v460_v25, %v442_v46  ;;  %v474_v18 = vmul.f32 %v4748_v59, %v438_v5  ;;  %v4038_v59 = vld [vmem:[%s7323_s1] sm:$0xff] }
  0xab   : > { %v516_v63 = vadd.f32 %v502_v39, %v484_v49  ;;  %v517_v0 = vadd.f32 %v502_v39, %v485_v56  ;;  %v518_v29 = vadd.f32 %v502_v39, %v486_v55  ;;  %v519_v1 = vadd.f32 %v502_v39, %v487_v60  ;;  %v4039_v55 = vld [vmem:[%s7323_s1 + $0x8] sm:$0xff] }
  0xac   : > { %v4488_v49 = vmov 3   ;;  %v4489_v56 = vmov 4  }
  0xad   : > { %v528_v8 = vpack.c.bf16 %v516_v63, %v512_v41  ;;  %v529_v9 = vpack.c.bf16 %v517_v0, %v513_v45  ;;  %v530_v10 = vpack.c.bf16 %v518_v29, %v514_v61  ;;  %v531_v12 = vpack.c.bf16 %v519_v1, %v515_v62  ;;  %4109 = vset.pattern.permute.xlu1 %v4488_v49 }
  0xae   : > { %846 = vperm.xlu1 %4109, %v4587_v16   ;;  %4113 = vset.pattern.permute.xlu0 %v4488_v49 }
  0xaf   : > { %571 = vmatpush.bf16.msra.mxu0 %v528_v8  ;;  %590 = vmatpush.bf16.msra.mxu1 %v529_v9 }
  0xb0   : > { %609 = vmatpush.bf16.msra.mxu2 %v530_v10  ;;  %628 = vmatpush.bf16.msra.mxu3 %v531_v12  ;;  %v494_v52 = vpop.permute.xlu1 %493 }
  0xb1   : > { %v490_v27 = vpop.permute.xlu0 %489  ;;  %v508_v3 = vadd.f32 %v494_v52, %v476_v13  ;;  %v509_v15 = vadd.f32 %v494_v52, %v477_v14  ;;  %v510_v34 = vadd.f32 %v494_v52, %v478_v17  ;;  %v511_v35 = vadd.f32 %v494_v52, %v479_v50  ;;  %838 = vperm.xlu0 %4113, %v4594_v19  }
  0xb2   : > { %v504_v37 = vadd.f32 %v490_v27, %v472_v54  ;;  %v505_v38 = vadd.f32 %v490_v27, %v473_v53  ;;  %v506_v39 = vadd.f32 %v490_v27, %v474_v18  ;;  %v507_v40 = vadd.f32 %v490_v27, %v475_v26  ;;  %541 = vperm.xlu2 %4106, %v4587_v16  }
  0xb4   : > { %v524_v41 = vpack.c.bf16 %v508_v3, %v504_v37  ;;  %v525_v44 = vpack.c.bf16 %v509_v15, %v505_v38  ;;  %v526_v46 = vpack.c.bf16 %v510_v34, %v506_v39  ;;  %v527_v48 = vpack.c.bf16 %v511_v35, %v507_v40 }
  0xb6   : > { %572 = vmatpush.bf16.msra.mxu0 %v524_v41  ;;  %591 = vmatpush.bf16.msra.mxu1 %v525_v44 }
  0xb7   : > { %610 = vmatpush.bf16.msra.mxu2 %v526_v46  ;;  %629 = vmatpush.bf16.msra.mxu3 %v527_v48 }
  0xb8   : > { %4111 = vset.pattern.permute.xlu1 %v4489_v56 }
  0xb9   : > { %3864 = vmatmul.msk.bf16.vlgmr.msra.gmra.mxu0 %vm558_vm13, %v4038_v59  ;;  %3866 = vmatmul.msk.bf16.vlgmr.msra.gmra.mxu1 %vm558_vm13, %v4038_v59 }
  0xba   : > { %3868 = vmatmul.msk.bf16.vlgmr.msra.gmra.mxu2 %vm558_vm13, %v4038_v59  ;;  %3870 = vmatmul.msk.bf16.vlgmr.msra.gmra.mxu3 %vm558_vm13, %v4038_v59 }
  0xbb   : > { %878 = vperm.xlu1 %4111, %v4587_v16   ;;  %4110 = vset.pattern.permute.xlu2 %v4488_v49 }
  0xbc   : > { %850 = vperm.xlu2 %4110, %v4600_v20  }
  0xc3   : > { %4114 = vset.pattern.permute.xlu1 %v4488_v49 }
  0xc4   : > { %842 = vperm.xlu1 %4114, %v4607_v21   ;;  %4112 = vset.pattern.permute.xlu2 %v4489_v56 }
  0xc5   : > { %882 = vperm.xlu2 %4112, %v4600_v20  }
  0xc9   : > { %3865 = vmatmul.msk.bf16.gmra.mxu0 %vm558_vm13, %v4039_v55  ;;  %3867 = vmatmul.msk.bf16.gmra.mxu1 %vm558_vm13, %v4039_v55 }
  0xca   : > { %3869 = vmatmul.msk.bf16.gmra.mxu2 %vm558_vm13, %v4039_v55  ;;  %3871 = vmatmul.msk.bf16.gmra.mxu3 %vm558_vm13, %v4039_v55 }
  0xcc   : > { %4115 = vset.pattern.permute.xlu1 %v4489_v56 }
  0xcd   : > { %874 = vperm.xlu1 %4115, %v4607_v21   ;;  %870 = vperm.xlu2 %4112, %v4594_v19  }
 0x100   : > { %v534_v45 = vpop.permute.xlu2 %533 }
 0x10c   : > { %v542_v5 = vpop.permute.xlu2 %541 }
 0x116   : > { %v538_v0 = vpop.permute.xlu1 %537 }
 0x117   : > { %v546_v34 = vpop.permute.xlu0 %545 }
 0x136   : > { %v574_v16 = vpop.f32.mrf.mxu0  ;;  %v593_v60 = vpop.f32.mrf.mxu1 }
 0x137   : > { %v575_v29 = vadd.f32 %v574_v16, %v534_v45  ;;  %v594_v1 = vadd.f32 %v593_v60, %v534_v45 }
 0x139   : > { %v4805_v20 = vadd.f32 %v575_v29, %v4619_v22  ;;  %v4808_v21 = vadd.f32 %v594_v1, %v4625_v24 }
 0x13b   : > { %7476 = vst [vmem:[#allocation5_spill] sm:$0xff] %v4805_v20  ;;  %v697_v24 = vmul.f32 %v4805_v20, %v4805_v20 }
 0x13c   : > { %7477 = vst [vmem:[#allocation6_spill] sm:$0xff] %v4808_v21 }
 0x13d   : > { %v612_v61 = vpop.f32.mrf.mxu2  ;;  %v631_v62 = vpop.f32.mrf.mxu3 }
 0x13e   : > { %v576_v25 = vpop.f32.mrf.mxu0  ;;  %v595_v63 = vpop.f32.mrf.mxu1  ;;  %v613_v54 = vadd.f32 %v612_v61, %v534_v45  ;;  %v632_v13 = vadd.f32 %v631_v62, %v534_v45 }
 0x13f   : > { %v577_v4 = vadd.f32 %v576_v25, %v538_v0  ;;  %v596_v51 = vadd.f32 %v595_v63, %v538_v0 }
 0x140   : > { %v4831_v26 = vadd.f32 %v613_v54, %v4639_v30  ;;  %v4834_v27 = vadd.f32 %v632_v13, %v4685_v57 }
 0x141   : > { %v4811_v19 = vadd.f32 %v577_v4, %v4622_v23  ;;  %v4814_v6 = vadd.f32 %v596_v51, %v4634_v28  ;;  %v698_v23 = vmul.f32 %v4808_v21, %v4808_v21 }
 0x142   : > { %7482 = vst [vmem:[#allocation11_spill] sm:$0xff] %v4831_v26  ;;  %v699_v44 = vmul.f32 %v4831_v26, %v4831_v26  ;;  %v700_v46 = vmul.f32 %v4834_v27, %v4834_v27 }
 0x143   : > { %7478 = vst [vmem:[#allocation7_spill] sm:$0xff] %v4811_v19  ;;  %v701_v28 = vmul.f32 %v4811_v19, %v4811_v19  ;;  %v702_v52 = vmul.f32 %v4814_v6, %v4814_v6  ;;  %v666_v30 = vadd.f32 %v4814_v6, %v4808_v21 }
 0x144   : > { %7479 = vst [vmem:[#allocation8_spill] sm:$0xff] %v4814_v6 }
 0x145   : > { %v614_v8 = vpop.f32.mrf.mxu2  ;;  %v633_v9 = vpop.f32.mrf.mxu3  ;;  %7483 = vst [vmem:[#allocation12_spill] sm:$0xff] %v4834_v27  ;;  %v722_v38 = vadd.f32 %v702_v52, %v698_v23 }
 0x146   : > { %v579_v10 = vpop.f32.mrf.mxu0  ;;  %v598_v12 = vpop.f32.mrf.mxu1  ;;  %v615_v50 = vadd.f32 %v614_v8, %v538_v0  ;;  %v634_v22 = vadd.f32 %v633_v9, %v538_v0 }
 0x147   : > { %v580_v14 = vadd.f32 %v579_v10, %v542_v5  ;;  %v599_v17 = vadd.f32 %v598_v12, %v542_v5 }
 0x148   : > { %v4837_v3 = vadd.f32 %v615_v50, %v4642_v31  ;;  %v4840_v15 = vadd.f32 %v634_v22, %v4688_v58 }
 0x149   : > { %v4825_v53 = vadd.f32 %v580_v14, %v4645_v32  ;;  %v4828_v18 = vadd.f32 %v599_v17, %v4648_v33  ;;  %v657_v32 = vadd.f32 %v4811_v19, %v4805_v20  ;;  %v713_v33 = vadd.f32 %v701_v28, %v697_v24 }
 0x14a   : > { %7484 = vst [vmem:[#allocation13_spill] sm:$0xff] %v4837_v3  ;;  %v703_v59 = vmul.f32 %v4837_v3, %v4837_v3  ;;  %v704_v56 = vmul.f32 %v4840_v15, %v4840_v15  ;;  %v675_v25 = vadd.f32 %v4837_v3, %v4831_v26 }
 0x14b   : > { %7480 = vst [vmem:[#allocation9_spill] sm:$0xff] %v4825_v53  ;;  %v705_v57 = vmul.f32 %v4825_v53, %v4825_v53  ;;  %v706_v31 = vmul.f32 %v4828_v18, %v4828_v18  ;;  %v658_v45 = vadd.f32 %v657_v32, %v4825_v53  ;;  %v667_v62 = vadd.f32 %v666_v30, %v4828_v18 }
 0x14c   : > { %7481 = vst [vmem:[#allocation10_spill] sm:$0xff] %v4828_v18  ;;  %v731_v1 = vadd.f32 %v703_v59, %v699_v44  ;;  %v740_v4 = vadd.f32 %v704_v56, %v700_v46 }
 0x14d   : > { %7485 = vst [vmem:[#allocation14_spill] sm:$0xff] %v4840_v15  ;;  %v617_v35 = vpop.f32.mrf.mxu2  ;;  %v636_v37 = vpop.f32.mrf.mxu3  ;;  %v714_v63 = vadd.f32 %v713_v33, %v705_v57  ;;  %v723_v0 = vadd.f32 %v722_v38, %v706_v31 }
 0x14e   : > { %v618_v39 = vadd.f32 %v617_v35, %v542_v5  ;;  %v637_v58 = vadd.f32 %v636_v37, %v542_v5  ;;  %v581_v40 = vpop.f32.mrf.mxu0  ;;  %v600_v41 = vpop.f32.mrf.mxu1 }
 0x14f   : > { %v582_v48 = vadd.f32 %v581_v40, %v546_v34  ;;  %v601_v49 = vadd.f32 %v600_v41, %v546_v34 }
 0x150   : > { %v4859_v55 = vadd.f32 %v618_v39, %v4655_v36  ;;  %v4862_v16 = vadd.f32 %v637_v58, %v4695_v2  ;;  %v684_v36 = vadd.f32 %v4840_v15, %v4834_v27 }
 0x151   : > { %v4865_v60 = vadd.f32 %v582_v48, %v4663_v42  ;;  %v4869_v61 = vadd.f32 %v601_v49, %v4666_v43 }
 0x152   : > { %7486 = vst [vmem:[#allocation15_spill] sm:$0xff] %v4859_v55  ;;  %v707_v51 = vmul.f32 %v4859_v55, %v4859_v55  ;;  %v708_v5 = vmul.f32 %v4862_v16, %v4862_v16  ;;  %v676_v14 = vadd.f32 %v675_v25, %v4859_v55  ;;  %v685_v17 = vadd.f32 %v684_v36, %v4862_v16 }
 0x153   : > { %7487 = vst [vmem:[#allocation16_spill] sm:$0xff] %v4862_v16  ;;  %v659_v2 = vadd.f32 %v658_v45, %v4865_v60  ;;  %v709_v42 = vmul.f32 %v4865_v60, %v4865_v60  ;;  %v668_v29 = vadd.f32 %v667_v62, %v4869_v61  ;;  %v710_v43 = vmul.f32 %v4869_v61, %v4869_v61 }
 0x154   : > { %7488 = vst [vmem:[#allocation17_spill] sm:$0xff] %v4865_v60  ;;  %v732_v35 = vadd.f32 %v731_v1, %v707_v51  ;;  %v741_v37 = vadd.f32 %v740_v4, %v708_v5  ;;  %v4900_v4 = vpop.permute.xlu1 %846 }
 0x155   : > { %7489 = vst [vmem:[#allocation18_spill] sm:$0xff] %v4869_v61  ;;  %v660_v8 = vrot.slane %v659_v2, 4  ;;  %v715_v9 = vadd.f32 %v714_v63, %v709_v42  ;;  %v669_v10 = vrot.slane %v668_v29, 4  ;;  %v724_v12 = vadd.f32 %v723_v0, %v710_v43  ;;  %v619_v54 = vpop.f32.mrf.mxu2  ;;  %v638_v13 = vpop.f32.mrf.mxu3 }
 0x156   : > { %v620_v50 = vadd.f32 %v619_v54, %v546_v34  ;;  %v639_v22 = vadd.f32 %v638_v13, %v546_v34 }
 0x157   : > { %v661_v24 = vadd.f32 %v660_v8, %v659_v2  ;;  %v716_v23 = vrot.slane %v715_v9, 4  ;;  %v670_v28 = vadd.f32 %v669_v10, %v668_v29  ;;  %v725_v52 = vrot.slane %v724_v12, 4 }
 0x158   : > { %v4889_v32 = vadd.f32 %v620_v50, %v4672_v47  ;;  %v4892_v33 = vadd.f32 %v639_v22, %v4702_v11 }
 0x159   : > { %v662_v30 = vrot.slane %v661_v24, 2  ;;  %v717_v38 = vadd.f32 %v716_v23, %v715_v9  ;;  %v671_v57 = vrot.slane %v670_v28, 2  ;;  %v726_v31 = vadd.f32 %v725_v52, %v724_v12 }
 0x15a   : > { %7490 = vst [vmem:[#allocation19_spill] sm:$0xff] %v4889_v32  ;;  %v677_v39 = vadd.f32 %v676_v14, %v4889_v32  ;;  %v711_v34 = vmul.f32 %v4889_v32, %v4889_v32  ;;  %v686_v58 = vadd.f32 %v685_v17, %v4892_v33  ;;  %v712_v40 = vmul.f32 %v4892_v33, %v4892_v33 }
 0x15b   : > { %7491 = vst [vmem:[#allocation20_spill] sm:$0xff] %v4892_v33  ;;  %v663_v41 = vadd.f32 %v662_v30, %v661_v24  ;;  %v718_v47 = vrot.slane %v717_v38, 2  ;;  %v672_v44 = vadd.f32 %v671_v57, %v670_v28  ;;  %v727_v46 = vrot.slane %v726_v31, 2 }
 0x15c   : > { %v678_v11 = vrot.slane %v677_v39, 4  ;;  %v733_v48 = vadd.f32 %v732_v35, %v711_v34  ;;  %v687_v49 = vrot.slane %v686_v58, 4  ;;  %v742_v59 = vadd.f32 %v741_v37, %v712_v40 }
 0x15d   : > { %v664_v56 = vrot.slane %v663_v41, 1  ;;  %v719_v45 = vadd.f32 %v718_v47, %v717_v38  ;;  %v673_v62 = vrot.slane %v672_v44, 1  ;;  %v728_v25 = vadd.f32 %v727_v46, %v726_v31 }
 0x15e   : > { %v679_v36 = vadd.f32 %v678_v11, %v677_v39  ;;  %v734_v63 = vrot.slane %v733_v48, 4  ;;  %v688_v0 = vadd.f32 %v687_v49, %v686_v58  ;;  %v743_v2 = vrot.slane %v742_v59, 4  ;;  %v4920_v49 = vpop.permute.xlu1 %878 }
 0x15f   : > { %v665_v42 = vadd.f32 %v664_v56, %v663_v41  ;;  %v720_v29 = vrot.slane %v719_v45, 1  ;;  %v674_v43 = vadd.f32 %v673_v62, %v672_v44  ;;  %v729_v1 = vrot.slane %v728_v25, 1 }
 0x160   : > { %v680_v51 = vrot.slane %v679_v36, 2  ;;  %v735_v5 = vadd.f32 %v734_v63, %v733_v48  ;;  %v689_v8 = vrot.slane %v688_v0, 2  ;;  %v744_v9 = vadd.f32 %v743_v2, %v742_v59  ;;  %v4922_v59 = vpop.permute.xlu2 %850 }
 0x161   : > { %v4903_v10 = vmul.f32 %v665_v42, %v4714_v7  ;;  %v721_v12 = vadd.f32 %v720_v29, %v719_v45  ;;  %v4906_v54 = vmul.f32 %v674_v43, %v4714_v7  ;;  %v730_v13 = vadd.f32 %v729_v1, %v728_v25  ;;  %v940_v45 = vld [vmem:[%s7325_s3 + $0x78] sm:$0xff] }
 0x162   : > { %v681_v14 = vadd.f32 %v680_v51, %v679_v36  ;;  %v736_v17 = vrot.slane %v735_v5, 2  ;;  %v690_v50 = vadd.f32 %v689_v8, %v688_v0  ;;  %v745_v22 = vrot.slane %v744_v9, 2 }
 0x163   : > { %v749_v24 = vmul.f32 %v721_v12, %v4714_v7  ;;  %v753_v23 = vmul.f32 %v4903_v10, %v4903_v10  ;;  %v750_v38 = vmul.f32 %v730_v13, %v4714_v7  ;;  %v754_v57 = vmul.f32 %v4906_v54, %v4906_v54 }
 0x164   : > { %v682_v28 = vrot.slane %v681_v14, 1  ;;  %v737_v52 = vadd.f32 %v736_v17, %v735_v5  ;;  %v691_v35 = vrot.slane %v690_v50, 1  ;;  %v746_v37 = vadd.f32 %v745_v22, %v744_v9  ;;  %v933_v22 = vld [vmem:[%s7325_s3 + $0x40] sm:$0xff] }
 0x165   : > { %v757_v30 = vsub.f32 %v749_v24, %v753_v23  ;;  %v758_v41 = vsub.f32 %v750_v38, %v754_v57  ;;  %v4490_v48 = vmov 5   ;;  %v813_v17 = vsub.f32 %v4825_v53, %v4903_v10 }
 0x166   : > { %v683_v31 = vadd.f32 %v682_v28, %v681_v14  ;;  %v738_v39 = vrot.slane %v737_v52, 1  ;;  %v692_v34 = vadd.f32 %v691_v35, %v690_v50  ;;  %v747_v58 = vrot.slane %v746_v37, 1  ;;  %4117 = vset.pattern.permute.xlu0 %v4490_v48  ;;  %4116 = vset.pattern.permute.xlu2 %v4490_v48  ;;  %v4939_v9 = vpop.permute.xlu1 %842 }
 0x167   : > { %v761_v40 = vadd.f32 1e-05, %v757_v30  ;;  %v762_v56 = vadd.f32 1e-05, %v758_v41  ;;  %4118 = vset.pattern.permute.xlu1 %v4490_v48  ;;  %1018 = vperm.xlu0 %4117, %v940_v45   ;;  %v817_v50 = vsub.f32 %v4865_v60, %v4903_v10  ;;  %v814_v28 = vsub.f32 %v4828_v18, %v4906_v54 }
 0x168   : > { %v4915_v47 = vmul.f32 %v683_v31, %v4714_v7  ;;  %v739_v44 = vadd.f32 %v738_v39, %v737_v52  ;;  %v4918_v46 = vmul.f32 %v692_v34, %v4714_v7  ;;  %v748_v11 = vadd.f32 %v747_v58, %v746_v37  ;;  %v4941_v12 = vpop.permute.xlu2 %882  ;;  %v939_v34 = vld [vmem:[%s7325_s3 + $0x70] sm:$0xff]  ;;  %v937_v58 = vld [vmem:[%s7325_s3 + $0x60] sm:$0xff] }
 0x169   : > { %4156 = vrsqrt.f32 %v761_v40  ;;  %vm771_vm15 = vweird.f32 %v761_v40  ;;  %v818_v35 = vsub.f32 %v4869_v61, %v4906_v54  ;;  %v805_v37 = vsub.f32 %v4805_v20, %v4903_v10  ;;  %1013 = vperm.xlu2 %4116, %v939_v34   ;;  %1003 = vperm.xlu1 %4118, %v937_v58  }
 0x16a   : > { %v751_v62 = vmul.f32 %v739_v44, %v4714_v7  ;;  %4158 = vrsqrt.f32 %v762_v56  ;;  %v755_v25 = vmul.f32 %v4915_v47, %v4915_v47  ;;  %v752_v36 = vmul.f32 %v748_v11, %v4714_v7 }
 0x16b   : > { %v756_v63 = vmul.f32 %v4918_v46, %v4918_v46  ;;  %v809_v30 = vsub.f32 %v4811_v19, %v4903_v10  ;;  %vm781_vm2 = vweird.f32 %v762_v56  ;;  %v806_v10 = vsub.f32 %v4808_v21, %v4906_v54 }
 0x16c   : > { %v759_v0 = vsub.f32 %v751_v62, %v755_v25  ;;  %v815_v45 = vsub.f32 %v4859_v55, %v4915_v47  ;;  %v4980_v62 = vpop.permute.xlu0 %838 }
 0x16d   : > { %v760_v2 = vsub.f32 %v752_v36, %v756_v63  ;;  %v932_v63 = vld [vmem:[%s7325_s3 + $0x38] sm:$0xff] }
 0x16e   : > { %v4933_v29 = vadd.f32 1e-05, %v759_v0 }
 0x16f   : > { %v4157_v42 = vpop.eup %4156  ;;  %v4935_v1 = vadd.f32 1e-05, %v760_v2  ;;  %983 = vperm.xlu0 %4117, %v933_v22  }
 0x170   : > { %v766_v43 = vmul.f32 %v4157_v42, %v761_v40  ;;  %v4159_v51 = vpop.eup %4158  ;;  %4160 = vrsqrt.f32 %v4933_v29  ;;  %vm772_vm14 = vweird.f32 %v4157_v42  ;;  %v810_v40 = vsub.f32 %v4814_v6, %v4906_v54 }
 0x171   : > { %v776_v8 = vmul.f32 %v4159_v51, %v762_v56  ;;  %4162 = vrsqrt.f32 %v4935_v1  ;;  %vm782_vm0 = vweird.f32 %v4159_v51  ;;  %vm773_vm1 = vmor %vm771_vm15, %vm772_vm14  ;;  %vm791_vm5 = vweird.f32 %v4933_v29 }
 0x172   : > { %v767_v5 = vmul.f32 %v4157_v42, %v766_v43  ;;  %vm783_vm3 = vmor %vm781_vm2, %vm782_vm0  ;;  %v4988_v43 = vpop.permute.xlu1 %874  ;;  %vm801_vm8 = vweird.f32 %v4935_v1 }
 0x173   : > { %v777_v14 = vmul.f32 %v4159_v51, %v776_v8 }
 0x174   : > { %v768_v13 = vmul.f32 0.5, %v767_v5  ;;  %v4990_v5 = vpop.permute.xlu2 %870 }
 0x175   : > { %v778_v23 = vmul.f32 0.5, %v777_v14 }
 0x176   : > { %v769_v24 = vsub.f32 1.5, %v768_v13  ;;  %v4952_v52 = vpop.eup %4160 }
 0x177   : > { %v4960_v38 = vpop.eup %4162  ;;  %v779_v31 = vsub.f32 1.5, %v778_v23  ;;  %v786_v39 = vmul.f32 %v4952_v52, %v4933_v29  ;;  %vm792_vm4 = vweird.f32 %v4952_v52  ;;  %978 = vperm.xlu0 %4117, %v932_v63   ;;  %v938_v23 = vld [vmem:[%s7325_s3 + $0x68] sm:$0xff] }
 0x178   : > { %v770_v57 = vmul.f32 %v4157_v42, %v769_v24  ;;  %v796_v41 = vmul.f32 %v4960_v38, %v4935_v1  ;;  %1008 = vperm.xlu2 %4116, %v938_v23   ;;  %vm793_vm6 = vmor %vm791_vm5, %vm792_vm4  ;;  %vm802_vm7 = vweird.f32 %v4960_v38  ;;  %v808_v1 = vsub.f32 %v4834_v27, %v4918_v46 }
 0x179   : > { %v780_v11 = vmul.f32 %v4159_v51, %v779_v31  ;;  %v787_v48 = vmul.f32 %v4952_v52, %v786_v39  ;;  %vm803_vm9 = vmor %vm801_vm8, %vm802_vm7 }
 0x17a   : > { %v774_v44 = vsel %vm773_vm1, %v4157_v42, %v770_v57  ;;  %v797_v42 = vmul.f32 %v4960_v38, %v796_v41 }
 0x17b   : > { %v829_v56 = vmul.f32 %v813_v17, %v774_v44  ;;  %v833_v25 = vmul.f32 %v817_v50, %v774_v44  ;;  %v821_v36 = vmul.f32 %v805_v37, %v774_v44  ;;  %v825_v54 = vmul.f32 %v809_v30, %v774_v44  ;;  %v935_v37 = vld [vmem:[%s7325_s3 + $0x50] sm:$0xff] }
 0x17c   : > { %v784_v0 = vsel %vm783_vm3, %v4159_v51, %v780_v11  ;;  %v788_v2 = vmul.f32 0.5, %v787_v48  ;;  %993 = vperm.xlu1 %4118, %v935_v37   ;;  %v819_v11 = vsub.f32 %v4889_v32, %v4915_v47  ;;  %v798_v48 = vmul.f32 0.5, %v797_v42 }
 0x17d   : > { %v861_v8 = vmul.f32 %v4900_v4, %v829_v56  ;;  %v865_v13 = vmul.f32 %v4922_v59, %v833_v25  ;;  %v830_v14 = vmul.f32 %v814_v28, %v784_v0  ;;  %v834_v17 = vmul.f32 %v818_v35, %v784_v0 }
 0x17e   : > { %v853_v50 = vmul.f32 %v4980_v62, %v821_v36  ;;  %v857_v22 = vmul.f32 %v4939_v9, %v825_v54  ;;  %v822_v51 = vmul.f32 %v806_v10, %v784_v0  ;;  %v826_v24 = vmul.f32 %v810_v40, %v784_v0  ;;  %v927_v0 = vld [vmem:[%s7325_s3 + $0x10] sm:$0xff] }
 0x17f   : > { %v893_v30 = vadd.f32 %v4920_v49, %v861_v8  ;;  %v897_v28 = vadd.f32 %v4941_v12, %v865_v13  ;;  %v862_v35 = vmul.f32 %v4900_v4, %v830_v14  ;;  %v866_v57 = vmul.f32 %v4922_v59, %v834_v17  ;;  %953 = vperm.xlu0 %4117, %v927_v0  }
 0x180   : > { %v885_v31 = vadd.f32 %v4990_v5, %v853_v50  ;;  %v889_v39 = vadd.f32 %v4988_v43, %v857_v22  ;;  %v854_v34 = vmul.f32 %v4980_v62, %v822_v51  ;;  %v858_v58 = vmul.f32 %v4939_v9, %v826_v24  ;;  %v4040_v51 = vld [vmem:[%s7323_s1 + $0x10] sm:$0xff] }
 0x181   : > { %v921_v10 = vpack.c.bf16 %v897_v28, %v893_v30  ;;  %v894_v40 = vadd.f32 %v4920_v49, %v862_v35  ;;  %v898_v41 = vadd.f32 %v4941_v12, %v866_v57  ;;  %v789_v44 = vsub.f32 1.5, %v788_v2  ;;  %v936_v35 = vld [vmem:[%s7325_s3 + $0x58] sm:$0xff] }
 0x182   : > { %v816_v56 = vsub.f32 %v4862_v16, %v4918_v46  ;;  %v886_v36 = vadd.f32 %v4990_v5, %v854_v34  ;;  %v890_v54 = vadd.f32 %v4988_v43, %v858_v58  ;;  %v799_v29 = vsub.f32 1.5, %v798_v48  ;;  %998 = vperm.xlu2 %4116, %v936_v35   ;;  %v926_v48 = vld [vmem:[%s7325_s3 + $0x8] sm:$0xff] }
 0x183   : > { %1091 = vmatpush.bf16.msrb.mxu0 %v921_v10  ;;  %v922_v25 = vpack.c.bf16 %v898_v41, %v894_v40  ;;  %v790_v63 = vmul.f32 %v4952_v52, %v789_v44  ;;  %v820_v2 = vsub.f32 %v4892_v33, %v4918_v46  ;;  %v807_v42 = vsub.f32 %v4831_v26, %v4915_v47 }
 0x184   : > { %v917_v8 = vpack.c.bf16 %v889_v39, %v885_v31  ;;  %v811_v14 = vsub.f32 %v4837_v3, %v4915_v47  ;;  %v800_v22 = vmul.f32 %v4960_v38, %v799_v29  ;;  %v918_v23 = vpack.c.bf16 %v890_v54, %v886_v36  ;;  %v931_v29 = vld [vmem:[%s7325_s3 + $0x30] sm:$0xff] }
 0x185   : > { %1140 = vmatpush.bf16.msrb.mxu1 %v922_v25  ;;  %v794_v13 = vsel %vm793_vm6, %v4952_v52, %v790_v63  ;;  %v812_v47 = vsub.f32 %v4840_v15, %v4918_v46  ;;  %v934_v46 = vld [vmem:[%s7325_s3 + $0x48] sm:$0xff] }
 0x186   : > { %v831_v17 = vmul.f32 %v815_v45, %v794_v13  ;;  %v835_v50 = vmul.f32 %v819_v11, %v794_v13  ;;  %v823_v24 = vmul.f32 %v807_v42, %v794_v13  ;;  %v827_v52 = vmul.f32 %v811_v14, %v794_v13  ;;  %988 = vperm.xlu1 %4118, %v934_v46   ;;  %v4042_v42 = vld [vmem:[%s7323_s1 + $0x20] sm:$0xff]  ;;  %v4044_v13 = vld [vmem:[%s7323_s1 + $0x30] sm:$0xff]  ;;  %v4045_v14 = vld [vmem:[%s7323_s1 + $0x38] sm:$0xff] }
 0x187   : > { %1092 = vmatpush.bf16.msrb.mxu0 %v917_v8  ;;  %v804_v30 = vsel %vm803_vm9, %v4960_v38, %v800_v22  ;;  %948 = vperm.xlu0 %4117, %v926_v48   ;;  %v4043_v8 = vld [vmem:[%s7323_s1 + $0x28] sm:$0xff] }
 0x188   : > { %v863_v45 = vmul.f32 %v4900_v4, %v831_v17  ;;  %v867_v37 = vmul.f32 %v4922_v59, %v835_v50  ;;  %v855_v28 = vmul.f32 %v4980_v62, %v823_v24  ;;  %v832_v57 = vmul.f32 %v816_v56, %v804_v30  ;;  %v4046_v17 = vld [vmem:[%s7323_s1 + $0x40] sm:$0xff]  ;;  %v4047_v22 = vld [vmem:[%s7323_s1 + $0x48] sm:$0xff] }
 0x189   : > { %1141 = vmatpush.bf16.msrb.mxu1 %v918_v23  ;;  %v836_v31 = vmul.f32 %v820_v2, %v804_v30  ;;  %v859_v39 = vmul.f32 %v4939_v9, %v827_v52  ;;  %v824_v34 = vmul.f32 %v808_v1, %v804_v30  ;;  %v828_v10 = vmul.f32 %v812_v47, %v804_v30  ;;  %v925_v2 = vld [vmem:[%s7325_s3] sm:$0xff] }
 0x18a   : > { %v895_v58 = vadd.f32 %v4920_v49, %v863_v45  ;;  %v899_v38 = vadd.f32 %v4941_v12, %v867_v37  ;;  %3904 = vmatmul.msk.bf16.vlgmr.msrb.gmra.mxu0 %vm558_vm13, %v4040_v51  ;;  %v864_v40 = vmul.f32 %v4900_v4, %v832_v57  ;;  %v887_v44 = vadd.f32 %v4990_v5, %v855_v28 }
 0x18b   : > { %v868_v41 = vmul.f32 %v4922_v59, %v836_v31  ;;  %v856_v11 = vmul.f32 %v4980_v62, %v824_v34  ;;  %v891_v25 = vadd.f32 %v4988_v43, %v859_v39  ;;  %v860_v36 = vmul.f32 %v4939_v9, %v828_v10  ;;  %v929_v9 = vld [vmem:[%s7325_s3 + $0x20] sm:$0xff]  ;;  %973 = vperm.xlu2 %4116, %v931_v29  }
 0x18c   : > { %v923_v56 = vpack.c.bf16 %v899_v38, %v895_v58  ;;  %3912 = vmatmul.msk.bf16.vlgmr.msrb.gmra.mxu1 %vm558_vm13, %v4040_v51  ;;  %v896_v4 = vadd.f32 %v4920_v49, %v864_v40 }
 0x18d   : > { %v900_v59 = vadd.f32 %v4941_v12, %v868_v41  ;;  %v888_v54 = vadd.f32 %v4990_v5, %v856_v11  ;;  %v892_v63 = vadd.f32 %v4988_v43, %v860_v36  ;;  %v919_v0 = vpack.c.bf16 %v891_v25, %v887_v44  ;;  %v4041_v12 = vld [vmem:[%s7323_s1 + $0x18] sm:$0xff]  ;;  %v930_v43 = vld [vmem:[%s7325_s3 + $0x28] sm:$0xff] }
 0x18e   : > { %1189 = vmatpush.bf16.msrb.mxu2 %v923_v56  ;;  %963 = vperm.xlu1 %4118, %v929_v9   ;;  %v928_v5 = vld [vmem:[%s7325_s3 + $0x18] sm:$0xff] }
 0x18f   : > { %v924_v62 = vpack.c.bf16 %v900_v59, %v896_v4  ;;  %v920_v49 = vpack.c.bf16 %v892_v63, %v888_v54 }
 0x191   : > { %1238 = vmatpush.bf16.msrb.mxu3 %v924_v62 }
 0x192   : > { %1190 = vmatpush.bf16.msrb.mxu2 %v919_v0 }
 0x193   : > { %968 = vperm.xlu2 %4116, %v930_v43  }
 0x195   : > { %1239 = vmatpush.bf16.msrb.mxu3 %v920_v49  ;;  %3920 = vmatmul.msk.bf16.vlgmr.msrb.gmra.mxu2 %vm558_vm13, %v4040_v51 }
 0x196   : > { %958 = vperm.xlu1 %4118, %v928_v5  }
 0x198   : > { %3928 = vmatmul.msk.bf16.vlgmr.msrb.gmra.mxu3 %vm558_vm13, %v4040_v51 }
 0x19a   : > { %3905 = vmatmul.msk.bf16.gmra.mxu0 %vm558_vm13, %v4041_v12 }
 0x19b   : > { %943 = vperm.xlu2 %4116, %v925_v2  }
 0x19c   : > { %3913 = vmatmul.msk.bf16.gmra.mxu1 %vm558_vm13, %v4041_v12 }
 0x1a5   : > { %3921 = vmatmul.msk.bf16.gmra.mxu2 %vm558_vm13, %v4041_v12 }
 0x1a8   : > { %3929 = vmatmul.msk.bf16.gmra.mxu3 %vm558_vm13, %v4041_v12 }
 0x1aa   : > { %3906 = vmatmul.msk.bf16.gmra.mxu0 %vm558_vm13, %v4042_v42 }
 0x1ac   : > { %3914 = vmatmul.msk.bf16.gmra.mxu1 %vm558_vm13, %v4042_v42 }
 0x1b5   : > { %3922 = vmatmul.msk.bf16.gmra.mxu2 %vm558_vm13, %v4042_v42 }
 0x1b8   : > { %3930 = vmatmul.msk.bf16.gmra.mxu3 %vm558_vm13, %v4042_v42 }
 0x1ba   : > { %3907 = vmatmul.msk.bf16.gmra.mxu0 %vm558_vm13, %v4043_v8 }
 0x1bc   : > { %3915 = vmatmul.msk.bf16.gmra.mxu1 %vm558_vm13, %v4043_v8 }
 0x1c3   : > { %v5129_v50 = vpop.permute.xlu2 %1013 }
 0x1c5   : > { %3923 = vmatmul.msk.bf16.gmra.mxu2 %vm558_vm13, %v4043_v8 }
 0x1c8   : > { %3931 = vmatmul.msk.bf16.gmra.mxu3 %vm558_vm13, %v4043_v8 }
 0x1ca   : > { %3908 = vmatmul.msk.bf16.gmra.mxu0 %vm558_vm13, %v4044_v13 }
 0x1cc   : > { %3916 = vmatmul.msk.bf16.gmra.mxu1 %vm558_vm13, %v4044_v13 }
 0x1d2   : > { %v5138_v51 = vpop.permute.xlu2 %1008 }
 0x1d5   : > { %3924 = vmatmul.msk.bf16.gmra.mxu2 %vm558_vm13, %v4044_v13 }
 0x1d8   : > { %3932 = vmatmul.msk.bf16.gmra.mxu3 %vm558_vm13, %v4044_v13 }
 0x1d9   : > { %v5140_v24 = vpop.permute.xlu0 %1018 }
 0x1da   : > { %3909 = vmatmul.msk.bf16.gmra.mxu0 %vm558_vm13, %v4045_v14 }
 0x1db   : > { %v5146_v47 = vpop.permute.xlu1 %1003 }
 0x1dc   : > { %3917 = vmatmul.msk.bf16.gmra.mxu1 %vm558_vm13, %v4045_v14  ;;  %v5143_v52 = vpop.permute.xlu2 %998 }
 0x1e1   : > { %v5148_v45 = vpop.permute.xlu0 %983 }
 0x1e5   : > { %3925 = vmatmul.msk.bf16.gmra.mxu2 %vm558_vm13, %v4045_v14  ;;  %v5150_v28 = vpop.permute.xlu2 %973 }
 0x1e8   : > { %3933 = vmatmul.msk.bf16.gmra.mxu3 %vm558_vm13, %v4045_v14 }
 0x1e9   : > { %v5154_v39 = vpop.permute.xlu0 %978 }
 0x1ea   : > { %3910 = vmatmul.msk.bf16.gmra.mxu0 %vm558_vm13, %v4046_v17 }
 0x1ec   : > { %3918 = vmatmul.msk.bf16.gmra.mxu1 %vm558_vm13, %v4046_v17 }
 0x1ed   : > { %v5156_v58 = vpop.permute.xlu2 %968 }
 0x1ee   : > { %v5152_v35 = vpop.permute.xlu1 %993 }
 0x1f1   : > { %v954_v44 = vpop.permute.xlu0 %953 }
 0x1f5   : > { %3926 = vmatmul.msk.bf16.gmra.mxu2 %vm558_vm13, %v4046_v17  ;;  %v944_v48 = vpop.permute.xlu2 %943 }
 0x1f8   : > { %3934 = vmatmul.msk.bf16.gmra.mxu3 %vm558_vm13, %v4046_v17  ;;  %v5158_v38 = vpop.permute.xlu1 %988 }
 0x1f9   : > { %v949_v42 = vpop.permute.xlu0 %948 }
 0x1fa   : > { %3911 = vmatmul.msk.bf16.gmra.mxu0 %vm558_vm13, %v4047_v22 }
 0x1fc   : > { %3919 = vmatmul.msk.bf16.gmra.mxu1 %vm558_vm13, %v4047_v22 }
 0x200   : > { %v5160_v56 = vpop.permute.xlu1 %963 }
 0x205   : > { %3927 = vmatmul.msk.bf16.gmra.mxu2 %vm558_vm13, %v4047_v22 }
 0x207   : > { %v1094_v23 = vpop.f32.mrf.mxu0 }
 0x208   : > { %3935 = vmatmul.msk.bf16.gmra.mxu3 %vm558_vm13, %v4047_v22  ;;  %v5181_v8 = vadd.f32 %v1094_v23, %v944_v48 }
 0x209   : > { %v1143_v1 = vpop.f32.mrf.mxu1 }
 0x20a   : > { %7494 = vst [vmem:[#allocation23_spill] sm:$0xff] %v5181_v8  ;;  %v5185_v22 = vadd.f32 %v1143_v1, %v944_v48  ;;  %v959_v1 = vpop.permute.xlu1 %958 }
 0x20c   : > { %7495 = vst [vmem:[#allocation24_spill] sm:$0xff] %v5185_v22 }
 0x20f   : > { %v1096_v37 = vpop.f32.mrf.mxu0 }
 0x211   : > { %v1145_v30 = vpop.f32.mrf.mxu1 }
 0x217   : > { %v1099_v57 = vpop.f32.mrf.mxu0 }
 0x218   : > { %v1192_v31 = vpop.f32.mrf.mxu2  ;;  %v5167_v62 = vadd.f32 %v1099_v57, %v954_v44 }
 0x219   : > { %v1148_v34 = vpop.f32.mrf.mxu1  ;;  %v5165_v59 = vadd.f32 %v1192_v31, %v944_v48  ;;  %v5188_v31 = vadd.f32 %v1096_v37, %v949_v42 }
 0x21a   : > { %v5169_v54 = vadd.f32 %v1148_v34, %v954_v44  ;;  %v1353_v5 = vmul.f32 0.044715, %v5167_v62 }
 0x21b   : > { %v1241_v46 = vpop.f32.mrf.mxu3  ;;  %7492 = vst [vmem:[#allocation21_spill] sm:$0xff] %v5165_v59  ;;  %v1347_v43 = vmul.f32 0.044715, %v5165_v59 }
 0x21c   : > { %v5175_v49 = vadd.f32 %v1241_v46, %v944_v48  ;;  %v1354_v2 = vmul.f32 0.044715, %v5169_v54  ;;  %7496 = vst [vmem:[#allocation25_spill] sm:$0xff] %v5188_v31  ;;  %v5197_v23 = vmul.f32 %v1353_v5, %v5167_v62 }
 0x21e   : > { %7493 = vst [vmem:[#allocation22_spill] sm:$0xff] %v5175_v49  ;;  %v1348_v57 = vmul.f32 0.044715, %v5175_v49 }
 0x21f   : > { %v1101_v10 = vpop.f32.mrf.mxu0 }
 0x220   : > { %v1194_v40 = vpop.f32.mrf.mxu2  ;;  %v5219_v16 = vmul.f32 %v1348_v57, %v5175_v49 }
 0x221   : > { %v1150_v41 = vpop.f32.mrf.mxu1 }
 0x222   : > { %7503 = vst [vmem:[#allocation32_spill] sm:$0xff] %v5219_v16 }
 0x223   : > { %v1243_v11 = vpop.f32.mrf.mxu3 }
 0x224   : > { %v5206_v37 = vadd.f32 %v1243_v11, %v949_v42 }
 0x226   : > { %7500 = vst [vmem:[#allocation29_spill] sm:$0xff] %v5206_v37 }
 0x227   : > { %v1104_v25 = vpop.f32.mrf.mxu0 }
 0x228   : > { %v1197_v36 = vpop.f32.mrf.mxu2  ;;  %v5163_v4 = vadd.f32 %v1104_v25, %v5160_v56  ;;  %v5194_v25 = vmul.f32 %v1347_v43, %v5165_v59 }
 0x229   : > { %v1153_v63 = vpop.f32.mrf.mxu1  ;;  %v5212_v43 = vadd.f32 %v1197_v36, %v954_v44 }
 0x22a   : > { %v5172_v0 = vadd.f32 %v1153_v63, %v5160_v56  ;;  %v1361_v9 = vmul.f32 0.044715, %v5163_v4  ;;  %7497 = vst [vmem:[#allocation26_spill] sm:$0xff] %v5194_v25  ;;  %v5200_v63 = vmul.f32 %v1354_v2, %v5169_v54 }
 0x22b   : > { %v1246_v29 = vpop.f32.mrf.mxu3  ;;  %7501 = vst [vmem:[#allocation30_spill] sm:$0xff] %v5212_v43 }
 0x22c   : > { %v1362_v12 = vmul.f32 0.044715, %v5172_v0  ;;  %v1425_v13 = vmul.f32 %v1361_v9, %v5163_v4  ;;  %v5202_v9 = vadd.f32 %v1145_v30, %v949_v42  ;;  %v5214_v5 = vadd.f32 %v1246_v29, %v954_v44 }
 0x22e   : > { %v1426_v14 = vmul.f32 %v1362_v12, %v5172_v0  ;;  %7498 = vst [vmem:[#allocation27_spill] sm:$0xff] %v5202_v9  ;;  %v5204_v12 = vadd.f32 %v1194_v40, %v949_v42  ;;  %v1489_v2 = vmul.f32 %v1425_v13, %v5163_v4  ;;  %v1356_v27 = vmul.f32 0.044715, %v5214_v5 }
 0x22f   : > { %v1106_v17 = vpop.f32.mrf.mxu0  ;;  %7502 = vst [vmem:[#allocation31_spill] sm:$0xff] %v5214_v5 }
 0x230   : > { %v1199_v34 = vpop.f32.mrf.mxu2  ;;  %v5191_v46 = vadd.f32 %v1106_v17, %v5156_v58  ;;  %7499 = vst [vmem:[#allocation28_spill] sm:$0xff] %v5204_v12  ;;  %v1490_v30 = vmul.f32 %v1426_v14, %v5172_v0  ;;  %v1553_v44 = vadd.f32 %v1489_v2, %v5163_v4  ;;  %v1351_v13 = vmul.f32 0.044715, %v5204_v12 }
 0x231   : > { %v1155_v48 = vpop.f32.mrf.mxu1  ;;  %v5221_v40 = vadd.f32 %v1199_v34, %v959_v1  ;;  %v1352_v14 = vmul.f32 0.044715, %v5206_v37 }
 0x232   : > { %v1365_v17 = vmul.f32 0.044715, %v5191_v46  ;;  %v5210_v33 = vadd.f32 %v1155_v48, %v5156_v58  ;;  %v5225_v48 = vadd.f32 %v1101_v10, %v959_v1  ;;  %v1554_v29 = vadd.f32 %v1490_v30, %v5172_v0 }
 0x233   : > { %v1248_v32 = vpop.f32.mrf.mxu3  ;;  %7504 = vst [vmem:[#allocation33_spill] sm:$0xff] %v5221_v40  ;;  %v5237_v10 = vadd.f32 %v1150_v41, %v959_v1  ;;  %v1617_v55 = vmul.f32 0.7978846, %v1553_v44  ;;  %v1359_v2 = vmul.f32 0.044715, %v5221_v40 }
 0x234   : > { %v1429_v11 = vmul.f32 %v1365_v17, %v5191_v46  ;;  %v1366_v42 = vmul.f32 0.044715, %v5210_v33  ;;  %v5227_v36 = vadd.f32 %v1248_v32, %v959_v1  ;;  %v1355_v17 = vmul.f32 0.044715, %v5212_v43 }
 0x235   : > { %4164 = vtanh.f32 %v1617_v55  ;;  %v1618_v41 = vmul.f32 0.7978846, %v1554_v29  ;;  %v1358_v18 = vmul.f32 0.044715, %v5237_v10  ;;  %v5261_v55 = vmul.f32 %v1352_v14, %v5206_v37 }
 0x236   : > { %7505 = vst [vmem:[#allocation34_spill] sm:$0xff] %v5227_v36  ;;  %v1430_v57 = vmul.f32 %v1366_v42, %v5210_v33  ;;  %v1493_v34 = vmul.f32 %v1429_v11, %v5191_v46  ;;  %v1360_v11 = vmul.f32 0.044715, %v5227_v36  ;;  %v5275_v53 = vmul.f32 %v1359_v2, %v5221_v40 }
 0x237   : > { %v1109_v32 = vpop.f32.mrf.mxu0  ;;  %7508 = vst [vmem:[#allocation37_spill] sm:$0xff] %v5261_v55 }
 0x238   : > { %v1202_v15 = vpop.f32.mrf.mxu2  ;;  %v5241_v30 = vadd.f32 %v1109_v32, %v5150_v28  ;;  %v1557_v26 = vadd.f32 %v1493_v34, %v5191_v46  ;;  %v1494_v42 = vmul.f32 %v1430_v57, %v5210_v33  ;;  %v5255_v34 = vmul.f32 %v1351_v13, %v5204_v12  ;;  %7512 = vst [vmem:[#allocation41_spill] sm:$0xff] %v5275_v53 }
 0x239   : > { %v5247_v3 = vadd.f32 %v1202_v15, %v5160_v56  ;;  %v1158_v7 = vpop.f32.mrf.mxu1  ;;  %v1357_v15 = vmul.f32 0.044715, %v5225_v48  ;;  %v5269_v13 = vmul.f32 %v1356_v27, %v5214_v5  ;;  %v5278_v14 = vmul.f32 %v1360_v11, %v5227_v36 }
 0x23a   : > { %v1369_v1 = vmul.f32 0.044715, %v5241_v30  ;;  %v5251_v44 = vadd.f32 %v1158_v7, %v5150_v28  ;;  %v1621_v61 = vmul.f32 0.7978846, %v1557_v26  ;;  %v1558_v32 = vadd.f32 %v1494_v42, %v5210_v33  ;;  %7507 = vst [vmem:[#allocation36_spill] sm:$0xff] %v5255_v34 }
 0x23b   : > { %7506 = vst [vmem:[#allocation35_spill] sm:$0xff] %v5247_v3  ;;  %v1363_v57 = vmul.f32 0.044715, %v5247_v3  ;;  %v1251_v60 = vpop.f32.mrf.mxu3  ;;  %v5266_v26 = vmul.f32 %v1355_v17, %v5212_v43  ;;  %v4165_v6 = vpop.eup %4164 }
 0x23c   : > { %v1433_v29 = vmul.f32 %v1369_v1, %v5241_v30  ;;  %v1370_v7 = vmul.f32 0.044715, %v5251_v44  ;;  %4166 = vtanh.f32 %v1621_v61  ;;  %7510 = vst [vmem:[#allocation39_spill] sm:$0xff] %v5269_v13  ;;  %v5272_v42 = vadd.f32 %v1251_v60, %v5160_v56 }
 0x23d   : > { %7509 = vst [vmem:[#allocation38_spill] sm:$0xff] %v5266_v26  ;;  %v1622_v21 = vmul.f32 0.7978846, %v1558_v32  ;;  %v5283_v17 = vmul.f32 %v1363_v57, %v5247_v3  ;;  %4168 = vtanh.f32 %v1618_v41  ;;  %v1421_v60 = vmul.f32 %v1357_v15, %v5225_v48 }
 0x23e   : > { %7511 = vst [vmem:[#allocation40_spill] sm:$0xff] %v5272_v42  ;;  %v1434_v1 = vmul.f32 %v1370_v7, %v5251_v44  ;;  %v1497_v61 = vmul.f32 %v1433_v29, %v5241_v30  ;;  %v5287_v56 = vmul.f32 %v1358_v18, %v5237_v10  ;;  %v1364_v29 = vmul.f32 0.044715, %v5272_v42 }
 0x23f   : > { %7513 = vst [vmem:[#allocation42_spill] sm:$0xff] %v5278_v14  ;;  %v1111_v27 = vpop.f32.mrf.mxu0  ;;  %4170 = vtanh.f32 %v1622_v21  ;;  %v1297_v41 = vmul.f32 0.5, %v5163_v4  ;;  %v1745_v15 = vadd.f32 1.0, %v4165_v6  ;;  %v1301_v21 = vmul.f32 0.5, %v5191_v46 }
 0x240   : > { %7514 = vst [vmem:[#allocation43_spill] sm:$0xff] %v5283_v17  ;;  %v1204_v2 = vpop.f32.mrf.mxu2  ;;  %v1112_v32 = vadd.f32 %v1111_v27, %v5154_v39  ;;  %v1561_v11 = vadd.f32 %v1497_v61, %v5241_v30  ;;  %v1498_v7 = vmul.f32 %v1434_v1, %v5251_v44  ;;  %v5312_v46 = vmul.f32 %v5200_v63, %v5169_v54 }
 0x241   : > { %v5294_v57 = vadd.f32 %v1204_v2, %v5156_v58  ;;  %v1160_v20 = vpop.f32.mrf.mxu1  ;;  %v1481_v2 = vmul.f32 %v5197_v23, %v5167_v62  ;;  %v5314_v25 = vmul.f32 %v1745_v15, %v1297_v41 }
 0x242   : > { %v4167_v19 = vpop.eup %4166  ;;  %v1373_v18 = vmul.f32 0.044715, %v1112_v32  ;;  %v1161_v55 = vadd.f32 %v1160_v20, %v5154_v39  ;;  %v1625_v37 = vmul.f32 0.7978846, %v1561_v11  ;;  %v1562_v27 = vadd.f32 %v1498_v7, %v5251_v44 }
 0x243   : > { %7515 = vst [vmem:[#allocation44_spill] sm:$0xff] %v5294_v57  ;;  %v1367_v61 = vmul.f32 0.044715, %v5294_v57  ;;  %v1253_v1 = vpop.f32.mrf.mxu3  ;;  %v1749_v16 = vadd.f32 1.0, %v4167_v19  ;;  %v4169_v34 = vpop.eup %4168  ;;  %v5307_v20 = vmul.f32 %v1364_v29, %v5272_v42  ;;  %v1485_v7 = vmul.f32 %v1421_v60, %v5225_v48 }
 0x244   : > { %v5304_v49 = vadd.f32 %v1253_v1, %v5156_v58  ;;  %v1437_v6 = vmul.f32 %v1373_v18, %v1112_v32  ;;  %v1374_v4 = vmul.f32 0.044715, %v1161_v55  ;;  %4172 = vtanh.f32 %v1625_v37  ;;  %7518 = vst [vmem:[#allocation47_spill] sm:$0xff] %v5314_v25 }
 0x245   : > { %7517 = vst [vmem:[#allocation46_spill] sm:$0xff] %v5307_v20  ;;  %v1626_v11 = vmul.f32 0.7978846, %v1562_v27  ;;  %v4171_v19 = vpop.eup %4170  ;;  %v1298_v58 = vmul.f32 0.5, %v5172_v0  ;;  %v5318_v37 = vmul.f32 %v1367_v61, %v5294_v57  ;;  %v5321_v27 = vmul.f32 %v1749_v16, %v1301_v21 }
 0x246   : > { %7516 = vst [vmem:[#allocation45_spill] sm:$0xff] %v5304_v49  ;;  %v1438_v12 = vmul.f32 %v1374_v4, %v1161_v55  ;;  %v1501_v23 = vmul.f32 %v1437_v6, %v1112_v32  ;;  %v1368_v29 = vmul.f32 0.044715, %v5304_v49  ;;  %v1302_v60 = vmul.f32 0.5, %v5210_v33 }
 0x247   : > { %7519 = vst [vmem:[#allocation48_spill] sm:$0xff] %v5318_v37  ;;  %v1114_v18 = vpop.f32.mrf.mxu0  ;;  %v1746_v41 = vadd.f32 1.0, %v4169_v34  ;;  %v1305_v61 = vmul.f32 0.5, %v5241_v30  ;;  %4174 = vtanh.f32 %v1626_v11  ;;  %v1750_v59 = vadd.f32 1.0, %v4171_v19 }
 0x248   : > { %7520 = vst [vmem:[#allocation49_spill] sm:$0xff] %v5321_v27  ;;  %v1207_v1 = vpop.f32.mrf.mxu2  ;;  %v5325_v63 = vadd.f32 %v1114_v18, %v5148_v45  ;;  %v1565_v4 = vadd.f32 %v1501_v23, %v1112_v32  ;;  %v1502_v6 = vmul.f32 %v1438_v12, %v1161_v55  ;;  %v1309_v34 = vmul.f32 0.5, %v1112_v32 }
 0x249   : > { %v5328_v15 = vadd.f32 %v1207_v1, %v5150_v28  ;;  %v1163_v0 = vpop.f32.mrf.mxu1  ;;  %v1306_v1 = vmul.f32 0.5, %v5251_v44  ;;  %v5337_v36 = vmul.f32 0.5, %v1161_v55  ;;  %v5342_v13 = vmul.f32 %v1368_v29, %v5304_v49 }
 0x24a   : > { %v4173_v14 = vpop.eup %4172  ;;  %v1377_v16 = vmul.f32 0.044715, %v5325_v63  ;;  %v5333_v33 = vadd.f32 %v1163_v0, %v5148_v45  ;;  %v1629_v21 = vmul.f32 0.7978846, %v1565_v4  ;;  %v1566_v18 = vadd.f32 %v1502_v6, %v1161_v55 }
 0x24b   : > { %7521 = vst [vmem:[#allocation50_spill] sm:$0xff] %v5328_v15  ;;  %v1371_v23 = vmul.f32 0.044715, %v5328_v15  ;;  %v1256_v12 = vpop.f32.mrf.mxu3  ;;  %v1753_v19 = vadd.f32 1.0, %v4173_v14  ;;  %v5351_v0 = vmul.f32 %v1746_v41, %v1298_v58  ;;  %v1313_v43 = vmul.f32 0.5, %v5325_v63 }
 0x24c   : > { %v1441_v30 = vmul.f32 %v1377_v16, %v5325_v63  ;;  %v1378_v11 = vmul.f32 0.044715, %v5333_v33  ;;  %4176 = vtanh.f32 %v1629_v21  ;;  %7522 = vst [vmem:[#allocation51_spill] sm:$0xff] %v5342_v13  ;;  %v5345_v4 = vadd.f32 %v1256_v12, %v5150_v28 }
 0x24d   : > { %v1630_v6 = vmul.f32 0.7978846, %v1566_v18  ;;  %7524 = vst [vmem:[#allocation53_spill] sm:$0xff] %v5351_v0  ;;  %v5353_v16 = vmul.f32 %v1750_v59, %v1302_v60  ;;  %v4175_v21 = vpop.eup %4174  ;;  %v5356_v14 = vmul.f32 %v1371_v23, %v5328_v15  ;;  %v1545_v28 = vadd.f32 %v1481_v2, %v5167_v62 }
 0x24e   : > { %7523 = vst [vmem:[#allocation52_spill] sm:$0xff] %v5345_v4  ;;  %v1442_v44 = vmul.f32 %v1378_v11, %v5333_v33  ;;  %v1505_v55 = vmul.f32 %v1441_v30, %v5325_v63  ;;  %v1549_v18 = vadd.f32 %v1485_v7, %v5225_v48  ;;  %v5363_v41 = vmul.f32 %v1753_v19, %v1305_v61 }
 0x24f   : > { %7525 = vst [vmem:[#allocation54_spill] sm:$0xff] %v5353_v16  ;;  %v1116_v29 = vpop.f32.mrf.mxu0  ;;  %4178 = vtanh.f32 %v1630_v6  ;;  %v1372_v59 = vmul.f32 0.044715, %v5345_v4  ;;  %v1609_v30 = vmul.f32 0.7978846, %v1545_v28  ;;  %v1754_v19 = vadd.f32 1.0, %v4175_v21 }
 0x250   : > { %7526 = vst [vmem:[#allocation55_spill] sm:$0xff] %v5356_v14  ;;  %v1209_v12 = vpop.f32.mrf.mxu2  ;;  %v1117_v32 = vadd.f32 %v1116_v29, %v5158_v38  ;;  %v1569_v11 = vadd.f32 %v1505_v55, %v5325_v63  ;;  %v1506_v58 = vmul.f32 %v1442_v44, %v5333_v33  ;;  %v1613_v6 = vmul.f32 0.7978846, %v1549_v18 }
 0x251   : > { %7527 = vst [vmem:[#allocation56_spill] sm:$0xff] %v5363_v41  ;;  %v5367_v60 = vadd.f32 %v1209_v12, %v5154_v39  ;;  %v1165_v23 = vpop.f32.mrf.mxu1  ;;  %4180 = vtanh.f32 %v1609_v30  ;;  %v1293_v30 = vmul.f32 0.5, %v5225_v48  ;;  %v1314_v49 = vmul.f32 0.5, %v5333_v33 }
 0x252   : > { %v4177_v2 = vpop.eup %4176  ;;  %v1381_v5 = vmul.f32 0.044715, %v1117_v32  ;;  %v1166_v7 = vadd.f32 %v1165_v23, %v5158_v38  ;;  %v1633_v53 = vmul.f32 0.7978846, %v1569_v11  ;;  %v1570_v29 = vadd.f32 %v1506_v58, %v5333_v33 }
 0x253   : > { %7528 = vst [vmem:[#allocation57_spill] sm:$0xff] %v5367_v60  ;;  %v1375_v55 = vmul.f32 0.044715, %v5367_v60  ;;  %v1258_v44 = vpop.f32.mrf.mxu3  ;;  %v1757_v61 = vadd.f32 1.0, %v4177_v2  ;;  %v1289_v11 = vmul.f32 0.5, %v5167_v62  ;;  %v5379_v58 = vmul.f32 %v1372_v59, %v5345_v4 }
 0x254   : > { %v5373_v40 = vadd.f32 %v1258_v44, %v5154_v39  ;;  %v1445_v12 = vmul.f32 %v1381_v5, %v1117_v32  ;;  %v1382_v26 = vmul.f32 0.044715, %v1166_v7  ;;  %4182 = vtanh.f32 %v1633_v53 }
 0x255   : > { %v4179_v28 = vpop.eup %4178  ;;  %v1634_v18 = vmul.f32 0.7978846, %v1570_v29  ;;  %4184 = vtanh.f32 %v1613_v6  ;;  %7530 = vst [vmem:[#allocation59_spill] sm:$0xff] %v5379_v58  ;;  %v5383_v39 = vmul.f32 %v1375_v55, %v5367_v60  ;;  %v5385_v53 = vmul.f32 %v1757_v61, %v1309_v34 }
 0x256   : > { %7529 = vst [vmem:[#allocation58_spill] sm:$0xff] %v5373_v40  ;;  %v1446_v2 = vmul.f32 %v1382_v26, %v1166_v7  ;;  %v1509_v21 = vmul.f32 %v1445_v12, %v1117_v32  ;;  %v1758_v29 = vadd.f32 1.0, %v4179_v28  ;;  %v5387_v44 = vmul.f32 %v1754_v19, %v1306_v1 }
 0x257   : > { %7531 = vst [vmem:[#allocation60_spill] sm:$0xff] %v5383_v39  ;;  %v1119_v5 = vpop.f32.mrf.mxu0  ;;  %v1376_v23 = vmul.f32 0.044715, %v5373_v40  ;;  %v4181_v12 = vpop.eup %4180  ;;  %v5397_v34 = vmul.f32 0.5, %v1117_v32  ;;  %4186 = vtanh.f32 %v1634_v18 }
 0x258   : > { %7532 = vst [vmem:[#allocation61_spill] sm:$0xff] %v5385_v53  ;;  %v1212_v62 = vpop.f32.mrf.mxu2  ;;  %v5391_v6 = vadd.f32 %v1119_v5, %v5152_v35  ;;  %v1573_v59 = vadd.f32 %v1509_v21, %v1117_v32  ;;  %v1510_v26 = vmul.f32 %v1446_v2, %v1166_v7  ;;  %v5406_v63 = vmul.f32 %v1758_v29, %v5337_v36 }
 0x259   : > { %7533 = vst [vmem:[#allocation62_spill] sm:$0xff] %v5387_v44  ;;  %v5394_v48 = vadd.f32 %v1212_v62, %v5148_v45  ;;  %v1168_v55 = vpop.f32.mrf.mxu1  ;;  %v1737_v20 = vadd.f32 1.0, %v4181_v12  ;;  %v5414_v37 = vmul.f32 %v1376_v23, %v5373_v40 }
 0x25a   : > { %v4183_v1 = vpop.eup %4182  ;;  %v1385_v61 = vmul.f32 0.044715, %v5391_v6  ;;  %v5401_v19 = vadd.f32 %v1168_v55, %v5152_v35  ;;  %v1637_v28 = vmul.f32 0.7978846, %v1573_v59  ;;  %v1574_v5 = vadd.f32 %v1510_v26, %v1166_v7  ;;  %7534 = vst [vmem:[#allocation63_spill] sm:$0xff] %v5406_v63 }
 0x25b   : > { %v4185_v21 = vpop.eup %4184  ;;  %v1379_v2 = vmul.f32 0.044715, %v5394_v48  ;;  %v1261_v13 = vpop.f32.mrf.mxu3  ;;  %v1761_v62 = vadd.f32 1.0, %v4183_v1  ;;  %v1318_v59 = vmul.f32 0.5, %v1166_v7  ;;  %7535 = vst [vmem:[#allocation64_spill] sm:$0xff] %v5414_v37 }
 0x25c   : > { %v5409_v32 = vadd.f32 %v1261_v13, %v5148_v45  ;;  %v1449_v18 = vmul.f32 %v1385_v61, %v5391_v6  ;;  %v1386_v55 = vmul.f32 0.044715, %v5401_v19  ;;  %4188 = vtanh.f32 %v1637_v28 }
 0x25d   : > { %v1638_v26 = vmul.f32 0.7978846, %v1574_v5  ;;  %v1741_v42 = vadd.f32 1.0, %v4185_v21  ;;  %v4187_v13 = vpop.eup %4186  ;;  %v5421_v29 = vmul.f32 %v1379_v2, %v5394_v48  ;;  %v5423_v61 = vmul.f32 %v1761_v62, %v1313_v43 }
 0x25e   : > { %v1450_v33 = vmul.f32 %v1386_v55, %v5401_v19  ;;  %v1513_v36 = vmul.f32 %v1449_v18, %v5391_v6  ;;  %v1380_v23 = vmul.f32 0.044715, %v5409_v32  ;;  %v1762_v55 = vadd.f32 1.0, %v4187_v13 }
 0x25f   : > { %v1121_v1 = vpop.f32.mrf.mxu0  ;;  %4190 = vtanh.f32 %v1638_v26  ;;  %v5434_v43 = vmul.f32 %v1737_v20, %v1289_v11  ;;  %v5436_v62 = vmul.f32 %v1741_v42, %v1293_v30  ;;  %v1486_v20 = vmul.f32 %v5287_v56, %v5237_v10 }
 0x260   : > { %v1214_v12 = vpop.f32.mrf.mxu2  ;;  %v1122_v28 = vadd.f32 %v1121_v1, %v5143_v52  ;;  %v1577_v5 = vadd.f32 %v1513_v36, %v5391_v6  ;;  %v1514_v21 = vmul.f32 %v1450_v33, %v5401_v19  ;;  %v5457_v40 = vmul.f32 %v1762_v55, %v1314_v49 }
 0x261   : > { %v5432_v18 = vadd.f32 %v1214_v12, %v5158_v38  ;;  %v1170_v2 = vpop.f32.mrf.mxu1  ;;  %7536 = vst [vmem:[#allocation65_spill] sm:$0xff] %v5434_v43  ;;  %v5442_v12 = vmul.f32 0.5, %v5169_v54 }
 0x262   : > { %7537 = vst [vmem:[#allocation66_spill] sm:$0xff] %v5436_v62  ;;  %v4189_v26 = vpop.eup %4188  ;;  %v1389_v7 = vmul.f32 0.044715, %v1122_v28  ;;  %v1171_v45 = vadd.f32 %v1170_v2, %v5143_v52  ;;  %v1641_v57 = vmul.f32 0.7978846, %v1577_v5  ;;  %v1578_v1 = vadd.f32 %v1514_v21, %v5401_v19 }
 0x263   : > { %v1383_v36 = vmul.f32 0.044715, %v5432_v18  ;;  %v1263_v17 = vpop.f32.mrf.mxu3  ;;  %v1765_v33 = vadd.f32 1.0, %v4189_v26  ;;  %7538 = vst [vmem:[#allocation67_spill] sm:$0xff] %v5442_v12  ;;  %v5450_v5 = vmul.f32 %v1380_v23, %v5409_v32  ;;  %v5455_v26 = vmul.f32 0.5, %v5237_v10 }
 0x264   : > { %v5447_v42 = vadd.f32 %v1263_v17, %v5158_v38  ;;  %v1453_v11 = vmul.f32 %v1389_v7, %v1122_v28  ;;  %v1390_v30 = vmul.f32 0.044715, %v1171_v45  ;;  %4192 = vtanh.f32 %v1641_v57  ;;  %7540 = vst [vmem:[#allocation69_spill] sm:$0xff] %v5457_v40 }
 0x265   : > { %v4191_v13 = vpop.eup %4190  ;;  %v1642_v21 = vmul.f32 0.7978846, %v1578_v1  ;;  %7539 = vst [vmem:[#allocation68_spill] sm:$0xff] %v5455_v26  ;;  %v5460_v38 = vmul.f32 %v1383_v36, %v5432_v18  ;;  %v5463_v57 = vmul.f32 %v1765_v33, %v5397_v34  ;;  %v1546_v7 = vadd.f32 %v5312_v46, %v5169_v54 }
 0x266   : > { %v1454_v3 = vmul.f32 %v1390_v30, %v1171_v45  ;;  %v1517_v37 = vmul.f32 %v1453_v11, %v1122_v28  ;;  %v1766_v56 = vadd.f32 1.0, %v4191_v13  ;;  %v1550_v23 = vadd.f32 %v1486_v20, %v5237_v10 }
 0x267   : > { %v1124_v17 = vpop.f32.mrf.mxu0  ;;  %v1384_v1 = vmul.f32 0.044715, %v5447_v42  ;;  %v1321_v13 = vmul.f32 0.5, %v5391_v6  ;;  %4194 = vtanh.f32 %v1642_v21  ;;  %v5475_v43 = vmul.f32 0.5, %v1122_v28 }
 0x268   : > { %v1217_v2 = vpop.f32.mrf.mxu2  ;;  %v1125_v11 = vadd.f32 %v1124_v17, %v5146_v47  ;;  %v1581_v30 = vadd.f32 %v1517_v37, %v1122_v28  ;;  %v1518_v49 = vmul.f32 %v1454_v3, %v1171_v45  ;;  %v5472_v34 = vmul.f32 %v1766_v56, %v1318_v59 }
 0x269   : > { %v1218_v55 = vadd.f32 %v1217_v2, %v5152_v35  ;;  %v1173_v36 = vpop.f32.mrf.mxu1  ;;  %v1322_v3 = vmul.f32 0.5, %v5401_v19  ;;  %v5481_v59 = vmul.f32 0.5, %v1171_v45  ;;  %v5484_v56 = vmul.f32 %v1384_v1, %v5447_v42 }
 0x26a   : > { %v4193_v33 = vpop.eup %4192  ;;  %v1393_v58 = vmul.f32 0.044715, %v1125_v11  ;;  %v1174_v54 = vadd.f32 %v1173_v36, %v5146_v47  ;;  %v1645_v10 = vmul.f32 0.7978846, %v1581_v30  ;;  %v1582_v46 = vadd.f32 %v1518_v49, %v1171_v45 }
 0x26b   : > { %v1387_v20 = vmul.f32 0.044715, %v1218_v55  ;;  %v1266_v4 = vpop.f32.mrf.mxu3  ;;  %v1769_v37 = vadd.f32 1.0, %v4193_v33  ;;  %v5496_v1 = vmul.f32 0.5, %v1218_v55  ;;  %v5506_v16 = vmul.f32 0.7978846, %v1546_v7 }
 0x26c   : > { %v5479_v2 = vadd.f32 %v1266_v4, %v5152_v35  ;;  %v1457_v6 = vmul.f32 %v1393_v58, %v1125_v11  ;;  %v1394_v21 = vmul.f32 0.044715, %v1174_v54  ;;  %4196 = vtanh.f32 %v1645_v10 }
 0x26d   : > { %v1451_v17 = vmul.f32 %v1387_v20, %v1218_v55  ;;  %v1646_v36 = vmul.f32 0.7978846, %v1582_v46  ;;  %v4195_v35 = vpop.eup %4194  ;;  %v5490_v58 = vmul.f32 0.5, %v1125_v11  ;;  %v5492_v45 = vmul.f32 0.5, %v1174_v54 }
 0x26e   : > { %v1458_v28 = vmul.f32 %v1394_v21, %v1174_v54  ;;  %v1521_v49 = vmul.f32 %v1457_v6, %v1125_v11  ;;  %v5494_v33 = vmul.f32 %v1769_v37, %v1321_v13  ;;  %v1388_v10 = vmul.f32 0.044715, %v5479_v2 }
 0x26f   : > { %v1126_v4 = vpop.f32.mrf.mxu0  ;;  %v1515_v62 = vmul.f32 %v1451_v17, %v1218_v55  ;;  %v5504_v0 = vmul.f32 0.5, %v5479_v2  ;;  %4198 = vtanh.f32 %v1646_v36 }
 0x270   : > { %v1219_v20 = vpop.f32.mrf.mxu2  ;;  %v1127_v21 = vadd.f32 %v1126_v4, %v5138_v51  ;;  %v1585_v6 = vadd.f32 %v1521_v49, %v1125_v11  ;;  %v1522_v46 = vmul.f32 %v1458_v28, %v1174_v54  ;;  %v1770_v49 = vadd.f32 1.0, %v4195_v35 }
 0x271   : > { %v5501_v30 = vadd.f32 %v1219_v20, %v5143_v52  ;;  %v1175_v19 = vpop.f32.mrf.mxu1  ;;  %7541 = vst [vmem:[#allocation70_spill] sm:$0xff] %v5504_v0  ;;  %v5510_v20 = vmul.f32 0.7978846, %v1550_v23  ;;  %v5517_v36 = vmul.f32 %v1388_v10, %v5479_v2 }
 0x272   : > { %v1397_v13 = vmul.f32 0.044715, %v1127_v21  ;;  %v1176_v37 = vadd.f32 %v1175_v19, %v5138_v51  ;;  %v1649_v39 = vmul.f32 0.7978846, %v1585_v6  ;;  %v4197_v60 = vpop.eup %4196  ;;  %v1586_v28 = vadd.f32 %v1522_v46, %v1174_v54 }
 0x273   : > { %v1391_v4 = vmul.f32 0.044715, %v5501_v30  ;;  %v1268_v11 = vpop.f32.mrf.mxu3  ;;  %v1773_v19 = vadd.f32 1.0, %v4197_v60  ;;  %v1579_v6 = vadd.f32 %v1515_v62, %v1218_v55  ;;  %v5519_v9 = vmul.f32 0.5, %v1127_v21 }
 0x274   : > { %v5513_v17 = vadd.f32 %v1268_v11, %v5143_v52  ;;  %v1461_v14 = vmul.f32 %v1397_v13, %v1127_v21  ;;  %v1398_v15 = vmul.f32 0.044715, %v1176_v37  ;;  %4200 = vtanh.f32 %v1649_v39 }
 0x275   : > { %v1455_v7 = vmul.f32 %v1391_v4, %v5501_v30  ;;  %v1650_v25 = vmul.f32 0.7978846, %v1586_v28  ;;  %v5522_v52 = vmul.f32 %v1770_v49, %v1322_v3  ;;  %v5525_v39 = vmul.f32 0.5, %v5501_v30  ;;  %v4199_v46 = vpop.eup %4198 }
 0x276   : > { %v1462_v27 = vmul.f32 %v1398_v15, %v1176_v37  ;;  %v1525_v54 = vmul.f32 %v1461_v14, %v1127_v21  ;;  %v1392_v23 = vmul.f32 0.044715, %v5513_v17  ;;  %v5529_v15 = vmul.f32 %v1773_v19, %v5475_v43 }
 0x277   : > { %v1129_v35 = vpop.f32.mrf.mxu0  ;;  %4202 = vtanh.f32 %v1650_v25  ;;  %v5532_v4 = vmul.f32 0.5, %v1176_v37  ;;  %v1519_v25 = vmul.f32 %v1455_v7, %v5501_v30  ;;  %v5535_v3 = vmul.f32 0.7978846, %v1579_v6 }
 0x278   : > { %v1222_v13 = vpop.f32.mrf.mxu2  ;;  %v1130_v60 = vadd.f32 %v1129_v35, %v5129_v50  ;;  %v1589_v62 = vadd.f32 %v1525_v54, %v1127_v21  ;;  %v1526_v55 = vmul.f32 %v1462_v27, %v1176_v37  ;;  %v5539_v21 = vmul.f32 0.5, %v5513_v17 }
 0x279   : > { %v1223_v14 = vadd.f32 %v1222_v13, %v5146_v47  ;;  %v1178_v10 = vpop.f32.mrf.mxu1  ;;  %v5542_v27 = vmul.f32 %v1392_v23, %v5513_v17  ;;  %v1774_v35 = vadd.f32 1.0, %v4199_v46 }
 0x27a   : > { %v4201_v11 = vpop.eup %4200  ;;  %v1401_v28 = vmul.f32 0.044715, %v1130_v60  ;;  %v1179_v49 = vadd.f32 %v1178_v10, %v5129_v50  ;;  %v1653_v44 = vmul.f32 0.7978846, %v1589_v62  ;;  %7542 = vst [vmem:[#allocation71_spill] sm:$0xff] %v5539_v21  ;;  %v1590_v54 = vadd.f32 %v1526_v55, %v1176_v37 }
 0x27b   : > { %v1395_v43 = vmul.f32 0.044715, %v1223_v14  ;;  %v1271_v19 = vpop.f32.mrf.mxu3  ;;  %v1777_v22 = vadd.f32 1.0, %v4201_v11  ;;  %v5549_v31 = vmul.f32 0.5, %v1130_v60  ;;  %v5552_v37 = vadd.f32 %v1519_v25, %v5501_v30 }
 0x27c   : > { %v5545_v13 = vadd.f32 %v1271_v19, %v5146_v47  ;;  %v1465_v7 = vmul.f32 %v1401_v28, %v1130_v60  ;;  %v1402_v6 = vmul.f32 0.044715, %v1179_v49  ;;  %4204 = vtanh.f32 %v1653_v44 }
 0x27d   : > { %v4203_v10 = vpop.eup %4202  ;;  %v1459_v62 = vmul.f32 %v1395_v43, %v1223_v14  ;;  %v1654_v21 = vmul.f32 0.7978846, %v1590_v54  ;;  %v5556_v55 = vmul.f32 %v1774_v35, %v5481_v59  ;;  %v5559_v54 = vmul.f32 0.5, %v1179_v49 }
 0x27e   : > { %v1529_v0 = vmul.f32 %v1465_v7, %v1130_v60  ;;  %v1466_v23 = vmul.f32 %v1402_v6, %v1179_v49  ;;  %v1396_v47 = vmul.f32 0.044715, %v5545_v13  ;;  %v5563_v30 = vmul.f32 %v1777_v22, %v5490_v58 }
 0x27f   : > { %v1131_v46 = vpop.f32.mrf.mxu0  ;;  %4206 = vtanh.f32 %v1654_v21  ;;  %v1523_v28 = vmul.f32 %v1459_v62, %v1223_v14  ;;  %v1778_v25 = vadd.f32 1.0, %v4203_v10 }
 0x280   : > { %v1593_v19 = vadd.f32 %v1529_v0, %v1130_v60  ;;  %v1530_v43 = vmul.f32 %v1466_v23, %v1179_v49  ;;  %v1224_v44 = vpop.f32.mrf.mxu2  ;;  %v1132_v11 = vadd.f32 %v1131_v46, %v5140_v24  ;;  %v1460_v60 = vmul.f32 %v1396_v47, %v5545_v13 }
 0x281   : > { %v1225_v7 = vadd.f32 %v1224_v44, %v5138_v51  ;;  %v1180_v6 = vpop.f32.mrf.mxu1  ;;  %v1587_v63 = vadd.f32 %v1523_v28, %v1223_v14  ;;  %v5569_v44 = vmul.f32 0.5, %v1223_v14 }
 0x282   : > { %v1657_v21 = vmul.f32 0.7978846, %v1593_v19  ;;  %v1594_v41 = vadd.f32 %v1530_v43, %v1179_v49  ;;  %v1405_v59 = vmul.f32 0.044715, %v1132_v11  ;;  %v1181_v35 = vadd.f32 %v1180_v6, %v5140_v24  ;;  %v4205_v0 = vpop.eup %4204 }
 0x283   : > { %v1399_v62 = vmul.f32 0.044715, %v1225_v7  ;;  %v1273_v23 = vpop.f32.mrf.mxu3  ;;  %v5573_v19 = vmul.f32 %v1778_v25, %v5492_v45  ;;  %v1651_v43 = vmul.f32 0.7978846, %v1587_v63  ;;  %v1781_v26 = vadd.f32 1.0, %v4205_v0 }
 0x284   : > { %v1658_v53 = vmul.f32 0.7978846, %v1594_v41  ;;  %v1274_v22 = vadd.f32 %v1273_v23, %v5138_v51  ;;  %v1469_v58 = vmul.f32 %v1405_v59, %v1132_v11  ;;  %v1406_v10 = vmul.f32 0.044715, %v1181_v35 }
 0x285   : > { %v4207_v28 = vpop.eup %4206  ;;  %v1463_v49 = vmul.f32 %v1399_v62, %v1225_v7  ;;  %4208 = vtanh.f32 %v1657_v21  ;;  %v5576_v41 = vmul.f32 0.5, %v5545_v13  ;;  %v1341_v12 = vmul.f32 0.5, %v1132_v11 }
 0x286   : > { %v1400_v47 = vmul.f32 0.044715, %v1274_v22  ;;  %v1533_v6 = vmul.f32 %v1469_v58, %v1132_v11  ;;  %v1470_v8 = vmul.f32 %v1406_v10, %v1181_v35  ;;  %4210 = vtanh.f32 %v1658_v53 }
 0x287   : > { %v1782_v46 = vadd.f32 1.0, %v4207_v28  ;;  %v1527_v14 = vmul.f32 %v1463_v49, %v1225_v7  ;;  %v5579_v45 = vmul.f32 0.5, %v1225_v7  ;;  %4212 = vtanh.f32 %v1651_v43 }
 0x288   : > { %v1464_v51 = vmul.f32 %v1400_v47, %v1274_v22  ;;  %v1534_v59 = vmul.f32 %v1470_v8, %v1181_v35  ;;  %v1227_v23 = vpop.f32.mrf.mxu2  ;;  %v1597_v62 = vadd.f32 %v1533_v6, %v1132_v11  ;;  %v5582_v53 = vmul.f32 %v1781_v26, %v5519_v9 }
 0x289   : > { %v1228_v21 = vadd.f32 %v1227_v23, %v5129_v50  ;;  %v1591_v63 = vadd.f32 %v1527_v14, %v1225_v7  ;;  %v1524_v0 = vmul.f32 %v1460_v60, %v5545_v13  ;;  %v5586_v8 = vmul.f32 %v1782_v46, %v5532_v4 }
 0x28a   : > { %v1661_v25 = vmul.f32 0.7978846, %v1597_v62  ;;  %v1598_v58 = vadd.f32 %v1534_v59, %v1181_v35  ;;  %v1528_v47 = vmul.f32 %v1464_v51, %v1274_v22  ;;  %v1342_v23 = vmul.f32 0.5, %v1181_v35 }
 0x28b   : > { %v4209_v10 = vpop.eup %4208  ;;  %v1403_v28 = vmul.f32 0.044715, %v1228_v21  ;;  %v1276_v49 = vpop.f32.mrf.mxu3  ;;  %v1655_v11 = vmul.f32 0.7978846, %v1591_v63  ;;  %v1588_v9 = vadd.f32 %v1524_v0, %v5545_v13  ;;  %v5592_v4 = vmul.f32 0.5, %v1274_v22 }
 0x28c   : > { %v1277_v6 = vadd.f32 %v1276_v49, %v5129_v50  ;;  %4214 = vtanh.f32 %v1661_v25  ;;  %v1785_v7 = vadd.f32 1.0, %v4209_v10  ;;  %v1662_v43 = vmul.f32 0.7978846, %v1598_v58  ;;  %v4211_v14 = vpop.eup %4210 }
 0x28d   : > { %v1467_v59 = vmul.f32 %v1403_v28, %v1228_v21  ;;  %4216 = vtanh.f32 %v1655_v11  ;;  %v4213_v46 = vpop.eup %4212  ;;  %v5596_v62 = vmul.f32 0.5, %v1228_v21  ;;  %v1592_v63 = vadd.f32 %v1528_v47, %v1274_v22 }
 0x28e   : > { %v1404_v26 = vmul.f32 0.044715, %v1277_v6  ;;  %4218 = vtanh.f32 %v1662_v43  ;;  %v1849_v58 = vmul.f32 %v1785_v7, %v5549_v31  ;;  %v1786_v13 = vadd.f32 1.0, %v4211_v14 }
 0x28f   : > { %v1531_v51 = vmul.f32 %v1467_v59, %v1228_v21  ;;  %v1652_v0 = vmul.f32 0.7978846, %v1588_v9  ;;  %v1656_v49 = vmul.f32 0.7978846, %v1592_v63  ;;  %4220 = vtanh.f32 %v5535_v3 }
 0x290   : > { %v1468_v25 = vmul.f32 %v1404_v26, %v1277_v6  ;;  %v1229_v35 = vpop.f32.mrf.mxu2  ;;  %v1779_v59 = vadd.f32 1.0, %v4213_v46  ;;  %v1647_v50 = vmul.f32 0.7978846, %v5552_v37  ;;  %v1516_v31 = vmul.f32 %v5517_v36, %v5479_v2 }
 0x291   : > { %v1595_v10 = vadd.f32 %v1531_v51, %v1228_v21  ;;  %v1230_v28 = vadd.f32 %v1229_v35, %v5140_v24  ;;  %4222 = vtanh.f32 %v1652_v0  ;;  %v1520_v35 = vmul.f32 %v5542_v27, %v5513_v17 }
 0x292   : > { %v4215_v11 = vpop.eup %4214  ;;  %v1532_v43 = vmul.f32 %v1468_v25, %v1277_v6  ;;  %4224 = vtanh.f32 %v1656_v49  ;;  %v1850_v25 = vmul.f32 %v1786_v13, %v5559_v54  ;;  %v1580_v27 = vadd.f32 %v1516_v31, %v5479_v2 }
 0x293   : > { %v4217_v60 = vpop.eup %4216  ;;  %v1659_v22 = vmul.f32 0.7978846, %v1595_v10  ;;  %v1407_v47 = vmul.f32 0.044715, %v1230_v28  ;;  %v1278_v26 = vpop.f32.mrf.mxu3  ;;  %v1789_v40 = vadd.f32 1.0, %v4215_v11  ;;  %v7543_v2 = vpack.c.bf16 %v5582_v53, %v5563_v30 }
 0x294   : > { %v4219_v21 = vpop.eup %4218  ;;  %v1596_v7 = vadd.f32 %v1532_v43, %v1277_v6  ;;  %v1279_v14 = vadd.f32 %v1278_v26, %v5140_v24  ;;  %v1783_v9 = vadd.f32 1.0, %v4217_v60  ;;  %v5608_v60 = vmul.f32 0.5, %v1277_v6 }
 0x295   : > { %v1471_v3 = vmul.f32 %v1407_v47, %v1230_v28  ;;  %v1853_v51 = vmul.f32 %v1789_v40, %v1341_v12  ;;  %v1790_v46 = vadd.f32 1.0, %v4219_v21  ;;  %4226 = vtanh.f32 %v1659_v22  ;;  %v4221_v0 = vpop.eup %4220 }
 0x296   : > { %v1660_v63 = vmul.f32 0.7978846, %v1596_v7  ;;  %v1408_v37 = vmul.f32 0.044715, %v1279_v14  ;;  %4228 = vtanh.f32 %v1647_v50  ;;  %v5611_v40 = vmul.f32 %v1779_v59, %v5569_v44 }
 0x297   : > { %v1535_v10 = vmul.f32 %v1471_v3, %v1230_v28  ;;  %v1889_v36 = vpack.c.bf16 %v1853_v51, %v1849_v58  ;;  %v1854_v11 = vmul.f32 %v1790_v46, %v1342_v23  ;;  %v4223_v43 = vpop.eup %4222  ;;  %v5614_v54 = vmul.f32 %v1783_v9, %v5579_v45 }
 0x298   : > { %v1472_v24 = vmul.f32 %v1408_v37, %v1279_v14  ;;  %4230 = vtanh.f32 %v1660_v63  ;;  %v4225_v13 = vpop.eup %4224  ;;  %v1771_v23 = vadd.f32 1.0, %v4221_v0  ;;  %v1584_v50 = vadd.f32 %v1520_v35, %v5513_v17 }
 0x299   : > { %1921 = vmatpush.bf16.msra.mxu0 %v1889_v36  ;;  %v1890_v12 = vpack.c.bf16 %v1854_v11, %v1850_v25  ;;  %v1599_v49 = vadd.f32 %v1535_v10, %v1230_v28  ;;  %4232 = vtanh.f32 %v5506_v16  ;;  %v1780_v44 = vadd.f32 1.0, %v4223_v43 }
 0x29a   : > { %v1536_v58 = vmul.f32 %v1472_v24, %v1279_v14  ;;  %v1784_v59 = vadd.f32 1.0, %v4225_v13  ;;  %v1644_v47 = vmul.f32 0.7978846, %v1580_v27  ;;  %v1343_v26 = vmul.f32 0.5, %v1230_v28 }
 0x29b   : > { %v4227_v6 = vpop.eup %4226  ;;  %1940 = vmatpush.bf16.msra.mxu1 %v1890_v12  ;;  %v1663_v22 = vmul.f32 0.7978846, %v1599_v49  ;;  %v1648_v7 = vmul.f32 0.7978846, %v1584_v50  ;;  %4234 = vtanh.f32 %v5510_v20  ;;  %v1344_v31 = vmul.f32 0.5, %v1279_v14 }
 0x29c   : > { %v1600_v21 = vadd.f32 %v1536_v58, %v1279_v14  ;;  %v4229_v45 = vpop.eup %4228  ;;  %v1787_v17 = vadd.f32 1.0, %v4227_v6  ;;  %v1887_v16 = vpack.c.bf16 %v5614_v54, %v5611_v40  ;;  %v5626_v51 = vmul.f32 %v1784_v59, %v5592_v4  ;;  %v7550_v6 = vld [vmem:[#allocation67_spill] sm:$0xff]  ;;  %v7551_v59 = vld [vmem:[#allocation68_spill] sm:$0xff] }
 0x29d   : > { %1922 = vmatpush.bf16.msra.mxu0 %v7543_v2  ;;  %4236 = vtanh.f32 %v1663_v22  ;;  %v1775_v28 = vadd.f32 1.0, %v4229_v45  ;;  %v7544_v20 = vpack.c.bf16 %v5586_v8, %v5573_v19  ;;  %v5632_v30 = vmul.f32 %v1780_v44, %v5576_v41  ;;  %v7554_v45 = vld [vmem:[#allocation56_spill] sm:$0xff] }
 0x29e   : > { %v4231_v9 = vpop.eup %4230  ;;  %v1664_v3 = vmul.f32 0.7978846, %v1600_v21  ;;  %4238 = vtanh.f32 %v1644_v47  ;;  %v5635_v53 = vmul.f32 %v1771_v23, %v5496_v1  ;;  %v1507_v14 = vmul.f32 %v5421_v29, %v5394_v48  ;;  %v7548_v23 = vld [vmem:[#allocation69_spill] sm:$0xff] }
 0x29f   : > { %1941 = vmatpush.bf16.msra.mxu1 %v7544_v20  ;;  %4240 = vtanh.f32 %v1648_v7  ;;  %v4233_v46 = vpop.eup %4232  ;;  %v5640_v4 = vmul.f32 0.5, %v5394_v48  ;;  %v5643_v63 = vmul.f32 0.5, %v5432_v18  ;;  %v1511_v19 = vmul.f32 %v5460_v38, %v5432_v18 }
 0x2a0   : > { %4242 = vtanh.f32 %v1664_v3  ;;  %v7545_v41 = vpack.c.bf16 %v5529_v15, %v5494_v33  ;;  %v1851_v1 = vmul.f32 %v1787_v17, %v5596_v62  ;;  %v1788_v8 = vadd.f32 1.0, %v4231_v9  ;;  %v7556_v17 = vld [vmem:[#allocation25_spill] sm:$0xff]  ;;  %v7557_v3 = vld [vmem:[#allocation70_spill] sm:$0xff] }
 0x2a1   : > { %v5652_v29 = vmul.f32 %v1775_v28, %v5525_v39  ;;  %v1571_v37 = vadd.f32 %v1507_v14, %v5394_v48  ;;  %v4235_v25 = vpop.eup %4234  ;;  %v1888_v35 = vpack.c.bf16 %v5626_v51, %v5632_v30  ;;  %v1575_v0 = vadd.f32 %v1511_v19, %v5432_v18 }
 0x2a2   : > { %1923 = vmatpush.bf16.msra.mxu0 %v7545_v41  ;;  %v1508_v38 = vmul.f32 %v5450_v5, %v5409_v32  ;;  %v1512_v33 = vmul.f32 %v5484_v56, %v5447_v42  ;;  %v7546_v62 = vpack.c.bf16 %v5556_v55, %v5522_v52  ;;  %v1738_v39 = vadd.f32 1.0, %v4233_v46  ;;  %v7558_v46 = vld [vmem:[#allocation24_spill] sm:$0xff] }
 0x2a3   : > { %v4237_v15 = vpop.eup %4236  ;;  %v1742_v10 = vadd.f32 1.0, %v4235_v25  ;;  %v1635_v48 = vmul.f32 0.7978846, %v1571_v37  ;;  %v5666_v36 = vmul.f32 0.5, %v5409_v32  ;;  %v1639_v18 = vmul.f32 0.7978846, %v1575_v0 }
 0x2a4   : > { %1942 = vmatpush.bf16.msra.mxu1 %v7546_v62  ;;  %v4239_v11 = vpop.eup %4238  ;;  %v1791_v43 = vadd.f32 1.0, %v4237_v15  ;;  %v1572_v24 = vadd.f32 %v1508_v38, %v5409_v32  ;;  %v1576_v5 = vadd.f32 %v1512_v33, %v5447_v42  ;;  %v7547_v56 = vpack.c.bf16 %v5463_v57, %v5423_v61  ;;  %v7562_v25 = vld [vmem:[#allocation71_spill] sm:$0xff] }
 0x2a5   : > { %v4241_v12 = vpop.eup %4240  ;;  %v1852_v52 = vmul.f32 %v1788_v8, %v5608_v60  ;;  %v1883_v55 = vpack.c.bf16 %v5652_v29, %v5635_v53  ;;  %4244 = vtanh.f32 %v1635_v48  ;;  %v5677_v49 = vmul.f32 0.5, %v5447_v42  ;;  %v7552_v42 = vld [vmem:[#allocation23_spill] sm:$0xff]  ;;  %v7560_v8 = vld [vmem:[#allocation62_spill] sm:$0xff] }
 0x2a6   : > { %1924 = vmatpush.bf16.msra.mxu0 %v7547_v56  ;;  %v4243_v27 = vpop.eup %4242  ;;  %v1855_v13 = vmul.f32 %v1791_v43, %v1343_v26  ;;  %v1772_v58 = vadd.f32 1.0, %v4239_v11  ;;  %4246 = vtanh.f32 %v1639_v18  ;;  %v1636_v32 = vmul.f32 0.7978846, %v1572_v24  ;;  %v7553_v26 = vld [vmem:[#allocation61_spill] sm:$0xff]  ;;  %v7563_v33 = vld [vmem:[#allocation27_spill] sm:$0xff] }
 0x2a7   : > { %v7549_v50 = vpack.c.bf16 %v5472_v34, %v7548_v23  ;;  %v1792_v61 = vadd.f32 1.0, %v4243_v27  ;;  %v1776_v57 = vadd.f32 1.0, %v4241_v12  ;;  %v1802_v60 = vmul.f32 %v1738_v39, %v7550_v6  ;;  %v7564_v43 = vld [vmem:[#allocation49_spill] sm:$0xff]  ;;  %v7565_v18 = vld [vmem:[#allocation47_spill] sm:$0xff] }
 0x2a8   : > { %v1640_v22 = vmul.f32 0.7978846, %v1576_v5  ;;  %v1891_v44 = vpack.c.bf16 %v1855_v13, %v1851_v1  ;;  %v1806_v47 = vmul.f32 %v1742_v10, %v7551_v59  ;;  %4248 = vtanh.f32 %v1636_v32  ;;  %v7559_v1 = vld [vmem:[#allocation63_spill] sm:$0xff] }
 0x2a9   : > { %1943 = vmatpush.bf16.msra.mxu1 %v7549_v50  ;;  %v1345_v21 = vmul.f32 0.044715, %v7552_v42  ;;  %v1856_v7 = vmul.f32 %v1792_v61, %v1344_v31  ;;  %v7555_v2 = vpack.c.bf16 %v7553_v26, %v7554_v45  ;;  %v5689_v34 = vmul.f32 0.5, %v7552_v42  ;;  %v7568_v27 = vld [vmem:[#allocation55_spill] sm:$0xff]  ;;  %v7569_v61 = vld [vmem:[#allocation57_spill] sm:$0xff]  ;;  %v7574_v45 = vld [vmem:[#allocation66_spill] sm:$0xff] }
 0x2aa   : > { %4250 = vtanh.f32 %v1640_v22  ;;  %v1349_v9 = vmul.f32 0.044715, %v7556_v17  ;;  %1959 = vmatpush.bf16.msra.mxu2 %v1891_v44  ;;  %v1836_v28 = vmul.f32 %v1772_v58, %v7557_v3  ;;  %v5694_v20 = vmul.f32 0.5, %v7556_v17  ;;  %v7571_v22 = vld [vmem:[#allocation54_spill] sm:$0xff]  ;;  %v7572_v44 = vld [vmem:[#allocation53_spill] sm:$0xff]  ;;  %v7578_v29 = vld [vmem:[#allocation59_spill] sm:$0xff] }
 0x2ab   : > { %1925 = vmatpush.bf16.msra.mxu0 %v7555_v2  ;;  %v1409_v14 = vmul.f32 %v1345_v21, %v7552_v42  ;;  %v1346_v31 = vmul.f32 0.044715, %v7558_v46  ;;  %v4245_v19 = vpop.eup %4244  ;;  %v1892_v41 = vpack.c.bf16 %v1856_v7, %v1852_v52  ;;  %v7561_v37 = vpack.c.bf16 %v7559_v1, %v7560_v8  ;;  %v7567_v52 = vld [vmem:[#allocation50_spill] sm:$0xff]  ;;  %v7575_v2 = vld [vmem:[#allocation65_spill] sm:$0xff] }
 0x2ac   : > { %v1840_v0 = vmul.f32 %v1776_v57, %v7562_v25  ;;  %v1413_v38 = vmul.f32 %v1349_v9, %v7556_v17  ;;  %v1350_v15 = vmul.f32 0.044715, %v7563_v33  ;;  %v4247_v62 = vpop.eup %4246  ;;  %v1866_v39 = vpack.c.bf16 %v1806_v47, %v1802_v60  ;;  %v7570_v57 = vld [vmem:[#allocation60_spill] sm:$0xff]  ;;  %v7579_v8 = vld [vmem:[#allocation58_spill] sm:$0xff] }
 0x2ad   : > { %1944 = vmatpush.bf16.msra.mxu1 %v7561_v37  ;;  %v1473_v10 = vmul.f32 %v1409_v14, %v7552_v42  ;;  %v5706_v48 = vmul.f32 0.5, %v7558_v46  ;;  %v1410_v11 = vmul.f32 %v1346_v31, %v7558_v46  ;;  %1978 = vmatpush.bf16.msra.mxu3 %v1892_v41  ;;  %v7566_v24 = vpack.c.bf16 %v7564_v43, %v7565_v18  ;;  %v7580_v37 = vld [vmem:[#allocation64_spill] sm:$0xff] }
 0x2ae   : > { %v1767_v5 = vadd.f32 1.0, %v4247_v62  ;;  %v1477_v12 = vmul.f32 %v1413_v38, %v7556_v17  ;;  %v1414_v56 = vmul.f32 %v1350_v15, %v7563_v33  ;;  %v1499_v13 = vmul.f32 %v7568_v27, %v7567_v52  ;;  %v4249_v58 = vpop.eup %4248  ;;  %1960 = vmatpush.bf16.msra.mxu2 %v1887_v16  ;;  %v7582_v38 = vld [vmem:[#allocation43_spill] sm:$0xff]  ;;  %v7583_v15 = vld [vmem:[#allocation44_spill] sm:$0xff] }
 0x2af   : > { %1926 = vmatpush.bf16.msra.mxu0 %v7566_v24  ;;  %v1763_v32 = vadd.f32 1.0, %v4245_v19  ;;  %v1537_v23 = vadd.f32 %v1473_v10, %v7552_v42  ;;  %v1474_v50 = vmul.f32 %v1410_v11, %v7558_v46  ;;  %v1503_v6 = vmul.f32 %v7570_v57, %v7569_v61  ;;  %v7584_v62 = vld [vmem:[#allocation48_spill] sm:$0xff] }
 0x2b0   : > { %v4251_v60 = vpop.eup %4250  ;;  %v7573_v59 = vpack.c.bf16 %v7571_v22, %v7572_v44  ;;  %v1884_v47 = vpack.c.bf16 %v1840_v0, %v1836_v28  ;;  %v1831_v21 = vmul.f32 %v1767_v5, %v5643_v63  ;;  %v1541_v7 = vadd.f32 %v1477_v12, %v7556_v17  ;;  %v7581_v0 = vld [vmem:[#allocation35_spill] sm:$0xff]  ;;  %v7585_v12 = vld [vmem:[#allocation40_spill] sm:$0xff] }
 0x2b1   : > { %v1478_v40 = vmul.f32 %v1414_v56, %v7563_v33  ;;  %v1768_v54 = vadd.f32 1.0, %v4251_v60  ;;  %v1601_v16 = vmul.f32 0.7978846, %v1537_v23  ;;  %v1538_v42 = vadd.f32 %v1474_v50, %v7558_v46  ;;  %1979 = vmatpush.bf16.msra.mxu3 %v1888_v35  ;;  %v7586_v56 = vld [vmem:[#allocation46_spill] sm:$0xff]  ;;  %v7587_v23 = vld [vmem:[#allocation45_spill] sm:$0xff]  ;;  %v7588_v50 = vld [vmem:[#allocation51_spill] sm:$0xff] }
 0x2b2   : > { %1945 = vmatpush.bf16.msra.mxu1 %v7573_v59  ;;  %v1563_v26 = vadd.f32 %v1499_v13, %v7567_v52  ;;  %v7576_v9 = vpack.c.bf16 %v7574_v45, %v7575_v2  ;;  %v1764_v3 = vadd.f32 1.0, %v4249_v58  ;;  %v1605_v63 = vmul.f32 0.7978846, %v1541_v7  ;;  %1961 = vmatpush.bf16.msra.mxu2 %v1883_v55 }
 0x2b3   : > { %v1286_v17 = vmul.f32 0.5, %v7563_v33  ;;  %v1542_v28 = vadd.f32 %v1478_v40, %v7563_v33  ;;  %v1827_v14 = vmul.f32 %v1763_v32, %v5640_v4  ;;  %4252 = vtanh.f32 %v1601_v16  ;;  %v7577_v4 = vld [vmem:[#allocation52_spill] sm:$0xff] }
 0x2b4   : > { %1927 = vmatpush.bf16.msra.mxu0 %v7576_v9  ;;  %v1602_v46 = vmul.f32 0.7978846, %v1538_v42  ;;  %v1567_v51 = vadd.f32 %v1503_v6, %v7569_v61  ;;  %v1832_v30 = vmul.f32 %v1768_v54, %v5677_v49  ;;  %4254 = vtanh.f32 %v1605_v63 }
 0x2b5   : > { %v1606_v35 = vmul.f32 0.7978846, %v1542_v28  ;;  %v1627_v31 = vmul.f32 0.7978846, %v1563_v26  ;;  %v1879_v19 = vpack.c.bf16 %v1831_v21, %v1827_v14  ;;  %v1307_v41 = vmul.f32 0.5, %v7567_v52  ;;  %1980 = vmatpush.bf16.msra.mxu3 %v1884_v47 }
 0x2b6   : > { %1946 = vmatpush.bf16.msra.mxu1 %v1866_v39  ;;  %4256 = vtanh.f32 %v1602_v46  ;;  %v1631_v1 = vmul.f32 0.7978846, %v1567_v51  ;;  %v1828_v53 = vmul.f32 %v1764_v3, %v5666_v36  ;;  %v1500_v55 = vmul.f32 %v7578_v29, %v7577_v4  ;;  %v7593_v29 = vld [vmem:[#allocation31_spill] sm:$0xff] }
 0x2b7   : > { %4258 = vtanh.f32 %v1606_v35  ;;  %v1504_v25 = vmul.f32 %v7580_v37, %v7579_v8  ;;  %1962 = vmatpush.bf16.msra.mxu2 %v1879_v19  ;;  %v1311_v49 = vmul.f32 0.5, %v7569_v61  ;;  %v1491_v33 = vmul.f32 %v7582_v38, %v7581_v0  ;;  %v7590_v35 = vld [vmem:[#allocation38_spill] sm:$0xff] }
 0x2b8   : > { %4260 = vtanh.f32 %v1627_v31  ;;  %v1495_v39 = vmul.f32 %v7584_v62, %v7583_v15  ;;  %v1880_v10 = vpack.c.bf16 %v1832_v30, %v1828_v53  ;;  %v1564_v36 = vadd.f32 %v1500_v55, %v7577_v4  ;;  %v7589_v30 = vld [vmem:[#allocation30_spill] sm:$0xff]  ;;  %v7592_v53 = vld [vmem:[#allocation41_spill] sm:$0xff]  ;;  %v7594_v55 = vld [vmem:[#allocation39_spill] sm:$0xff] }
 0x2b9   : > { %4262 = vtanh.f32 %v1631_v1  ;;  %v1568_v11 = vadd.f32 %v1504_v25, %v7579_v8  ;;  %v4253_v43 = vpop.eup %4252  ;;  %v5759_v18 = vmul.f32 0.5, %v7577_v4  ;;  %v1555_v24 = vadd.f32 %v1491_v33, %v7581_v0  ;;  %v7591_v1 = vld [vmem:[#allocation33_spill] sm:$0xff]  ;;  %v7595_v38 = vld [vmem:[#allocation34_spill] sm:$0xff] }
 0x2ba   : > { %v1559_v5 = vadd.f32 %v1495_v39, %v7583_v15  ;;  %v1492_v52 = vmul.f32 %v7586_v56, %v7585_v12  ;;  %v4255_v27 = vpop.eup %4254  ;;  %1981 = vmatpush.bf16.msra.mxu3 %v1880_v10  ;;  %v1729_v13 = vadd.f32 1.0, %v4253_v43  ;;  %v1628_v58 = vmul.f32 0.7978846, %v1564_v36  ;;  %v7596_v33 = vld [vmem:[#allocation42_spill] sm:$0xff] }
 0x2bb   : > { %v1632_v32 = vmul.f32 0.7978846, %v1568_v11  ;;  %v1496_v61 = vmul.f32 %v7588_v50, %v7587_v23  ;;  %v1733_v6 = vadd.f32 1.0, %v4255_v27  ;;  %v1619_v60 = vmul.f32 0.7978846, %v1555_v24 }
 0x2bc   : > { %v4257_v57 = vpop.eup %4256  ;;  %v1623_v22 = vmul.f32 0.7978846, %v1559_v5  ;;  %v1556_v44 = vadd.f32 %v1492_v52, %v7585_v12  ;;  %v1793_v47 = vmul.f32 %v1729_v13, %v5689_v34  ;;  %4264 = vtanh.f32 %v1628_v58 }
 0x2bd   : > { %v4259_v59 = vpop.eup %4258  ;;  %v1730_v21 = vadd.f32 1.0, %v4257_v57  ;;  %v1560_v7 = vadd.f32 %v1496_v61, %v7587_v23  ;;  %v1797_v54 = vmul.f32 %v1733_v6, %v5694_v20  ;;  %4266 = vtanh.f32 %v1632_v32  ;;  %v5776_v20 = vld [vmem:[%s7324_s2] sm:$0xff] }
 0x2be   : > { %v4261_v40 = vpop.eup %4260  ;;  %v1734_v16 = vadd.f32 1.0, %v4259_v59  ;;  %v1620_v42 = vmul.f32 0.7978846, %v1556_v44  ;;  %4268 = vtanh.f32 %v1619_v60  ;;  %v1312_v14 = vmul.f32 0.5, %v7579_v8  ;;  %v7597_v44 = vld [vmem:[#allocation21_spill] sm:$0xff]  ;;  %v7598_v59 = vld [vmem:[#allocation26_spill] sm:$0xff] }
 0x2bf   : > { %v4263_v26 = vpop.eup %4262  ;;  %v1794_v45 = vmul.f32 %v1730_v21, %v5706_v48  ;;  %v1755_v2 = vadd.f32 1.0, %v4261_v40  ;;  %v1624_v9 = vmul.f32 0.7978846, %v1560_v7  ;;  %v1861_v3 = vpack.c.bf16 %v1797_v54, %v1793_v47  ;;  %v7599_v40 = vld [vmem:[#allocation28_spill] sm:$0xff] }
 0x2c0   : > { %v1798_v63 = vmul.f32 %v1734_v16, %v1286_v17  ;;  %v1759_v28 = vadd.f32 1.0, %v4263_v26  ;;  %4270 = vtanh.f32 %v1623_v22  ;;  %v1299_v46 = vmul.f32 0.5, %v7581_v0  ;;  %v7600_v54 = vld [vmem:[#allocation36_spill] sm:$0xff]  ;;  %v7601_v26 = vld [vmem:[#allocation22_spill] sm:$0xff] }
 0x2c1   : > { %v1819_v34 = vmul.f32 %v1755_v2, %v1307_v41  ;;  %4272 = vtanh.f32 %v1620_v42  ;;  %1928 = vmatpush.bf16.msra.mxu0 %v1861_v3  ;;  %v1483_v17 = vmul.f32 %v7590_v35, %v7589_v30  ;;  %v1303_v19 = vmul.f32 0.5, %v7583_v15 }
 0x2c2   : > { %v1862_v48 = vpack.c.bf16 %v1798_v63, %v1794_v45  ;;  %v1823_v51 = vmul.f32 %v1759_v28, %v1311_v49  ;;  %4274 = vtanh.f32 %v1624_v9  ;;  %v4265_v31 = vpop.eup %4264  ;;  %v1300_v41 = vmul.f32 0.5, %v7585_v12  ;;  %v7602_v45 = vld [vmem:[#allocation32_spill] sm:$0xff]  ;;  %v7603_v63 = vld [vmem:[#allocation29_spill] sm:$0xff] }
 0x2c3   : > { %v1487_v4 = vmul.f32 %v7592_v53, %v7591_v1  ;;  %v1484_v8 = vmul.f32 %v7594_v55, %v7593_v29  ;;  %v4267_v37 = vpop.eup %4266  ;;  %v1756_v0 = vadd.f32 1.0, %v4265_v31  ;;  %v1547_v49 = vadd.f32 %v1483_v17, %v7589_v30  ;;  %v7604_v28 = vld [vmem:[#allocation37_spill] sm:$0xff] }
 0x2c4   : > { %1947 = vmatpush.bf16.msra.mxu1 %v1862_v48  ;;  %v1875_v25 = vpack.c.bf16 %v1823_v51, %v1819_v34  ;;  %v1488_v62 = vmul.f32 %v7596_v33, %v7595_v38  ;;  %v4269_v39 = vpop.eup %4268  ;;  %v1760_v10 = vadd.f32 1.0, %v4267_v37  ;;  %1929 = vmatmul.bf16.vlgmr.msra.gmra.mxu0 %v5776_v20  ;;  %v1304_v15 = vmul.f32 0.5, %v7587_v23 }
 0x2c5   : > { %v1551_v36 = vadd.f32 %v1487_v4, %v7591_v1  ;;  %v1548_v11 = vadd.f32 %v1484_v8, %v7593_v29  ;;  %v1820_v24 = vmul.f32 %v1756_v0, %v5759_v18  ;;  %v1747_v5 = vadd.f32 1.0, %v4269_v39  ;;  %v5814_v4 = vld [vmem:[%s7325_s3] sm:$0xff] }
 0x2c6   : > { %v4271_v43 = vpop.eup %4270  ;;  %1963 = vmatpush.bf16.msra.mxu2 %v1875_v25  ;;  %v1611_v12 = vmul.f32 0.7978846, %v1547_v49  ;;  %v1552_v56 = vadd.f32 %v1488_v62, %v7595_v38  ;;  %v1824_v27 = vmul.f32 %v1760_v10, %v1312_v14  ;;  %v1475_v47 = vmul.f32 %v7598_v59, %v7597_v44  ;;  %v5831_v62 = vld [vmem:[%s7325_s3 + $0x8] sm:$0xff] }
 0x2c7   : > { %v4273_v52 = vpop.eup %4272  ;;  %1948 = vmatmul.bf16.vlgmr.msra.gmra.mxu1 %v5776_v20  ;;  %v1751_v13 = vadd.f32 1.0, %v4271_v43  ;;  %v1615_v58 = vmul.f32 0.7978846, %v1551_v36  ;;  %v1612_v32 = vmul.f32 0.7978846, %v1548_v11  ;;  %v1811_v50 = vmul.f32 %v1747_v5, %v1299_v46 }
 0x2c8   : > { %v4275_v23 = vpop.eup %4274  ;;  %v1748_v61 = vadd.f32 1.0, %v4273_v52  ;;  %4276 = vtanh.f32 %v1611_v12  ;;  %v1616_v57 = vmul.f32 0.7978846, %v1552_v56  ;;  %v1876_v6 = vpack.c.bf16 %v1824_v27, %v1820_v24  ;;  %v5837_v56 = vld [vmem:[%s7325_s3 + $0x18] sm:$0xff] }
 0x2c9   : > { %v1815_v60 = vmul.f32 %v1751_v13, %v1303_v19  ;;  %v1752_v22 = vadd.f32 1.0, %v4275_v23  ;;  %4278 = vtanh.f32 %v1615_v58  ;;  %v1479_v16 = vmul.f32 %v7600_v54, %v7599_v40 }
 0x2ca   : > { %v1812_v18 = vmul.f32 %v1748_v61, %v1300_v41  ;;  %4280 = vtanh.f32 %v1612_v32  ;;  %1982 = vmatpush.bf16.msra.mxu3 %v1876_v6  ;;  %v1539_v42 = vadd.f32 %v1475_v47, %v7597_v44  ;;  %v1476_v2 = vmul.f32 %v7602_v45, %v7601_v26 }
 0x2cb   : > { %v1871_v21 = vpack.c.bf16 %v1815_v60, %v1811_v50  ;;  %v1816_v7 = vmul.f32 %v1752_v22, %v1304_v15  ;;  %4282 = vtanh.f32 %v1616_v57  ;;  %v1543_v3 = vadd.f32 %v1479_v16, %v7599_v40 }
 0x2cc   : > { %v1480_v34 = vmul.f32 %v7604_v28, %v7603_v63  ;;  %v1291_v46 = vmul.f32 0.5, %v7589_v30  ;;  %v1603_v48 = vmul.f32 0.7978846, %v1539_v42  ;;  %v1540_v51 = vadd.f32 %v1476_v2, %v7601_v26 }
 0x2cd   : > { %1964 = vmatpush.bf16.msra.mxu2 %v1871_v21  ;;  %v1872_v9 = vpack.c.bf16 %v1816_v7, %v1812_v18  ;;  %v4491_v35 = vmov 6   ;;  %v1295_v31 = vmul.f32 0.5, %v7591_v1  ;;  %v1607_v41 = vmul.f32 0.7978846, %v1543_v3  ;;  %v5821_v1 = vld [vmem:[%s7325_s3 + $0x10] sm:$0xff] }
 0x2ce   : > { %v4277_v14 = vpop.eup %4276  ;;  %4119 = vset.pattern.permute.xlu1 %v4491_v35  ;;  %4121 = vset.pattern.permute.xlu0 %v4491_v35  ;;  %v1544_v53 = vadd.f32 %v1480_v34, %v7603_v63  ;;  %v1292_v8 = vmul.f32 0.5, %v7593_v29  ;;  %4284 = vtanh.f32 %v1603_v48  ;;  %v1604_v37 = vmul.f32 0.7978846, %v1540_v51  ;;  %v4049_v29 = vld [vmem:[%s7324_s2 + $0x8] sm:$0xff]  ;;  %v7605_v34 = vld [vmem:[#allocation7_spill] sm:$0xff] }
 0x2cf   : > { %v4279_v17 = vpop.eup %4278  ;;  %1983 = vmatpush.bf16.msra.mxu3 %v1872_v9  ;;  %v1739_v19 = vadd.f32 1.0, %v4277_v14  ;;  %1894 = vperm.xlu1 %4119, %v5814_v4   ;;  %v1296_v0 = vmul.f32 0.5, %v7595_v38  ;;  %4286 = vtanh.f32 %v1607_v41  ;;  %v1283_v27 = vmul.f32 0.5, %v7597_v44  ;;  %v7606_v51 = vld [vmem:[#allocation5_spill] sm:$0xff] }
 0x2d0   : > { %v4281_v30 = vpop.eup %4280  ;;  %v1743_v55 = vadd.f32 1.0, %v4279_v17  ;;  %1902 = vperm.xlu0 %4121, %v5821_v1   ;;  %4120 = vset.pattern.permute.xlu2 %v4491_v35  ;;  %v1608_v33 = vmul.f32 0.7978846, %v1544_v53  ;;  %4288 = vtanh.f32 %v1604_v37  ;;  %v1287_v13 = vmul.f32 0.5, %v7599_v40  ;;  %v7607_v17 = vld [vmem:[#allocation8_spill] sm:$0xff]  ;;  %v7609_v53 = vld [vmem:[#allocation6_spill] sm:$0xff] }
 0x2d1   : > { %v4283_v25 = vpop.eup %4282  ;;  %v1740_v49 = vadd.f32 1.0, %v4281_v30  ;;  %1898 = vperm.xlu2 %4120, %v5831_v62   ;;  %v1803_v39 = vmul.f32 %v1739_v19, %v1291_v46  ;;  %v4492_v32 = vmov 8   ;;  %v1284_v50 = vmul.f32 0.5, %v7601_v26  ;;  %v7608_v19 = vld [vmem:[#allocation9_spill] sm:$0xff] }
 0x2d2   : > { %v1807_v10 = vmul.f32 %v1743_v55, %v1295_v31  ;;  %v1744_v15 = vadd.f32 1.0, %v4283_v25  ;;  %4290 = vtanh.f32 %v1608_v33  ;;  %v4493_v57 = vmov 7  }
 0x2d3   : > { %v1804_v36 = vmul.f32 %v1740_v49, %v1292_v8  ;;  %v1288_v22 = vmul.f32 0.5, %v7603_v63  ;;  %v7610_v8 = vld [vmem:[#allocation10_spill] sm:$0xff] }
 0x2d4   : > { %v1867_v38 = vpack.c.bf16 %v1807_v10, %v1803_v39  ;;  %v1808_v11 = vmul.f32 %v1744_v15, %v1296_v0  ;;  %1934 = vmatmul.bf16.gmra.mxu0 %v4049_v29  ;;  %v4285_v43 = vpop.eup %4284 }
 0x2d5   : > { %v4287_v5 = vpop.eup %4286  ;;  %v1731_v12 = vadd.f32 1.0, %v4285_v43 }
 0x2d6   : > { %1965 = vmatpush.bf16.msra.mxu2 %v1867_v38  ;;  %v1868_v24 = vpack.c.bf16 %v1808_v11, %v1804_v36  ;;  %v4289_v52 = vpop.eup %4288  ;;  %v1735_v58 = vadd.f32 1.0, %v4287_v5  ;;  %v7611_v5 = vld [vmem:[#allocation17_spill] sm:$0xff] }
 0x2d7   : > { %1953 = vmatmul.bf16.gmra.mxu1 %v4049_v29  ;;  %1906 = vperm.xlu1 %4119, %v5837_v56   ;;  %v1732_v61 = vadd.f32 1.0, %v4289_v52  ;;  %v1795_v6 = vmul.f32 %v1731_v12, %v1283_v27 }
 0x2d8   : > { %1984 = vmatpush.bf16.msra.mxu3 %v1868_v24  ;;  %4125 = vset.pattern.permute.xlu0 %v4492_v32  ;;  %v4291_v23 = vpop.eup %4290  ;;  %v1799_v60 = vmul.f32 %v1735_v58, %v1287_v13 }
 0x2d9   : > { %4122 = vset.pattern.permute.xlu2 %v4493_v57  ;;  %2238 = vperm.xlu0 %4125, %v5837_v56   ;;  %v1736_v18 = vadd.f32 1.0, %v4291_v23  ;;  %v1796_v59 = vmul.f32 %v1732_v61, %v1284_v50  ;;  %v7612_v50 = vld [vmem:[#allocation18_spill] sm:$0xff] }
 0x2da   : > { %2202 = vperm.xlu2 %4122, %v5821_v1   ;;  %v1863_v44 = vpack.c.bf16 %v1799_v60, %v1795_v6 }
 0x2db   : > { %v1800_v47 = vmul.f32 %v1736_v18, %v1288_v22 }
 0x2dc   : > { %1966 = vmatpush.bf16.msra.mxu2 %v1863_v44 }
 0x2dd   : > { %v1864_v21 = vpack.c.bf16 %v1800_v47, %v1796_v59 }
 0x2df   : > { %4123 = vset.pattern.permute.xlu1 %v4493_v57  ;;  %1985 = vmatpush.bf16.msra.mxu3 %v1864_v21 }
 0x2e0   : > { %2206 = vperm.xlu1 %4123, %v5837_v56   ;;  %1967 = vmatmul.bf16.vlgmr.msra.gmra.mxu2 %v5776_v20 }
 0x2e2   : > { %4124 = vset.pattern.permute.xlu2 %v4492_v32  ;;  %1986 = vmatmul.bf16.vlgmr.msra.gmra.mxu3 %v5776_v20 }
 0x2e3   : > { %2234 = vperm.xlu2 %4124, %v5821_v1  }
 0x2e8   : > { %2194 = vperm.xlu1 %4123, %v5814_v4  }
 0x2eb   : > { %4126 = vset.pattern.permute.xlu2 %v4493_v57 }
 0x2ec   : > { %2198 = vperm.xlu2 %4126, %v5831_v62  }
 0x2f0   : > { %4127 = vset.pattern.permute.xlu1 %v4492_v32  ;;  %1972 = vmatmul.bf16.gmra.mxu2 %v4049_v29 }
 0x2f1   : > { %2226 = vperm.xlu1 %4127, %v5814_v4  }
 0x2f2   : > { %1991 = vmatmul.bf16.gmra.mxu3 %v4049_v29 }
 0x2f4   : > { %4128 = vset.pattern.permute.xlu2 %v4492_v32 }
 0x2f5   : > { %2230 = vperm.xlu2 %4128, %v5831_v62  }
 0x32b   : > { %v5854_v20 = vpop.permute.xlu2 %1898 }
 0x341   : > { %v1930_v7 = vpop.f32.mrf.mxu0  ;;  %v5856_v42 = vpop.permute.xlu1 %1894 }
 0x342   : > { %v5859_v45 = vpop.permute.xlu0 %1902  ;;  %v1931_v2 = vadd.f32 %v1930_v7, %v5856_v42 }
 0x344   : > { %v1949_v40 = vpop.f32.mrf.mxu1  ;;  %v5870_v35 = vadd.f32 %v1931_v2, %v7606_v51 }
 0x345   : > { %v1950_v28 = vadd.f32 %v1949_v40, %v5856_v42 }
 0x346   : > { %v2053_v0 = vmul.f32 %v5870_v35, %v5870_v35 }
 0x347   : > { %v5879_v30 = vadd.f32 %v1950_v28, %v7609_v53 }
 0x349   : > { %v1932_v54 = vpop.f32.mrf.mxu0  ;;  %v5886_v25 = vpop.permute.xlu1 %1906  ;;  %v2054_v15 = vmul.f32 %v5879_v30, %v5879_v30 }
 0x34a   : > { %v1933_v26 = vadd.f32 %v1932_v54, %v5854_v20 }
 0x34c   : > { %v1951_v16 = vpop.f32.mrf.mxu1  ;;  %v5866_v14 = vadd.f32 %v1933_v26, %v7605_v34 }
 0x34d   : > { %v1952_v9 = vadd.f32 %v1951_v16, %v5854_v20 }
 0x34e   : > { %v2057_v55 = vmul.f32 %v5866_v14, %v5866_v14  ;;  %v2013_v39 = vadd.f32 %v5866_v14, %v5870_v35 }
 0x34f   : > { %v5873_v31 = vadd.f32 %v1952_v9, %v7607_v17 }
 0x350   : > { %v2069_v38 = vadd.f32 %v2057_v55, %v2053_v0 }
 0x351   : > { %v1935_v3 = vpop.f32.mrf.mxu0  ;;  %v2058_v49 = vmul.f32 %v5873_v31, %v5873_v31  ;;  %v2022_v43 = vadd.f32 %v5873_v31, %v5879_v30 }
 0x352   : > { %v1936_v63 = vadd.f32 %v1935_v3, %v5859_v45 }
 0x353   : > { %v2078_v27 = vadd.f32 %v2058_v49, %v2054_v15 }
 0x354   : > { %v1954_v46 = vpop.f32.mrf.mxu1  ;;  %v5876_v41 = vadd.f32 %v1936_v63, %v7608_v19 }
 0x355   : > { %v1955_v48 = vadd.f32 %v1954_v46, %v5859_v45 }
 0x356   : > { %v2061_v33 = vmul.f32 %v5876_v41, %v5876_v41  ;;  %v2014_v24 = vadd.f32 %v2013_v39, %v5876_v41  ;;  %v7613_v39 = vld [vmem:[#allocation4_spill] sm:$0xff] }
 0x357   : > { %v5884_v37 = vadd.f32 %v1955_v48, %v7610_v8 }
 0x358   : > { %v2070_v13 = vadd.f32 %v2069_v38, %v2061_v33 }
 0x359   : > { %v1937_v29 = vpop.f32.mrf.mxu0  ;;  %v2062_v36 = vmul.f32 %v5884_v37, %v5884_v37  ;;  %v2023_v58 = vadd.f32 %v2022_v43, %v5884_v37 }
 0x35a   : > { %v1938_v10 = vadd.f32 %v1937_v29, %v5886_v25 }
 0x35b   : > { %v2079_v57 = vadd.f32 %v2078_v27, %v2062_v36 }
 0x35c   : > { %v1956_v11 = vpop.f32.mrf.mxu1  ;;  %v5905_v12 = vadd.f32 %v1938_v10, %v7611_v5 }
 0x35d   : > { %v1957_v52 = vadd.f32 %v1956_v11, %v5886_v25 }
 0x35e   : > { %v2015_v32 = vadd.f32 %v2014_v24, %v5905_v12  ;;  %v2065_v23 = vmul.f32 %v5905_v12, %v5905_v12 }
 0x35f   : > { %v5913_v61 = vadd.f32 %v1957_v52, %v7612_v50  ;;  %v7614_v50 = vld [vmem:[#allocation13_spill] sm:$0xff] }
 0x360   : > { %v2016_v6 = vrot.slane %v2015_v32, 4  ;;  %v2071_v60 = vadd.f32 %v2070_v13, %v2065_v23 }
 0x361   : > { %v2024_v22 = vadd.f32 %v2023_v58, %v5913_v61  ;;  %v2066_v18 = vmul.f32 %v5913_v61, %v5913_v61 }
 0x362   : > { %v2017_v44 = vadd.f32 %v2016_v6, %v2015_v32  ;;  %v2072_v59 = vrot.slane %v2071_v60, 4 }
 0x363   : > { %v2025_v47 = vrot.slane %v2024_v22, 4  ;;  %v2080_v21 = vadd.f32 %v2079_v57, %v2066_v18  ;;  %v1968_v7 = vpop.f32.mrf.mxu2 }
 0x364   : > { %v2018_v40 = vrot.slane %v2017_v44, 2  ;;  %v2073_v54 = vadd.f32 %v2072_v59, %v2071_v60  ;;  %v1969_v5 = vadd.f32 %v1968_v7, %v5856_v42 }
 0x365   : > { %v2026_v16 = vadd.f32 %v2025_v47, %v2024_v22  ;;  %v1987_v26 = vpop.f32.mrf.mxu3  ;;  %v2081_v2 = vrot.slane %v2080_v21, 4 }
 0x366   : > { %v2019_v9 = vadd.f32 %v2018_v40, %v2017_v44  ;;  %v2074_v3 = vrot.slane %v2073_v54, 2  ;;  %v1988_v23 = vadd.f32 %v1987_v26, %v5856_v42  ;;  %v7615_v44 = vld [vmem:[#allocation11_spill] sm:$0xff]  ;;  %v7618_v42 = vld [vmem:[#allocation12_spill] sm:$0xff] }
 0x367   : > { %v2027_v63 = vrot.slane %v2026_v16, 2  ;;  %v2082_v28 = vadd.f32 %v2081_v2, %v2080_v21  ;;  %v5940_v59 = vadd.f32 %v1969_v5, %v7615_v44  ;;  %v7617_v21 = vld [vmem:[#allocation15_spill] sm:$0xff]  ;;  %v7621_v5 = vld [vmem:[#allocation20_spill] sm:$0xff] }
 0x368   : > { %v2020_v34 = vrot.slane %v2019_v9, 1  ;;  %v2075_v46 = vadd.f32 %v2074_v3, %v2073_v54  ;;  %v5951_v54 = vadd.f32 %v1988_v23, %v7618_v42 }
 0x369   : > { %v2028_v48 = vadd.f32 %v2027_v63, %v2026_v16  ;;  %v2083_v51 = vrot.slane %v2082_v28, 2  ;;  %v2055_v2 = vmul.f32 %v5940_v59, %v5940_v59 }
 0x36a   : > { %v2021_v17 = vadd.f32 %v2020_v34, %v2019_v9  ;;  %v2076_v19 = vrot.slane %v2075_v46, 1 }
 0x36b   : > { %v2029_v53 = vrot.slane %v2028_v48, 1  ;;  %v2084_v55 = vadd.f32 %v2083_v51, %v2082_v28  ;;  %v1970_v8 = vpop.f32.mrf.mxu2 }
 0x36c   : > { %v2077_v0 = vadd.f32 %v2076_v19, %v2075_v46  ;;  %v5919_v10 = vmul.f32 %v2021_v17, %v7613_v39  ;;  %v1971_v43 = vadd.f32 %v1970_v8, %v5854_v20  ;;  %v2056_v46 = vmul.f32 %v5951_v54, %v5951_v54  ;;  %v7620_v8 = vld [vmem:[#allocation19_spill] sm:$0xff] }
 0x36d   : > { %v2030_v49 = vadd.f32 %v2029_v53, %v2028_v48  ;;  %v2085_v33 = vrot.slane %v2084_v55, 1  ;;  %v1989_v29 = vpop.f32.mrf.mxu3 }
 0x36e   : > { %v2105_v36 = vmul.f32 %v2077_v0, %v7613_v39  ;;  %v2109_v24 = vmul.f32 %v5919_v10, %v5919_v10  ;;  %v1990_v52 = vadd.f32 %v1989_v29, %v5854_v20  ;;  %v5936_v57 = vadd.f32 %v1971_v43, %v7614_v50  ;;  %v7616_v20 = vld [vmem:[#allocation14_spill] sm:$0xff] }
 0x36f   : > { %v5922_v15 = vmul.f32 %v2030_v49, %v7613_v39  ;;  %v2086_v38 = vadd.f32 %v2085_v33, %v2084_v55 }
 0x370   : > { %v2113_v32 = vsub.f32 %v2105_v36, %v2109_v24  ;;  %v5943_v47 = vadd.f32 %v1990_v52, %v7616_v20  ;;  %v2059_v16 = vmul.f32 %v5936_v57, %v5936_v57  ;;  %v2031_v28 = vadd.f32 %v5936_v57, %v5940_v59 }
 0x371   : > { %v2106_v11 = vmul.f32 %v2086_v38, %v7613_v39  ;;  %v2110_v13 = vmul.f32 %v5922_v15, %v5922_v15 }
 0x372   : > { %v2117_v18 = vadd.f32 1e-05, %v2113_v32  ;;  %v2060_v9 = vmul.f32 %v5943_v47, %v5943_v47  ;;  %v2087_v48 = vadd.f32 %v2059_v16, %v2055_v2  ;;  %v2040_v51 = vadd.f32 %v5943_v47, %v5951_v54 }
 0x373   : > { %v1973_v27 = vpop.f32.mrf.mxu2  ;;  %v2114_v60 = vsub.f32 %v2106_v11, %v2110_v13 }
 0x374   : > { %v1974_v58 = vadd.f32 %v1973_v27, %v5859_v45  ;;  %4292 = vrsqrt.f32 %v2117_v18  ;;  %v2096_v29 = vadd.f32 %v2060_v9, %v2056_v46  ;;  %vm2127_vm11 = vweird.f32 %v2117_v18 }
 0x375   : > { %v1992_v6 = vpop.f32.mrf.mxu3  ;;  %v5948_v40 = vadd.f32 1e-05, %v2114_v60 }
 0x376   : > { %v1993_v22 = vadd.f32 %v1992_v6, %v5859_v45  ;;  %v5946_v7 = vadd.f32 %v1974_v58, %v7617_v21  ;;  %v7619_v45 = vld [vmem:[#allocation16_spill] sm:$0xff]  ;;  %v5990_v6 = vpop.permute.xlu2 %2202 }
 0x377   : > { %4294 = vrsqrt.f32 %v5948_v40  ;;  %vm2137_vm15 = vweird.f32 %v5948_v40 }
 0x378   : > { %v5956_v26 = vadd.f32 %v1993_v22, %v7619_v45  ;;  %v2063_v3 = vmul.f32 %v5946_v7, %v5946_v7  ;;  %v2032_v55 = vadd.f32 %v2031_v28, %v5946_v7 }
 0x37a   : > { %v2064_v17 = vmul.f32 %v5956_v26, %v5956_v26  ;;  %v4293_v53 = vpop.eup %4292  ;;  %v2088_v38 = vadd.f32 %v2087_v48, %v2063_v3  ;;  %v2041_v36 = vadd.f32 %v2040_v51, %v5956_v26 }
 0x37b   : > { %v1975_v63 = vpop.f32.mrf.mxu2  ;;  %v2122_v11 = vmul.f32 %v4293_v53, %v2117_v18  ;;  %vm2128_vm10 = vweird.f32 %v4293_v53  ;;  %v2169_v18 = vsub.f32 %v5876_v41, %v5919_v10 }
 0x37c   : > { %v1976_v34 = vadd.f32 %v1975_v63, %v5886_v25  ;;  %v2097_v13 = vadd.f32 %v2096_v29, %v2064_v17  ;;  %vm2129_vm14 = vmor %vm2127_vm11, %vm2128_vm10 }
 0x37d   : > { %v1994_v19 = vpop.f32.mrf.mxu3  ;;  %v4295_v33 = vpop.eup %4294  ;;  %v2123_v58 = vmul.f32 %v4293_v53, %v2122_v11 }
 0x37e   : > { %v5976_v0 = vadd.f32 %v1976_v34, %v7620_v8  ;;  %v1995_v49 = vadd.f32 %v1994_v19, %v5886_v25  ;;  %v2132_v27 = vmul.f32 %v4295_v33, %v5948_v40  ;;  %vm2138_vm12 = vweird.f32 %v4295_v33 }
 0x37f   : > { %v2124_v60 = vmul.f32 0.5, %v2123_v58  ;;  %vm2139_vm0 = vmor %vm2137_vm15, %vm2138_vm12  ;;  %v2170_v40 = vsub.f32 %v5884_v37, %v5922_v15  ;;  %v2173_v58 = vsub.f32 %v5905_v12, %v5919_v10 }
 0x380   : > { %v2033_v43 = vadd.f32 %v2032_v55, %v5976_v0  ;;  %v2067_v24 = vmul.f32 %v5976_v0, %v5976_v0  ;;  %v5984_v52 = vadd.f32 %v1995_v49, %v7621_v5  ;;  %v2133_v22 = vmul.f32 %v4295_v33, %v2132_v27  ;;  %v5995_v27 = vpop.permute.xlu1 %2206 }
 0x381   : > { %v2125_v16 = vsub.f32 1.5, %v2124_v60  ;;  %v2174_v60 = vsub.f32 %v5913_v61, %v5922_v15 }
 0x382   : > { %v2034_v32 = vrot.slane %v2033_v43, 4  ;;  %v2089_v25 = vadd.f32 %v2088_v38, %v2067_v24  ;;  %v2042_v23 = vadd.f32 %v2041_v36, %v5984_v52  ;;  %v2068_v50 = vmul.f32 %v5984_v52, %v5984_v52 }
 0x383   : > { %v2134_v45 = vmul.f32 0.5, %v2133_v22  ;;  %v2126_v28 = vmul.f32 %v4293_v53, %v2125_v16 }
 0x384   : > { %v2035_v44 = vadd.f32 %v2034_v32, %v2033_v43  ;;  %v2090_v20 = vrot.slane %v2089_v25, 4  ;;  %v2043_v21 = vrot.slane %v2042_v23, 4  ;;  %v2098_v42 = vadd.f32 %v2097_v13, %v2068_v50  ;;  %v5997_v13 = vpop.permute.xlu2 %2234 }
 0x385   : > { %v2135_v34 = vsub.f32 1.5, %v2134_v45  ;;  %v2130_v19 = vsel %vm2129_vm14, %v4293_v53, %v2126_v28  ;;  %v2161_v28 = vsub.f32 %v5870_v35, %v5919_v10 }
 0x386   : > { %v2036_v2 = vrot.slane %v2035_v44, 2  ;;  %v2091_v9 = vadd.f32 %v2090_v20, %v2089_v25  ;;  %v2044_v3 = vadd.f32 %v2043_v21, %v2042_v23  ;;  %v2099_v63 = vrot.slane %v2098_v42, 4 }
 0x387   : > { %v2136_v55 = vmul.f32 %v4295_v33, %v2135_v34  ;;  %v2185_v53 = vmul.f32 %v2169_v18, %v2130_v19  ;;  %v2189_v22 = vmul.f32 %v2173_v58, %v2130_v19  ;;  %v2162_v34 = vsub.f32 %v5879_v30, %v5922_v15  ;;  %v6033_v18 = vpop.permute.xlu0 %2238 }
 0x388   : > { %v2037_v46 = vadd.f32 %v2036_v2, %v2035_v44  ;;  %v2092_v48 = vrot.slane %v2091_v9, 2  ;;  %v2045_v51 = vrot.slane %v2044_v3, 2  ;;  %v2100_v17 = vadd.f32 %v2099_v63, %v2098_v42 }
 0x389   : > { %v2140_v36 = vsel %vm2139_vm0, %v4295_v33, %v2136_v55 }
 0x38a   : > { %v2038_v8 = vrot.slane %v2037_v46, 1  ;;  %v2093_v49 = vadd.f32 %v2092_v48, %v2091_v9  ;;  %v2046_v29 = vadd.f32 %v2045_v51, %v2044_v3  ;;  %v2101_v38 = vrot.slane %v2100_v17, 2 }
 0x38b   : > { %v2186_v50 = vmul.f32 %v2170_v40, %v2140_v36  ;;  %v2190_v16 = vmul.f32 %v2174_v60, %v2140_v36  ;;  %v2217_v3 = vmul.f32 %v5990_v6, %v2185_v53  ;;  %v2221_v51 = vmul.f32 %v5995_v27, %v2189_v22 }
 0x38c   : > { %v2039_v11 = vadd.f32 %v2038_v8, %v2037_v46  ;;  %v2094_v43 = vrot.slane %v2093_v49, 1  ;;  %v2047_v24 = vrot.slane %v2046_v29, 1  ;;  %v2102_v5 = vadd.f32 %v2101_v38, %v2100_v17  ;;  %v6026_v17 = vpop.permute.xlu1 %2194  ;;  %v6028_v55 = vpop.permute.xlu2 %2198 }
 0x38d   : > { %v2218_v63 = vmul.f32 %v5990_v6, %v2186_v50  ;;  %v2222_v8 = vmul.f32 %v5995_v27, %v2190_v16  ;;  %v2165_v38 = vsub.f32 %v5866_v14, %v5919_v10  ;;  %v2253_v58 = vadd.f32 %v6033_v18, %v2221_v51 }
 0x38e   : > { %v6004_v33 = vmul.f32 %v2039_v11, %v7613_v39  ;;  %v2095_v32 = vadd.f32 %v2094_v43, %v2093_v49  ;;  %v2048_v25 = vadd.f32 %v2047_v24, %v2046_v29  ;;  %v2103_v23 = vrot.slane %v2102_v5, 1 }
 0x38f   : > { %v2177_v49 = vmul.f32 %v2161_v28, %v2130_v19  ;;  %v2178_v29 = vmul.f32 %v2162_v34, %v2140_v36  ;;  %v2249_v43 = vadd.f32 %v5997_v13, %v2217_v3  ;;  %v2166_v24 = vsub.f32 %v5873_v31, %v5922_v15 }
 0x390   : > { %v2107_v44 = vmul.f32 %v2095_v32, %v7613_v39  ;;  %v6010_v20 = vmul.f32 %v2048_v25, %v7613_v39  ;;  %v2104_v21 = vadd.f32 %v2103_v23, %v2102_v5  ;;  %v2111_v42 = vmul.f32 %v6004_v33, %v6004_v33 }
 0x391   : > { %v2250_v5 = vadd.f32 %v5997_v13, %v2218_v63  ;;  %v2181_v40 = vmul.f32 %v2165_v38, %v2130_v19  ;;  %v2182_v53 = vmul.f32 %v2166_v24, %v2140_v36  ;;  %v2209_v10 = vmul.f32 %v6026_v17, %v2177_v49 }
 0x392   : > { %v2108_v45 = vmul.f32 %v2104_v21, %v7613_v39  ;;  %v2112_v2 = vmul.f32 %v6010_v20, %v6010_v20  ;;  %v2115_v9 = vsub.f32 %v2107_v44, %v2111_v42  ;;  %v2210_v32 = vmul.f32 %v6026_v17, %v2178_v29 }
 0x393   : > { %v2254_v25 = vadd.f32 %v6033_v18, %v2222_v8  ;;  %v2213_v23 = vmul.f32 %v6028_v55, %v2181_v40  ;;  %v2214_v50 = vmul.f32 %v6028_v55, %v2182_v53  ;;  %v2265_v60 = vpack.c.bf16 %v2253_v58, %v2249_v43  ;;  %v6065_v8 = vld [vmem:[%s7323_s1 + $0x50] sm:$0xff] }
 0x394   : > { %v2116_v46 = vsub.f32 %v2108_v45, %v2112_v2  ;;  %v6023_v48 = vadd.f32 1e-05, %v2115_v9  ;;  %v4494_v15 = vmov 9   ;;  %v6051_v22 = vpop.permute.xlu1 %2226  ;;  %v6053_v44 = vpop.permute.xlu2 %2230  ;;  %v2171_v38 = vsub.f32 %v5946_v7, %v6004_v33 }
 0x395   : > { %4129 = vset.pattern.permute.xlu0 %v4494_v15  ;;  %4130 = vset.pattern.permute.xlu1 %v4494_v15  ;;  %v2266_v19 = vpack.c.bf16 %v2254_v25, %v2250_v5  ;;  %v2241_v42 = vadd.f32 %v6051_v22, %v2209_v10  ;;  %v2242_v16 = vadd.f32 %v6051_v22, %v2210_v32 }
 0x396   : > { %v6035_v11 = vadd.f32 1e-05, %v2116_v46  ;;  %4296 = vrsqrt.f32 %v6023_v48  ;;  %2270 = vperm.xlu0 %4129, %v5814_v4   ;;  %2274 = vperm.xlu1 %4130, %v5831_v62   ;;  %v2245_v2 = vadd.f32 %v6053_v44, %v2213_v23  ;;  %v2246_v9 = vadd.f32 %v6053_v44, %v2214_v50 }
 0x397   : > { %2307 = vmatpush.bf16.msrb.mxu0 %v2265_v60  ;;  %4131 = vset.pattern.permute.xlu2 %v4494_v15  ;;  %v2175_v43 = vsub.f32 %v5976_v0, %v6004_v33  ;;  %vm2147_vm2 = vweird.f32 %v6023_v48  ;;  %v2172_v40 = vsub.f32 %v5956_v26, %v6010_v20  ;;  %v2176_v53 = vsub.f32 %v5984_v52, %v6010_v20 }
 0x398   : > { %4298 = vrsqrt.f32 %v6035_v11  ;;  %2326 = vmatpush.bf16.msrb.mxu1 %v2266_v19  ;;  %2278 = vperm.xlu2 %4131, %v5821_v1   ;;  %v2261_v28 = vpack.c.bf16 %v2245_v2, %v2241_v42  ;;  %v2262_v34 = vpack.c.bf16 %v2246_v9, %v2242_v16  ;;  %v2163_v58 = vsub.f32 %v5940_v59, %v6004_v33 }
 0x399   : > { %vm2157_vm5 = vweird.f32 %v6035_v11  ;;  %v2164_v25 = vsub.f32 %v5951_v54, %v6010_v20  ;;  %v4495_v2 = vmov 10  }
 0x39b   : > { %2308 = vmatpush.bf16.msrb.mxu0 %v2261_v28  ;;  %v4496_v28 = vmov 11  }
 0x39c   : > { %v4297_v36 = vpop.eup %4296  ;;  %2327 = vmatpush.bf16.msrb.mxu1 %v2262_v34 }
 0x39d   : > { %v2142_v21 = vmul.f32 %v4297_v36, %v6023_v48  ;;  %vm2148_vm1 = vweird.f32 %v4297_v36  ;;  %v2167_v48 = vsub.f32 %v5936_v57, %v6004_v33 }
 0x39e   : > { %v4299_v45 = vpop.eup %4298  ;;  %2282 = vperm.xlu1 %4130, %v5837_v56   ;;  %3952 = vmatmul.msk.bf16.vlgmr.msrb.gmra.mxu0 %vm558_vm13, %v6065_v8  ;;  %vm2149_vm4 = vmor %vm2147_vm2, %vm2148_vm1 }
 0x39f   : > { %v2143_v3 = vmul.f32 %v4297_v36, %v2142_v21  ;;  %v2152_v63 = vmul.f32 %v4299_v45, %v6035_v11  ;;  %vm2158_vm3 = vweird.f32 %v4299_v45  ;;  %3954 = vmatmul.msk.bf16.vlgmr.msrb.gmra.mxu1 %vm558_vm13, %v6065_v8  ;;  %v2168_v21 = vsub.f32 %v5943_v47, %v6010_v20  ;;  %4133 = vset.pattern.permute.xlu0 %v4495_v2 }
 0x3a0   : > { %vm2159_vm6 = vmor %vm2157_vm5, %vm2158_vm3  ;;  %2586 = vperm.xlu0 %4133, %v5837_v56   ;;  %4132 = vset.pattern.permute.xlu2 %v4495_v2 }
 0x3a1   : > { %v2144_v46 = vmul.f32 0.5, %v2143_v3  ;;  %v2153_v51 = vmul.f32 %v4299_v45, %v2152_v63  ;;  %2582 = vperm.xlu2 %4132, %v5821_v1  }
 0x3a3   : > { %v2145_v49 = vsub.f32 1.5, %v2144_v46  ;;  %v2154_v29 = vmul.f32 0.5, %v2153_v51 }
 0x3a5   : > { %v2146_v24 = vmul.f32 %v4297_v36, %v2145_v49  ;;  %v2155_v5 = vsub.f32 1.5, %v2154_v29 }
 0x3a6   : > { %4134 = vset.pattern.permute.xlu1 %v4496_v28 }
 0x3a7   : > { %v2150_v10 = vsel %vm2149_vm4, %v4297_v36, %v2146_v24  ;;  %v2156_v32 = vmul.f32 %v4299_v45, %v2155_v5  ;;  %2614 = vperm.xlu1 %4134, %v5821_v1   ;;  %v4051_v5 = vld [vmem:[%s7323_s1 + $0x58] sm:$0xff] }
 0x3a8   : > { %v2187_v23 = vmul.f32 %v2171_v38, %v2150_v10  ;;  %v2191_v50 = vmul.f32 %v2175_v43, %v2150_v10  ;;  %v2179_v60 = vmul.f32 %v2163_v58, %v2150_v10  ;;  %v2183_v15 = vmul.f32 %v2167_v48, %v2150_v10  ;;  %4138 = vset.pattern.permute.xlu0 %v4496_v28 }
 0x3a9   : > { %v2160_v19 = vsel %vm2159_vm6, %v4299_v45, %v2156_v32  ;;  %2606 = vperm.xlu0 %4138, %v5814_v4   ;;  %4135 = vset.pattern.permute.xlu2 %v4496_v28 }
 0x3aa   : > { %v2188_v42 = vmul.f32 %v2172_v40, %v2160_v19  ;;  %v2219_v16 = vmul.f32 %v5990_v6, %v2187_v23  ;;  %v2192_v33 = vmul.f32 %v2176_v53, %v2160_v19  ;;  %v2223_v36 = vmul.f32 %v5995_v27, %v2191_v50  ;;  %2618 = vperm.xlu2 %4135, %v5837_v56  }
 0x3ab   : > { %v2180_v11 = vmul.f32 %v2164_v25, %v2160_v19  ;;  %v2211_v9 = vmul.f32 %v6026_v17, %v2179_v60  ;;  %v2184_v3 = vmul.f32 %v2168_v21, %v2160_v19  ;;  %v2215_v63 = vmul.f32 %v6028_v55, %v2183_v15 }
 0x3ac   : > { %v2220_v45 = vmul.f32 %v5990_v6, %v2188_v42  ;;  %v2224_v20 = vmul.f32 %v5995_v27, %v2192_v33  ;;  %v2251_v34 = vadd.f32 %v5997_v13, %v2219_v16  ;;  %v2255_v46 = vadd.f32 %v6033_v18, %v2223_v36 }
 0x3ad   : > { %v2212_v51 = vmul.f32 %v6026_v17, %v2180_v11  ;;  %v2216_v49 = vmul.f32 %v6028_v55, %v2184_v3  ;;  %v2243_v29 = vadd.f32 %v6051_v22, %v2211_v9  ;;  %v2247_v27 = vadd.f32 %v6053_v44, %v2215_v63 }
 0x3ae   : > { %v2252_v38 = vadd.f32 %v5997_v13, %v2220_v45  ;;  %v2256_v6 = vadd.f32 %v6033_v18, %v2224_v20  ;;  %v2267_v43 = vpack.c.bf16 %v2255_v46, %v2251_v34  ;;  %3953 = vmatmul.msk.bf16.gmra.mxu0 %vm558_vm13, %v4051_v5 }
 0x3af   : > { %v2244_v24 = vadd.f32 %v6051_v22, %v2212_v51  ;;  %v2248_v17 = vadd.f32 %v6053_v44, %v2216_v49  ;;  %v2263_v13 = vpack.c.bf16 %v2247_v27, %v2243_v29  ;;  %4136 = vset.pattern.permute.xlu1 %v4495_v2  ;;  %3955 = vmatmul.msk.bf16.gmra.mxu1 %vm558_vm13, %v4051_v5 }
 0x3b0   : > { %2345 = vmatpush.bf16.msrb.mxu2 %v2267_v43  ;;  %v2268_v55 = vpack.c.bf16 %v2256_v6, %v2252_v38  ;;  %2574 = vperm.xlu1 %4136, %v5814_v4  }
 0x3b1   : > { %v2264_v18 = vpack.c.bf16 %v2248_v17, %v2244_v24 }
 0x3b2   : > { %2364 = vmatpush.bf16.msrb.mxu3 %v2268_v55  ;;  %4137 = vset.pattern.permute.xlu2 %v4495_v2 }
 0x3b3   : > { %2578 = vperm.xlu2 %4137, %v5831_v62  }
 0x3b4   : > { %2346 = vmatpush.bf16.msrb.mxu2 %v2263_v13 }
 0x3b6   : > { %2365 = vmatpush.bf16.msrb.mxu3 %v2264_v18 }
 0x3b7   : > { %3956 = vmatmul.msk.bf16.vlgmr.msrb.gmra.mxu2 %vm558_vm13, %v6065_v8 }
 0x3b8   : > { %4139 = vset.pattern.permute.xlu1 %v4496_v28 }
 0x3b9   : > { %3958 = vmatmul.msk.bf16.vlgmr.msrb.gmra.mxu3 %vm558_vm13, %v6065_v8  ;;  %2610 = vperm.xlu1 %4139, %v5831_v62  }
 0x3c7   : > { %3957 = vmatmul.msk.bf16.gmra.mxu2 %vm558_vm13, %v4051_v5 }
 0x3c9   : > { %3959 = vmatmul.msk.bf16.gmra.mxu3 %vm558_vm13, %v4051_v5 }
 0x3f2   : > { %v6131_v58 = vpop.permute.xlu2 %2278 }
 0x408   : > { %v6125_v40 = vpop.permute.xlu1 %2274  ;;  %v6127_v53 = vpop.permute.xlu0 %2270 }
 0x41b   : > { %v2310_v1 = vpop.f32.mrf.mxu0 }
 0x41c   : > { %v2329_v22 = vpop.f32.mrf.mxu1  ;;  %v2311_v62 = vadd.f32 %v2310_v1, %v6127_v53 }
 0x41d   : > { %v2330_v48 = vadd.f32 %v2329_v22, %v6127_v53 }
 0x41e   : > { %v6144_v15 = vadd.f32 %v2311_v62, %v5870_v35 }
 0x41f   : > { %v6147_v19 = vadd.f32 %v2330_v48, %v5879_v30 }
 0x420   : > { %7624 = vst [vmem:[#allocation68_spill] sm:$0xff] %v6144_v15  ;;  %v2433_v35 = vmul.f32 %v6144_v15, %v6144_v15 }
 0x421   : > { %7625 = vst [vmem:[#allocation23_spill] sm:$0xff] %v6147_v19  ;;  %v2434_v30 = vmul.f32 %v6147_v19, %v6147_v19 }
 0x423   : > { %v2312_v44 = vpop.f32.mrf.mxu0 }
 0x424   : > { %v2331_v4 = vpop.f32.mrf.mxu1  ;;  %v2313_v56 = vadd.f32 %v2312_v44, %v6125_v40 }
 0x425   : > { %v2332_v8 = vadd.f32 %v2331_v4, %v6125_v40 }
 0x426   : > { %v6138_v50 = vadd.f32 %v2313_v56, %v5866_v14 }
 0x427   : > { %v6141_v60 = vadd.f32 %v2332_v8, %v5873_v31  ;;  %v6159_v31 = vpop.permute.xlu1 %2282 }
 0x428   : > { %7622 = vst [vmem:[#allocation69_spill] sm:$0xff] %v6138_v50  ;;  %v2437_v16 = vmul.f32 %v6138_v50, %v6138_v50  ;;  %v2393_v2 = vadd.f32 %v6138_v50, %v6144_v15 }
 0x429   : > { %7623 = vst [vmem:[#allocation67_spill] sm:$0xff] %v6141_v60  ;;  %v2438_v14 = vmul.f32 %v6141_v60, %v6141_v60  ;;  %v2402_v11 = vadd.f32 %v6141_v60, %v6147_v19 }
 0x42a   : > { %v2449_v28 = vadd.f32 %v2437_v16, %v2433_v35 }
 0x42b   : > { %v2315_v10 = vpop.f32.mrf.mxu0  ;;  %v2458_v45 = vadd.f32 %v2438_v14, %v2434_v30 }
 0x42c   : > { %v2334_v32 = vpop.f32.mrf.mxu1  ;;  %v2316_v25 = vadd.f32 %v2315_v10, %v6131_v58 }
 0x42d   : > { %v2335_v23 = vadd.f32 %v2334_v32, %v6131_v58 }
 0x42e   : > { %v6150_v21 = vadd.f32 %v2316_v25, %v5876_v41 }
 0x42f   : > { %v6153_v42 = vadd.f32 %v2335_v23, %v5884_v37 }
 0x430   : > { %7626 = vst [vmem:[#allocation61_spill] sm:$0xff] %v6150_v21  ;;  %v2441_v41 = vmul.f32 %v6150_v21, %v6150_v21  ;;  %v2394_v34 = vadd.f32 %v2393_v2, %v6150_v21 }
 0x431   : > { %7627 = vst [vmem:[#allocation56_spill] sm:$0xff] %v6153_v42  ;;  %v2442_v37 = vmul.f32 %v6153_v42, %v6153_v42  ;;  %v2403_v46 = vadd.f32 %v2402_v11, %v6153_v42 }
 0x432   : > { %v2450_v29 = vadd.f32 %v2449_v28, %v2441_v41 }
 0x433   : > { %v2317_v33 = vpop.f32.mrf.mxu0  ;;  %v2459_v38 = vadd.f32 %v2458_v45, %v2442_v37 }
 0x434   : > { %v2336_v36 = vpop.f32.mrf.mxu1  ;;  %v2318_v9 = vadd.f32 %v2317_v33, %v6159_v31 }
 0x435   : > { %v2337_v3 = vadd.f32 %v2336_v36, %v6159_v31 }
 0x436   : > { %v6178_v51 = vadd.f32 %v2318_v9, %v5905_v12 }
 0x437   : > { %v6181_v49 = vadd.f32 %v2337_v3, %v5913_v61 }
 0x438   : > { %7628 = vst [vmem:[#allocation25_spill] sm:$0xff] %v6178_v51  ;;  %v2395_v6 = vadd.f32 %v2394_v34, %v6178_v51  ;;  %v2445_v27 = vmul.f32 %v6178_v51, %v6178_v51 }
 0x439   : > { %7629 = vst [vmem:[#allocation70_spill] sm:$0xff] %v6181_v49  ;;  %v2404_v43 = vadd.f32 %v2403_v46, %v6181_v49  ;;  %v2446_v24 = vmul.f32 %v6181_v49, %v6181_v49 }
 0x43a   : > { %v2348_v63 = vpop.f32.mrf.mxu2  ;;  %v2396_v17 = vrot.slane %v2395_v6, 4  ;;  %v2451_v55 = vadd.f32 %v2450_v29, %v2445_v27 }
 0x43b   : > { %v2405_v5 = vrot.slane %v2404_v43, 4  ;;  %v2460_v12 = vadd.f32 %v2459_v38, %v2446_v24  ;;  %v2349_v30 = vadd.f32 %v2348_v63, %v6127_v53 }
 0x43c   : > { %v2367_v20 = vpop.f32.mrf.mxu3  ;;  %v2397_v13 = vadd.f32 %v2396_v17, %v2395_v6  ;;  %v2452_v18 = vrot.slane %v2451_v55, 4 }
 0x43d   : > { %v2406_v61 = vadd.f32 %v2405_v5, %v2404_v43  ;;  %v2461_v1 = vrot.slane %v2460_v12, 4  ;;  %v2368_v3 = vadd.f32 %v2367_v20, %v6127_v53 }
 0x43e   : > { %v2398_v4 = vrot.slane %v2397_v13, 2  ;;  %v2453_v56 = vadd.f32 %v2452_v18, %v2451_v55 }
 0x43f   : > { %v2407_v8 = vrot.slane %v2406_v61, 2  ;;  %v2462_v62 = vadd.f32 %v2461_v1, %v2460_v12 }
 0x440   : > { %v2399_v48 = vadd.f32 %v2398_v4, %v2397_v13  ;;  %v2454_v10 = vrot.slane %v2453_v56, 2 }
 0x441   : > { %v2408_v32 = vadd.f32 %v2407_v8, %v2406_v61  ;;  %v2463_v25 = vrot.slane %v2462_v62, 2 }
 0x442   : > { %v2350_v22 = vpop.f32.mrf.mxu2  ;;  %v2400_v23 = vrot.slane %v2399_v48, 1  ;;  %v2455_v16 = vadd.f32 %v2454_v10, %v2453_v56 }
 0x443   : > { %v2409_v14 = vrot.slane %v2408_v32, 1  ;;  %v2464_v35 = vadd.f32 %v2463_v25, %v2462_v62  ;;  %v2351_v41 = vadd.f32 %v2350_v22, %v6125_v40 }
 0x444   : > { %v2369_v44 = vpop.f32.mrf.mxu3  ;;  %v2401_v33 = vadd.f32 %v2400_v23, %v2399_v48  ;;  %v2456_v36 = vrot.slane %v2455_v16, 1 }
 0x445   : > { %v2370_v37 = vadd.f32 %v2369_v44, %v6125_v40  ;;  %v2410_v2 = vadd.f32 %v2409_v14, %v2408_v32  ;;  %v2465_v11 = vrot.slane %v2464_v35, 1  ;;  %v6201_v40 = vadd.f32 %v2349_v30, %v5940_v59 }
 0x446   : > { %v6195_v34 = vmul.f32 %v2401_v33, %v7613_v39  ;;  %v2457_v46 = vadd.f32 %v2456_v36, %v2455_v16  ;;  %v6204_v38 = vadd.f32 %v2351_v41, %v5936_v57  ;;  %v6217_v59 = vadd.f32 %v2368_v3, %v5951_v54 }
 0x447   : > { %v6198_v63 = vmul.f32 %v2410_v2, %v7613_v39  ;;  %v2466_v29 = vadd.f32 %v2465_v11, %v2464_v35  ;;  %7630 = vst [vmem:[#allocation24_spill] sm:$0xff] %v6201_v40  ;;  %v6207_v6 = vadd.f32 %v2370_v37, %v5943_v47  ;;  %v2435_v5 = vmul.f32 %v6201_v40, %v6201_v40 }
 0x448   : > { %7631 = vst [vmem:[#allocation63_spill] sm:$0xff] %v6204_v38  ;;  %v2485_v20 = vmul.f32 %v2457_v46, %v7613_v39  ;;  %v2489_v43 = vmul.f32 %v6195_v34, %v6195_v34  ;;  %v2439_v55 = vmul.f32 %v6204_v38, %v6204_v38 }
 0x449   : > { %7632 = vst [vmem:[#allocation62_spill] sm:$0xff] %v6207_v6  ;;  %v2486_v27 = vmul.f32 %v2466_v29, %v7613_v39  ;;  %v2490_v24 = vmul.f32 %v6198_v63, %v6198_v63  ;;  %v2440_v12 = vmul.f32 %v6207_v6, %v6207_v6  ;;  %v2420_v44 = vadd.f32 %v6207_v6, %v6217_v59 }
 0x44a   : > { %v2353_v9 = vpop.f32.mrf.mxu2  ;;  %7633 = vst [vmem:[#allocation71_spill] sm:$0xff] %v6217_v59  ;;  %v2467_v8 = vadd.f32 %v2439_v55, %v2435_v5 }
 0x44b   : > { %v2354_v28 = vadd.f32 %v2353_v9, %v6131_v58  ;;  %v2494_v17 = vsub.f32 %v2486_v27, %v2490_v24  ;;  %v6263_v9 = vpop.permute.xlu2 %2582 }
 0x44c   : > { %v2372_v45 = vpop.f32.mrf.mxu3 }
 0x44d   : > { %v2373_v53 = vadd.f32 %v2372_v45, %v6131_v58  ;;  %v6220_v57 = vadd.f32 %v2354_v28, %v5946_v7  ;;  %v2493_v58 = vsub.f32 %v2485_v20, %v2489_v43  ;;  %v6233_v18 = vadd.f32 1e-05, %v2494_v17 }
 0x44e   : > { %v2436_v7 = vmul.f32 %v6217_v59, %v6217_v59 }
 0x44f   : > { %7634 = vst [vmem:[#allocation27_spill] sm:$0xff] %v6220_v57  ;;  %v6223_v47 = vadd.f32 %v2373_v53, %v5956_v26  ;;  %v6231_v54 = vadd.f32 1e-05, %v2493_v58  ;;  %v2411_v26 = vadd.f32 %v6204_v38, %v6201_v40  ;;  %v2443_v61 = vmul.f32 %v6220_v57, %v6220_v57 }
 0x450   : > { %v2476_v10 = vadd.f32 %v2440_v12, %v2436_v7  ;;  %vm2517_vm11 = vweird.f32 %v6233_v18 }
 0x451   : > { %7635 = vst [vmem:[#allocation49_spill] sm:$0xff] %v6223_v47  ;;  %v2444_v4 = vmul.f32 %v6223_v47, %v6223_v47  ;;  %4300 = vrsqrt.f32 %v6231_v54  ;;  %v2412_v62 = vadd.f32 %v2411_v26, %v6220_v57  ;;  %v2421_v32 = vadd.f32 %v2420_v44, %v6223_v47 }
 0x452   : > { %v2355_v13 = vpop.f32.mrf.mxu2  ;;  %4302 = vrsqrt.f32 %v6233_v18  ;;  %v2468_v23 = vadd.f32 %v2467_v8, %v2443_v61  ;;  %vm2507_vm9 = vweird.f32 %v6231_v54 }
 0x453   : > { %v2356_v1 = vadd.f32 %v2355_v13, %v6159_v31  ;;  %v2477_v14 = vadd.f32 %v2476_v10, %v2444_v4  ;;  %v6267_v4 = vpop.permute.xlu1 %2614 }
 0x454   : > { %v2374_v22 = vpop.f32.mrf.mxu3 }
 0x455   : > { %v2375_v56 = vadd.f32 %v2374_v22, %v6159_v31  ;;  %v6250_v48 = vadd.f32 %v2356_v1, %v5976_v0 }
 0x457   : > { %7636 = vst [vmem:[#allocation47_spill] sm:$0xff] %v6250_v48  ;;  %v6255_v25 = vadd.f32 %v2375_v56, %v5984_v52  ;;  %v2413_v16 = vadd.f32 %v2412_v62, %v6250_v48  ;;  %v2447_v31 = vmul.f32 %v6250_v48, %v6250_v48  ;;  %v4301_v37 = vpop.eup %4300 }
 0x458   : > { %v4303_v2 = vpop.eup %4302  ;;  %v2502_v3 = vmul.f32 %v4301_v37, %v6231_v54  ;;  %vm2508_vm7 = vweird.f32 %v4301_v37 }
 0x459   : > { %7637 = vst [vmem:[#allocation50_spill] sm:$0xff] %v6255_v25  ;;  %v2422_v35 = vadd.f32 %v2421_v32, %v6255_v25  ;;  %v2448_v0 = vmul.f32 %v6255_v25, %v6255_v25  ;;  %v2414_v30 = vrot.slane %v2413_v16, 4  ;;  %v2469_v41 = vadd.f32 %v2468_v23, %v2447_v31  ;;  %vm2509_vm10 = vmor %vm2507_vm9, %vm2508_vm7 }
 0x45a   : > { %v2512_v46 = vmul.f32 %v4303_v2, %v6233_v18  ;;  %v2503_v20 = vmul.f32 %v4301_v37, %v2502_v3  ;;  %vm2518_vm8 = vweird.f32 %v4303_v2  ;;  %v6283_v18 = vpop.permute.xlu0 %2586 }
 0x45b   : > { %v2423_v33 = vrot.slane %v2422_v35, 4  ;;  %v2478_v36 = vadd.f32 %v2477_v14, %v2448_v0  ;;  %v2415_v52 = vadd.f32 %v2414_v30, %v2413_v16  ;;  %v2470_v11 = vrot.slane %v2469_v41, 4  ;;  %vm2519_vm12 = vmor %vm2517_vm11, %vm2518_vm8  ;;  %v6276_v0 = vpop.permute.xlu2 %2618 }
 0x45c   : > { %v2513_v24 = vmul.f32 %v4303_v2, %v2512_v46  ;;  %v2504_v55 = vmul.f32 0.5, %v2503_v20 }
 0x45d   : > { %v2424_v28 = vadd.f32 %v2423_v33, %v2422_v35  ;;  %v2479_v45 = vrot.slane %v2478_v36, 4  ;;  %v2416_v29 = vrot.slane %v2415_v52, 2  ;;  %v2471_v53 = vadd.f32 %v2470_v11, %v2469_v41 }
 0x45e   : > { %v2514_v13 = vmul.f32 0.5, %v2513_v24  ;;  %v2505_v61 = vsub.f32 1.5, %v2504_v55  ;;  %v2549_v35 = vsub.f32 %v6150_v21, %v6195_v34  ;;  %v2550_v33 = vsub.f32 %v6153_v42, %v6198_v63 }
 0x45f   : > { %v2425_v27 = vrot.slane %v2424_v28, 2  ;;  %v2480_v43 = vadd.f32 %v2479_v45, %v2478_v36  ;;  %v2417_v58 = vadd.f32 %v2416_v29, %v2415_v52  ;;  %v2472_v17 = vrot.slane %v2471_v53, 2  ;;  %v6293_v29 = vpop.permute.xlu1 %2574 }
 0x460   : > { %v2515_v44 = vsub.f32 1.5, %v2514_v13  ;;  %v2506_v62 = vmul.f32 %v4301_v37, %v2505_v61  ;;  %v2554_v55 = vsub.f32 %v6181_v49, %v6198_v63  ;;  %v2545_v13 = vsub.f32 %v6138_v50, %v6195_v34 }
 0x461   : > { %v2426_v5 = vadd.f32 %v2425_v27, %v2424_v28  ;;  %v2481_v12 = vrot.slane %v2480_v43, 2  ;;  %v2418_v7 = vrot.slane %v2417_v58, 1  ;;  %v2473_v26 = vadd.f32 %v2472_v17, %v2471_v53 }
 0x462   : > { %v2516_v23 = vmul.f32 %v4303_v2, %v2515_v44  ;;  %v2510_v14 = vsel %vm2509_vm10, %v4301_v37, %v2506_v62  ;;  %v2542_v53 = vsub.f32 %v6147_v19, %v6198_v63 }
 0x463   : > { %v2427_v1 = vrot.slane %v2426_v5, 1  ;;  %v2482_v22 = vadd.f32 %v2481_v12, %v2480_v43  ;;  %v2419_v56 = vadd.f32 %v2418_v7, %v2417_v58  ;;  %v2474_v8 = vrot.slane %v2473_v26, 1 }
 0x464   : > { %v2520_v41 = vsel %vm2519_vm12, %v4303_v2, %v2516_v23  ;;  %v2565_v52 = vmul.f32 %v2549_v35, %v2510_v14  ;;  %v2541_v2 = vsub.f32 %v6144_v15, %v6195_v34  ;;  %v2561_v62 = vmul.f32 %v2545_v13, %v2510_v14 }
 0x465   : > { %v2428_v10 = vadd.f32 %v2427_v1, %v2426_v5  ;;  %v2483_v32 = vrot.slane %v2482_v22, 1  ;;  %v6272_v16 = vmul.f32 %v2419_v56, %v7613_v39  ;;  %v2475_v31 = vadd.f32 %v2474_v8, %v2473_v26  ;;  %v6314_v1 = vpop.permute.xlu2 %2578 }
 0x466   : > { %v2566_v28 = vmul.f32 %v2550_v33, %v2520_v41  ;;  %v2597_v27 = vmul.f32 %v6263_v9, %v2565_v52  ;;  %v2557_v43 = vmul.f32 %v2541_v2, %v2510_v14  ;;  %v2558_v17 = vmul.f32 %v2542_v53, %v2520_v41  ;;  %v4442_v53 = vld [vmem:[%s7325_s3 + $0x70] sm:$0xff] }
 0x467   : > { %v6279_v30 = vmul.f32 %v2428_v10, %v7613_v39  ;;  %v2484_v54 = vadd.f32 %v2483_v32, %v2482_v22  ;;  %v2487_v36 = vmul.f32 %v2475_v31, %v7613_v39  ;;  %v2491_v37 = vmul.f32 %v6272_v16, %v6272_v16  ;;  %v6321_v10 = vpop.permute.xlu0 %2606  ;;  %v6326_v35 = vpop.permute.xlu1 %2610 }
 0x468   : > { %v2598_v58 = vmul.f32 %v6263_v9, %v2566_v28  ;;  %v2570_v12 = vmul.f32 %v2554_v55, %v2520_v41  ;;  %v2629_v7 = vadd.f32 %v6267_v4, %v2597_v27  ;;  %v2589_v26 = vmul.f32 %v6293_v29, %v2557_v43  ;;  %v6347_v55 = vld [vmem:[%s7323_s1 + $0x60] sm:$0xff] }
 0x469   : > { %v2488_v11 = vmul.f32 %v2484_v54, %v7613_v39  ;;  %v2492_v3 = vmul.f32 %v6279_v30, %v6279_v30  ;;  %v2495_v45 = vsub.f32 %v2487_v36, %v2491_v37  ;;  %v2553_v39 = vsub.f32 %v6178_v51, %v6195_v34  ;;  %v4441_v37 = vld [vmem:[%s7325_s3 + $0x68] sm:$0xff] }
 0x46a   : > { %v2546_v22 = vsub.f32 %v6141_v60, %v6198_v63  ;;  %v2630_v44 = vadd.f32 %v6267_v4, %v2598_v58  ;;  %v2590_v56 = vmul.f32 %v6293_v29, %v2558_v17  ;;  %v2602_v8 = vmul.f32 %v6283_v18, %v2570_v12 }
 0x46b   : > { %v2496_v46 = vsub.f32 %v2488_v11, %v2492_v3  ;;  %v6297_v20 = vadd.f32 1e-05, %v2495_v45  ;;  %v2569_v5 = vmul.f32 %v2553_v39, %v2510_v14  ;;  %v2593_v31 = vmul.f32 %v6314_v1, %v2561_v62  ;;  %v4440_v14 = vld [vmem:[%s7325_s3 + $0x78] sm:$0xff] }
 0x46c   : > { %v2562_v32 = vmul.f32 %v2546_v22, %v2520_v41  ;;  %v2634_v23 = vadd.f32 %v6276_v0, %v2602_v8  ;;  %v4497_v54 = vmov 12   ;;  %v2621_v36 = vadd.f32 %v6321_v10, %v2589_v26  ;;  %v4443_v26 = vld [vmem:[%s7325_s3 + $0x50] sm:$0xff] }
 0x46d   : > { %v6302_v24 = vadd.f32 1e-05, %v2496_v46  ;;  %4304 = vrsqrt.f32 %v6297_v20  ;;  %v2601_v61 = vmul.f32 %v6283_v18, %v2569_v5  ;;  %4141 = vset.pattern.permute.xlu1 %v4497_v54  ;;  %4142 = vset.pattern.permute.xlu0 %v4497_v54  ;;  %v2625_v3 = vadd.f32 %v6326_v35, %v2593_v31 }
 0x46e   : > { %v2594_v33 = vmul.f32 %v6314_v1, %v2562_v32  ;;  %2722 = vperm.xlu1 %4141, %v4440_v14   ;;  %2714 = vperm.xlu0 %4142, %v4441_v37   ;;  %v2622_v28 = vadd.f32 %v6321_v10, %v2590_v56  ;;  %v2658_v45 = vpack.c.bf16 %v2634_v23, %v2630_v44  ;;  %vm2527_vm0 = vweird.f32 %v6297_v20 }
 0x46f   : > { %4306 = vrsqrt.f32 %v6302_v24  ;;  %v2633_v34 = vadd.f32 %v6276_v0, %v2601_v61  ;;  %4140 = vset.pattern.permute.xlu2 %v4497_v54  ;;  %v2653_v39 = vpack.c.bf16 %v2625_v3, %v2621_v36  ;;  %v4444_v61 = vld [vmem:[%s7325_s3 + $0x30] sm:$0xff]  ;;  %v2552_v44 = vsub.f32 %v6223_v47, %v6279_v30 }
 0x470   : > { %v2626_v46 = vadd.f32 %v6326_v35, %v2594_v33  ;;  %2718 = vperm.xlu2 %4140, %v4442_v53   ;;  %2844 = vmatpush.bf16.msra.mxu1 %v2658_v45  ;;  %v2543_v56 = vsub.f32 %v6201_v40, %v6272_v16  ;;  %vm2537_vm2 = vweird.f32 %v6302_v24  ;;  %v2544_v62 = vsub.f32 %v6217_v59, %v6279_v30 }
 0x471   : > { %v2657_v41 = vpack.c.bf16 %v2633_v34, %v2629_v7  ;;  %v2551_v7 = vsub.f32 %v6220_v57, %v6272_v16  ;;  %v2555_v34 = vsub.f32 %v6250_v48, %v6272_v16  ;;  %v2547_v23 = vsub.f32 %v6204_v38, %v6272_v16 }
 0x472   : > { %v2654_v17 = vpack.c.bf16 %v2626_v46, %v2622_v28  ;;  %v2548_v31 = vsub.f32 %v6207_v6, %v6279_v30 }
 0x473   : > { %v4305_v63 = vpop.eup %4304  ;;  %2795 = vmatpush.bf16.msra.mxu0 %v2657_v41 }
 0x474   : > { %v2522_v11 = vmul.f32 %v4305_v63, %v6297_v20  ;;  %vm2528_vm14 = vweird.f32 %v4305_v63  ;;  %2845 = vmatpush.bf16.msra.mxu1 %v2654_v17  ;;  %v4445_v20 = vld [vmem:[%s7325_s3 + $0x60] sm:$0xff] }
 0x475   : > { %v4307_v52 = vpop.eup %4306  ;;  %vm2529_vm1 = vmor %vm2527_vm0, %vm2528_vm14 }
 0x476   : > { %v2532_v2 = vmul.f32 %v4307_v52, %v6302_v24  ;;  %v2523_v27 = vmul.f32 %v4305_v63, %v2522_v11  ;;  %vm2538_vm15 = vweird.f32 %v4307_v52  ;;  %2702 = vperm.xlu1 %4141, %v4443_v26   ;;  %2686 = vperm.xlu0 %4142, %v4444_v61   ;;  %v2556_v24 = vsub.f32 %v6255_v25, %v6279_v30  ;;  %v4449_v61 = vld [vmem:[%s7325_s3 + $0x38] sm:$0xff] }
 0x477   : > { %2796 = vmatpush.bf16.msra.mxu0 %v2653_v39  ;;  %4000 = vmatmul.msk.bf16.vlgmr.msra.gmra.mxu1 %vm558_vm13, %v6347_v55  ;;  %vm2539_vm3 = vmor %vm2537_vm2, %vm2538_vm15  ;;  %v4446_v39 = vld [vmem:[%s7325_s3 + $0x40] sm:$0xff] }
 0x478   : > { %v2533_v43 = vmul.f32 %v4307_v52, %v2532_v2  ;;  %v2524_v58 = vmul.f32 0.5, %v2523_v27  ;;  %2710 = vperm.xlu2 %4140, %v4445_v20   ;;  %v4057_v20 = vld [vmem:[%s7323_s1 + $0x88] sm:$0xff] }
 0x47a   : > { %v2534_v5 = vmul.f32 0.5, %v2533_v43  ;;  %v2525_v12 = vsub.f32 1.5, %v2524_v58  ;;  %3992 = vmatmul.msk.bf16.vlgmr.msra.gmra.mxu0 %vm558_vm13, %v6347_v55 }
 0x47c   : > { %v2535_v13 = vsub.f32 1.5, %v2534_v5  ;;  %v2526_v22 = vmul.f32 %v4305_v63, %v2525_v12 }
 0x47e   : > { %v2536_v8 = vmul.f32 %v4307_v52, %v2535_v13  ;;  %v2530_v32 = vsel %vm2529_vm1, %v4305_v63, %v2526_v22  ;;  %2694 = vperm.xlu1 %4141, %v4446_v39   ;;  %v4053_v13 = vld [vmem:[%s7323_s1 + $0x68] sm:$0xff]  ;;  %v4452_v22 = vld [vmem:[%s7325_s3 + $0x10] sm:$0xff] }
 0x47f   : > { %v2567_v33 = vmul.f32 %v2551_v7, %v2530_v32  ;;  %v2559_v36 = vmul.f32 %v2543_v56, %v2530_v32  ;;  %v2571_v14 = vmul.f32 %v2555_v34, %v2530_v32  ;;  %v2563_v3 = vmul.f32 %v2547_v23, %v2530_v32  ;;  %v4054_v56 = vld [vmem:[%s7323_s1 + $0x70] sm:$0xff]  ;;  %v4056_v34 = vld [vmem:[%s7323_s1 + $0x80] sm:$0xff] }
 0x480   : > { %v2540_v54 = vsel %vm2539_vm3, %v4307_v52, %v2536_v8  ;;  %v4454_v8 = vld [vmem:[%s7325_s3 + $0x8] sm:$0xff]  ;;  %v4058_v32 = vld [vmem:[%s7323_s1 + $0x90] sm:$0xff] }
 0x481   : > { %v2568_v41 = vmul.f32 %v2552_v44, %v2540_v54  ;;  %v2560_v37 = vmul.f32 %v2544_v62, %v2540_v54  ;;  %v2572_v11 = vmul.f32 %v2556_v24, %v2540_v54  ;;  %v2599_v63 = vmul.f32 %v6263_v9, %v2567_v33  ;;  %v4453_v44 = vld [vmem:[%s7325_s3 + $0x20] sm:$0xff]  ;;  %v4055_v62 = vld [vmem:[%s7323_s1 + $0x78] sm:$0xff] }
 0x482   : > { %v2591_v28 = vmul.f32 %v6293_v29, %v2559_v36  ;;  %v2603_v45 = vmul.f32 %v6283_v18, %v2571_v14  ;;  %v2564_v2 = vmul.f32 %v2548_v31, %v2540_v54  ;;  %v2595_v52 = vmul.f32 %v6314_v1, %v2563_v3  ;;  %v4059_v24 = vld [vmem:[%s7323_s1 + $0x98] sm:$0xff] }
 0x483   : > { %v2600_v16 = vmul.f32 %v6263_v9, %v2568_v41  ;;  %v2592_v46 = vmul.f32 %v6293_v29, %v2560_v37  ;;  %v2604_v30 = vmul.f32 %v6283_v18, %v2572_v11  ;;  %v2631_v53 = vadd.f32 %v6267_v4, %v2599_v63  ;;  %v4447_v18 = vld [vmem:[%s7325_s3 + $0x28] sm:$0xff] }
 0x484   : > { %v2635_v27 = vadd.f32 %v6276_v0, %v2603_v45  ;;  %v2596_v43 = vmul.f32 %v6314_v1, %v2564_v2  ;;  %2682 = vperm.xlu0 %4142, %v4447_v18   ;;  %v2627_v29 = vadd.f32 %v6326_v35, %v2595_v52  ;;  %v2623_v17 = vadd.f32 %v6321_v10, %v2591_v28  ;;  %v4448_v1 = vld [vmem:[%s7325_s3 + $0x58] sm:$0xff] }
 0x485   : > { %v2632_v58 = vadd.f32 %v6267_v4, %v2600_v16  ;;  %v2636_v9 = vadd.f32 %v6276_v0, %v2604_v30  ;;  %2706 = vperm.xlu2 %4140, %v4448_v1   ;;  %v2624_v4 = vadd.f32 %v6321_v10, %v2592_v46  ;;  %v4450_v10 = vld [vmem:[%s7325_s3] sm:$0xff] }
 0x486   : > { %v2659_v5 = vpack.c.bf16 %v2635_v27, %v2631_v53  ;;  %v2628_v12 = vadd.f32 %v6326_v35, %v2596_v43  ;;  %v2655_v7 = vpack.c.bf16 %v2627_v29, %v2623_v17  ;;  %2690 = vperm.xlu1 %4141, %v4449_v61   ;;  %v4451_v35 = vld [vmem:[%s7325_s3 + $0x48] sm:$0xff] }
 0x487   : > { %v2660_v0 = vpack.c.bf16 %v2636_v9, %v2632_v58  ;;  %4001 = vmatmul.msk.bf16.gmra.mxu1 %vm558_vm13, %v4053_v13 }
 0x488   : > { %2893 = vmatpush.bf16.msra.mxu2 %v2659_v5  ;;  %v2656_v26 = vpack.c.bf16 %v2628_v12, %v2624_v4 }
 0x489   : > { %2942 = vmatpush.bf16.msra.mxu3 %v2660_v0 }
 0x48a   : > { %3993 = vmatmul.msk.bf16.gmra.mxu0 %vm558_vm13, %v4053_v13 }
 0x48c   : > { %2894 = vmatpush.bf16.msra.mxu2 %v2655_v7  ;;  %2662 = vperm.xlu0 %4142, %v4450_v10  }
 0x48d   : > { %2943 = vmatpush.bf16.msra.mxu3 %v2656_v26  ;;  %2698 = vperm.xlu2 %4140, %v4451_v35  }
 0x48e   : > { %2670 = vperm.xlu1 %4141, %v4452_v22  }
 0x48f   : > { %4008 = vmatmul.msk.bf16.vlgmr.msra.gmra.mxu2 %vm558_vm13, %v6347_v55 }
 0x490   : > { %4016 = vmatmul.msk.bf16.vlgmr.msra.gmra.mxu3 %vm558_vm13, %v6347_v55  ;;  %v4455_v55 = vld [vmem:[%s7325_s3 + $0x18] sm:$0xff] }
 0x495   : > { %2678 = vperm.xlu2 %4140, %v4453_v44  }
 0x496   : > { %2666 = vperm.xlu1 %4141, %v4454_v8  }
 0x497   : > { %4002 = vmatmul.msk.bf16.gmra.mxu1 %vm558_vm13, %v4054_v56 }
 0x49a   : > { %3994 = vmatmul.msk.bf16.gmra.mxu0 %vm558_vm13, %v4054_v56 }
 0x49d   : > { %2674 = vperm.xlu2 %4140, %v4455_v55  }
 0x49f   : > { %4009 = vmatmul.msk.bf16.gmra.mxu2 %vm558_vm13, %v4053_v13 }
 0x4a0   : > { %4017 = vmatmul.msk.bf16.gmra.mxu3 %vm558_vm13, %v4053_v13 }
 0x4a7   : > { %4003 = vmatmul.msk.bf16.gmra.mxu1 %vm558_vm13, %v4055_v62 }
 0x4aa   : > { %3995 = vmatmul.msk.bf16.gmra.mxu0 %vm558_vm13, %v4055_v62 }
 0x4af   : > { %4010 = vmatmul.msk.bf16.gmra.mxu2 %vm558_vm13, %v4054_v56 }
 0x4b0   : > { %4018 = vmatmul.msk.bf16.gmra.mxu3 %vm558_vm13, %v4054_v56 }
 0x4b7   : > { %4004 = vmatmul.msk.bf16.gmra.mxu1 %vm558_vm13, %v4056_v34 }
 0x4ba   : > { %3996 = vmatmul.msk.bf16.gmra.mxu0 %vm558_vm13, %v4056_v34 }
 0x4bf   : > { %4011 = vmatmul.msk.bf16.gmra.mxu2 %vm558_vm13, %v4055_v62 }
 0x4c0   : > { %4019 = vmatmul.msk.bf16.gmra.mxu3 %vm558_vm13, %v4055_v62 }
 0x4c7   : > { %4005 = vmatmul.msk.bf16.gmra.mxu1 %vm558_vm13, %v4057_v20 }
 0x4ca   : > { %3997 = vmatmul.msk.bf16.gmra.mxu0 %vm558_vm13, %v4057_v20  ;;  %v6488_v36 = vpop.permute.xlu2 %2718 }
 0x4cf   : > { %4012 = vmatmul.msk.bf16.gmra.mxu2 %vm558_vm13, %v4056_v34 }
 0x4d0   : > { %4020 = vmatmul.msk.bf16.gmra.mxu3 %vm558_vm13, %v4056_v34 }
 0x4d2   : > { %v6490_v37 = vpop.permute.xlu2 %2710 }
 0x4d7   : > { %4006 = vmatmul.msk.bf16.gmra.mxu1 %vm558_vm13, %v4058_v32 }
 0x4da   : > { %3998 = vmatmul.msk.bf16.gmra.mxu0 %vm558_vm13, %v4058_v32 }
 0x4df   : > { %4013 = vmatmul.msk.bf16.gmra.mxu2 %vm558_vm13, %v4057_v20  ;;  %v6502_v52 = vpop.permute.xlu2 %2706 }
 0x4e0   : > { %4021 = vmatmul.msk.bf16.gmra.mxu3 %vm558_vm13, %v4057_v20  ;;  %v6496_v45 = vpop.permute.xlu1 %2722  ;;  %v6508_v9 = vpop.permute.xlu0 %2714 }
 0x4e7   : > { %4007 = vmatmul.msk.bf16.gmra.mxu1 %vm558_vm13, %v4059_v24  ;;  %v6510_v18 = vpop.permute.xlu2 %2698 }
 0x4e8   : > { %v6506_v58 = vpop.permute.xlu1 %2702  ;;  %v6516_v4 = vpop.permute.xlu0 %2686 }
 0x4ea   : > { %3999 = vmatmul.msk.bf16.gmra.mxu0 %vm558_vm13, %v4059_v24 }
 0x4ef   : > { %4014 = vmatmul.msk.bf16.gmra.mxu2 %vm558_vm13, %v4058_v32  ;;  %v6518_v0 = vpop.permute.xlu2 %2678 }
 0x4f0   : > { %4022 = vmatmul.msk.bf16.gmra.mxu3 %vm558_vm13, %v4058_v32  ;;  %v6514_v12 = vpop.permute.xlu1 %2694 }
 0x4f4   : > { %v6480_v31 = vpop.f32.mrf.mxu1 }
 0x4f6   : > { %v6531_v22 = vpop.permute.xlu0 %2682 }
 0x4f7   : > { %v6478_v23 = vpop.f32.mrf.mxu0  ;;  %v2675_v21 = vpop.permute.xlu2 %2674 }
 0x4f8   : > { %v6529_v35 = vpop.permute.xlu1 %2690 }
 0x4fc   : > { %v6486_v33 = vpop.f32.mrf.mxu1 }
 0x4fe   : > { %v2663_v49 = vpop.permute.xlu0 %2662 }
 0x4ff   : > { %4015 = vmatmul.msk.bf16.gmra.mxu2 %vm558_vm13, %v4059_v24  ;;  %v6484_v54 = vpop.f32.mrf.mxu0  ;;  %v6574_v42 = vadd.f32 %v6480_v31, %v2663_v49 }
 0x500   : > { %4023 = vmatmul.msk.bf16.gmra.mxu3 %vm558_vm13, %v4059_v24  ;;  %v2671_v25 = vpop.permute.xlu1 %2670 }
 0x501   : > { %7646 = vst [vmem:[#allocation59_spill] sm:$0xff] %v6574_v42 }
 0x504   : > { %v2852_v41 = vpop.f32.mrf.mxu1 }
 0x505   : > { %v6553_v47 = vadd.f32 %v2852_v41, %v2671_v25  ;;  %v6571_v41 = vadd.f32 %v6478_v23, %v2663_v49 }
 0x507   : > { %v2803_v14 = vpop.f32.mrf.mxu0  ;;  %7642 = vst [vmem:[#allocation53_spill] sm:$0xff] %v6553_v47  ;;  %v3058_v40 = vmul.f32 0.044715, %v6553_v47 }
 0x508   : > { %v6551_v48 = vadd.f32 %v2803_v14, %v2671_v25  ;;  %7645 = vst [vmem:[#allocation52_spill] sm:$0xff] %v6571_v41 }
 0x509   : > { %v6577_v60 = vmul.f32 %v3058_v40, %v6553_v47 }
 0x50a   : > { %7641 = vst [vmem:[#allocation54_spill] sm:$0xff] %v6551_v48  ;;  %v3057_v59 = vmul.f32 0.044715, %v6551_v48 }
 0x50b   : > { %7647 = vst [vmem:[#allocation58_spill] sm:$0xff] %v6577_v60 }
 0x50c   : > { %v6494_v63 = vpop.f32.mrf.mxu1  ;;  %v6568_v14 = vmul.f32 %v3057_v59, %v6551_v48 }
 0x50e   : > { %7644 = vst [vmem:[#allocation65_spill] sm:$0xff] %v6568_v14 }
 0x50f   : > { %v6492_v11 = vpop.f32.mrf.mxu0 }
 0x512   : > { %v2896_v3 = vpop.f32.mrf.mxu2 }
 0x513   : > { %v2945_v28 = vpop.f32.mrf.mxu3  ;;  %v6565_v51 = vadd.f32 %v2896_v3, %v2663_v49 }
 0x514   : > { %v2857_v46 = vpop.f32.mrf.mxu1  ;;  %v6585_v3 = vadd.f32 %v2945_v28, %v2663_v49  ;;  %v6604_v49 = vadd.f32 %v6492_v11, %v2675_v21 }
 0x515   : > { %7643 = vst [vmem:[#allocation66_spill] sm:$0xff] %v6565_v51  ;;  %v3051_v23 = vmul.f32 0.044715, %v6565_v51  ;;  %v6596_v40 = vadd.f32 %v2857_v46, %v6518_v0  ;;  %v6615_v46 = vadd.f32 %v6494_v63, %v2675_v21 }
 0x516   : > { %7650 = vst [vmem:[#allocation43_spill] sm:$0xff] %v6585_v3 }
 0x517   : > { %v2808_v2 = vpop.f32.mrf.mxu0  ;;  %7651 = vst [vmem:[#allocation44_spill] sm:$0xff] %v6596_v40  ;;  %v6636_v63 = vmul.f32 %v3051_v23, %v6565_v51 }
 0x518   : > { %v6593_v31 = vadd.f32 %v2808_v2, %v6518_v0  ;;  %7653 = vst [vmem:[#allocation40_spill] sm:$0xff] %v6604_v49 }
 0x519   : > { %7657 = vst [vmem:[#allocation30_spill] sm:$0xff] %v6615_v46 }
 0x51a   : > { %v6498_v16 = vpop.f32.mrf.mxu2  ;;  %7662 = vst [vmem:[#allocation39_spill] sm:$0xff] %v6636_v63 }
 0x51b   : > { %v6500_v30 = vpop.f32.mrf.mxu3 }
 0x51c   : > { %v2859_v43 = vpop.f32.mrf.mxu1 }
 0x51d   : > { %v6607_v28 = vadd.f32 %v2859_v43, %v6531_v22  ;;  %v3052_v43 = vmul.f32 0.044715, %v6585_v3 }
 0x51f   : > { %v2810_v53 = vpop.f32.mrf.mxu0  ;;  %7654 = vst [vmem:[#allocation46_spill] sm:$0xff] %v6607_v28  ;;  %v6662_v60 = vmul.f32 %v3052_v43, %v6585_v3 }
 0x521   : > { %7667 = vst [vmem:[#allocation28_spill] sm:$0xff] %v6662_v60 }
 0x522   : > { %v2901_v27 = vpop.f32.mrf.mxu2 }
 0x523   : > { %v6504_v39 = vpop.f32.mrf.mxu3 }
 0x524   : > { %v2862_v5 = vpop.f32.mrf.mxu1  ;;  %v6624_v11 = vadd.f32 %v6504_v39, %v2671_v25  ;;  %v3070_v39 = vmul.f32 0.044715, %v6607_v28 }
 0x526   : > { %7660 = vst [vmem:[#allocation41_spill] sm:$0xff] %v6624_v11  ;;  %v3060_v63 = vmul.f32 0.044715, %v6624_v11  ;;  %v6687_v3 = vmul.f32 %v3070_v39, %v6607_v28 }
 0x527   : > { %v2813_v29 = vpop.f32.mrf.mxu0 }
 0x528   : > { %7670 = vst [vmem:[#allocation32_spill] sm:$0xff] %v6687_v3 }
 0x52a   : > { %v2903_v17 = vpop.f32.mrf.mxu2 }
 0x52b   : > { %v6512_v1 = vpop.f32.mrf.mxu3  ;;  %v6633_v41 = vadd.f32 %v2903_v17, %v2675_v21 }
 0x52c   : > { %v6524_v26 = vpop.f32.mrf.mxu1 }
 0x52d   : > { %7661 = vst [vmem:[#allocation31_spill] sm:$0xff] %v6633_v41 }
 0x52f   : > { %v6520_v13 = vpop.f32.mrf.mxu0 }
 0x530   : > { %v6648_v17 = vadd.f32 %v6520_v13, %v6529_v35  ;;  %v3063_v13 = vmul.f32 0.044715, %v6633_v41 }
 0x532   : > { %v6522_v7 = vpop.f32.mrf.mxu2 }
 0x533   : > { %v2955_v61 = vpop.f32.mrf.mxu3  ;;  %v6659_v51 = vadd.f32 %v6522_v7, %v6518_v0  ;;  %v6682_v7 = vadd.f32 %v6524_v26, %v6529_v35 }
 0x534   : > { %v6527_v10 = vadd.f32 %v2955_v61, %v6518_v0  ;;  %v6537_v8 = vpop.f32.mrf.mxu1 }
 0x535   : > { %7666 = vst [vmem:[#allocation26_spill] sm:$0xff] %v6659_v51  ;;  %v3067_v46 = vmul.f32 0.044715, %v6659_v51 }
 0x536   : > { %7638 = vst [vmem:[#allocation55_spill] sm:$0xff] %v6527_v10 }
 0x537   : > { %v6533_v44 = vpop.f32.mrf.mxu0 }
 0x538   : > { %v6700_v26 = vadd.f32 %v6533_v44, %v6514_v12  ;;  %v3078_v44 = vmul.f32 0.044715, %v6682_v7 }
 0x53a   : > { %v6535_v56 = vpop.f32.mrf.mxu2 }
 0x53b   : > { %v2957_v55 = vpop.f32.mrf.mxu3  ;;  %v6704_v39 = vadd.f32 %v6535_v56, %v6531_v22 }
 0x53c   : > { %v6540_v62 = vadd.f32 %v2957_v55, %v6531_v22  ;;  %v6546_v32 = vpop.f32.mrf.mxu1 }
 0x53d   : > { %7673 = vst [vmem:[#allocation7_spill] sm:$0xff] %v6704_v39 }
 0x53e   : > { %7639 = vst [vmem:[#allocation57_spill] sm:$0xff] %v6540_v62 }
 0x53f   : > { %v6542_v34 = vpop.f32.mrf.mxu0 }
 0x542   : > { %v6544_v20 = vpop.f32.mrf.mxu2 }
 0x543   : > { %v2960_v24 = vpop.f32.mrf.mxu3  ;;  %v6730_v56 = vadd.f32 %v6544_v20, %v6516_v4 }
 0x544   : > { %v6549_v61 = vadd.f32 %v2960_v24, %v6516_v4  ;;  %v6559_v55 = vpop.f32.mrf.mxu1  ;;  %v2667_v24 = vpop.permute.xlu1 %2666 }
 0x545   : > { %v6580_v50 = vadd.f32 %v6484_v54, %v2667_v24  ;;  %v6583_v19 = vadd.f32 %v6486_v33, %v2667_v24  ;;  %v6599_v54 = vadd.f32 %v2810_v53, %v6531_v22  ;;  %v6618_v53 = vadd.f32 %v6498_v16, %v2667_v24  ;;  %7675 = vst [vmem:[#allocation8_spill] sm:$0xff] %v6730_v56 }
 0x546   : > { %7640 = vst [vmem:[#allocation60_spill] sm:$0xff] %v6549_v61  ;;  %v3065_v16 = vmul.f32 0.044715, %v6593_v31  ;;  %v6726_v22 = vadd.f32 %v6546_v32, %v6510_v18  ;;  %v3081_v32 = vmul.f32 0.044715, %v6700_v26 }
 0x547   : > { %v6555_v57 = vpop.f32.mrf.mxu0  ;;  %7648 = vst [vmem:[#allocation64_spill] sm:$0xff] %v6580_v50  ;;  %v6621_v50 = vadd.f32 %v6500_v30, %v2667_v24  ;;  %v3066_v30 = vmul.f32 0.044715, %v6596_v40  ;;  %v3076_v14 = vmul.f32 0.044715, %v6549_v61 }
 0x548   : > { %7649 = vst [vmem:[#allocation35_spill] sm:$0xff] %v6583_v19  ;;  %v6609_v19 = vadd.f32 %v2901_v27, %v2671_v25  ;;  %v6628_v27 = vadd.f32 %v2813_v29, %v6516_v4  ;;  %v3069_v25 = vmul.f32 0.044715, %v6599_v54  ;;  %v6644_v29 = vadd.f32 %v6512_v1, %v2675_v21 }
 0x549   : > { %7652 = vst [vmem:[#allocation48_spill] sm:$0xff] %v6599_v54  ;;  %v6654_v23 = vmul.f32 0.044715, %v6621_v50 }
 0x54a   : > { %v6557_v6 = vpop.f32.mrf.mxu2  ;;  %7655 = vst [vmem:[#allocation45_spill] sm:$0xff] %v6609_v19  ;;  %v3059_v24 = vmul.f32 0.044715, %v6609_v19  ;;  %v3073_v21 = vmul.f32 0.044715, %v6628_v27  ;;  %v6678_v0 = vmul.f32 %v3069_v25, %v6599_v54  ;;  %v6695_v25 = vmul.f32 %v3060_v63, %v6624_v11 }
 0x54b   : > { %v6561_v38 = vpop.f32.mrf.mxu3  ;;  %7658 = vst [vmem:[#allocation38_spill] sm:$0xff] %v6618_v53  ;;  %v6717_v63 = vadd.f32 %v6537_v8, %v6514_v12  ;;  %v6750_v20 = vadd.f32 %v6557_v6, %v6529_v35  ;;  %v6763_v11 = vmul.f32 %v3078_v44, %v6682_v7  ;;  %v6778_v44 = vmul.f32 %v3081_v32, %v6700_v26 }
 0x54c   : > { %v6601_v42 = vpop.f32.mrf.mxu1  ;;  %7659 = vst [vmem:[#allocation33_spill] sm:$0xff] %v6621_v50  ;;  %v6675_v50 = vmul.f32 %v3066_v30, %v6596_v40  ;;  %v6690_v47 = vmul.f32 %v3059_v24, %v6609_v19  ;;  %v3077_v30 = vmul.f32 0.044715, %v6648_v17  ;;  %v6707_v24 = vmul.f32 %v3073_v21, %v6628_v27 }
 0x54d   : > { %7663 = vst [vmem:[#allocation34_spill] sm:$0xff] %v6644_v29  ;;  %v6713_v19 = vmul.f32 %v3063_v13, %v6633_v41  ;;  %v6744_v13 = vmul.f32 %v3067_v46, %v6659_v51  ;;  %v3075_v41 = vmul.f32 0.044715, %v6730_v56  ;;  %v3079_v49 = vmul.f32 0.044715, %v6750_v20 }
 0x54e   : > { %7665 = vst [vmem:[#allocation21_spill] sm:$0xff] %v6654_v23  ;;  %v6672_v23 = vmul.f32 %v3065_v16, %v6593_v31  ;;  %v3064_v16 = vmul.f32 0.044715, %v6644_v29  ;;  %v6736_v8 = vmul.f32 %v3077_v30, %v6648_v17  ;;  %v3072_v30 = vmul.f32 0.044715, %v6540_v62 }
 0x54f   : > { %v6587_v59 = vpop.f32.mrf.mxu0  ;;  %7668 = vst [vmem:[#allocation36_spill] sm:$0xff] %v6675_v50 }
 0x550   : > { %7669 = vst [vmem:[#allocation22_spill] sm:$0xff] %v6678_v0  ;;  %v6733_v21 = vmul.f32 %v3064_v16, %v6644_v29  ;;  %v3082_v16 = vmul.f32 0.044715, %v6717_v63 }
 0x551   : > { %7671 = vst [vmem:[#allocation29_spill] sm:$0xff] %v6690_v47 }
 0x552   : > { %v6589_v15 = vpop.f32.mrf.mxu2  ;;  %7672 = vst [vmem:[#allocation37_spill] sm:$0xff] %v6695_v25  ;;  %v6722_v25 = vadd.f32 %v6542_v34, %v6510_v18  ;;  %v6741_v34 = vadd.f32 %v6555_v57, %v6506_v58  ;;  %v6760_v57 = vadd.f32 %v6561_v38, %v6529_v35  ;;  %v6775_v35 = vadd.f32 %v6587_v59, %v6502_v52 }
 0x553   : > { %v2965_v33 = vpop.f32.mrf.mxu3  ;;  %7674 = vst [vmem:[#allocation5_spill] sm:$0xff] %v6713_v19  ;;  %v3086_v19 = vmul.f32 0.044715, %v6726_v22 }
 0x554   : > { %v6612_v2 = vadd.f32 %v2965_v33, %v6514_v12  ;;  %v6631_v33 = vadd.f32 %v2862_v5, %v6516_v4  ;;  %v6651_v5 = vmul.f32 0.044715, %v6618_v53  ;;  %v2877_v43 = vpop.f32.mrf.mxu1  ;;  %7676 = vst [vmem:[#allocation9_spill] sm:$0xff] %v6733_v21  ;;  %v3071_v4 = vmul.f32 0.044715, %v6704_v39 }
 0x555   : > { %7677 = vst [vmem:[#allocation6_spill] sm:$0xff] %v6744_v13  ;;  %v6756_v21 = vadd.f32 %v6559_v55, %v6506_v58  ;;  %v3085_v6 = vmul.f32 0.044715, %v6722_v25  ;;  %v3089_v38 = vmul.f32 0.044715, %v6741_v34 }
 0x556   : > { %7656 = vst [vmem:[#allocation51_spill] sm:$0xff] %v6612_v2  ;;  %v3074_v1 = vmul.f32 0.044715, %v6631_v33  ;;  %v6781_v48 = vmul.f32 %v3071_v4, %v6704_v39  ;;  %v3080_v32 = vmul.f32 0.044715, %v6760_v57  ;;  %v6800_v4 = vmul.f32 %v3086_v19, %v6726_v22 }
 0x557   : > { %7664 = vst [vmem:[#allocation42_spill] sm:$0xff] %v6651_v5  ;;  %v6667_v53 = vpop.f32.mrf.mxu0  ;;  %v3090_v59 = vmul.f32 0.044715, %v6756_v21  ;;  %v6797_v3 = vmul.f32 %v3085_v6, %v6722_v25  ;;  %v6821_v19 = vmul.f32 %v3079_v49, %v6750_v20 }
 0x558   : > { %v6710_v47 = vmul.f32 %v3074_v1, %v6631_v33  ;;  %v3068_v1 = vmul.f32 0.044715, %v6527_v10  ;;  %7678 = vst [vmem:[#allocation10_spill] sm:$0xff] %v6750_v20  ;;  %v6818_v6 = vadd.f32 %v6667_v53, %v6490_v37 }
 0x559   : > { %7679 = vst [vmem:[#allocation17_spill] sm:$0xff] %v6760_v57 }
 0x55a   : > { %v6669_v5 = vpop.f32.mrf.mxu2  ;;  %v6769_v55 = vmul.f32 %v3068_v1, %v6527_v10  ;;  %7681 = vst [vmem:[#allocation4_spill] sm:$0xff] %v6781_v48  ;;  %v6786_v1 = vadd.f32 %v6589_v15, %v6514_v12  ;;  %v6792_v10 = vmul.f32 %v3072_v30, %v6540_v62  ;;  %v6803_v48 = vmul.f32 %v3075_v41, %v6730_v56 }
 0x55b   : > { %v6684_v60 = vpop.f32.mrf.mxu3  ;;  %v6807_v15 = vadd.f32 %v6601_v42, %v6502_v52  ;;  %v6810_v12 = vmul.f32 %v3076_v14, %v6549_v61  ;;  %v3093_v30 = vmul.f32 0.044715, %v6775_v35  ;;  %7686 = vst [vmem:[#allocation12_spill] sm:$0xff] %v6821_v19  ;;  %v6825_v42 = vadd.f32 %v2877_v43, %v6490_v37 }
 0x55c   : > { %v2879_v13 = vpop.f32.mrf.mxu1  ;;  %7680 = vst [vmem:[#allocation18_spill] sm:$0xff] %v6769_v55  ;;  %v6789_v55 = vmul.f32 %v3082_v16, %v6717_v63  ;;  %v6813_v16 = vmul.f32 %v3089_v38, %v6741_v34  ;;  %v3083_v41 = vmul.f32 0.044715, %v6786_v1  ;;  %v6829_v14 = vadd.f32 %v6669_v5, %v6510_v18 }
 0x55d   : > { %7682 = vst [vmem:[#allocation13_spill] sm:$0xff] %v6786_v1  ;;  %v6832_v38 = vmul.f32 %v3090_v59, %v6756_v21  ;;  %v6839_v53 = vadd.f32 %v6684_v60, %v6510_v18  ;;  %v3094_v39 = vmul.f32 0.044715, %v6807_v15  ;;  %v3084_v5 = vmul.f32 0.044715, %v6612_v2 }
 0x55e   : > { %7683 = vst [vmem:[#allocation11_spill] sm:$0xff] %v6792_v10  ;;  %v6835_v10 = vmul.f32 %v3080_v32, %v6760_v57  ;;  %v6851_v57 = vmul.f32 %v3093_v30, %v6775_v35  ;;  %v3097_v60 = vmul.f32 0.044715, %v6818_v6  ;;  %v6855_v18 = vadd.f32 %v2879_v13, %v6508_v9 }
 0x55f   : > { %v2830_v46 = vpop.f32.mrf.mxu0  ;;  %7684 = vst [vmem:[#allocation14_spill] sm:$0xff] %v6803_v48  ;;  %v6859_v61 = vmul.f32 %v3083_v41, %v6786_v1  ;;  %v3087_v19 = vmul.f32 0.044715, %v6829_v14  ;;  %v3088_v20 = vmul.f32 0.044715, %v6839_v53  ;;  %v6869_v13 = vmul.f32 %v3094_v39, %v6807_v15 }
 0x560   : > { %7685 = vst [vmem:[#allocation15_spill] sm:$0xff] %v6810_v12  ;;  %v6842_v49 = vadd.f32 %v2830_v46, %v6508_v9  ;;  %v3161_v1 = vmul.f32 %v3097_v60, %v6818_v6  ;;  %v3102_v28 = vmul.f32 0.044715, %v6855_v18 }
 0x561   : > { %7687 = vst [vmem:[#allocation16_spill] sm:$0xff] %v6829_v14 }
 0x562   : > { %v2921_v29 = vpop.f32.mrf.mxu2  ;;  %7688 = vst [vmem:[#allocation19_spill] sm:$0xff] %v6835_v10  ;;  %v3101_v30 = vmul.f32 0.044715, %v6842_v49 }
 0x563   : > { %v2970_v51 = vpop.f32.mrf.mxu3  ;;  %7689 = vst [vmem:[#allocation20_spill] sm:$0xff] %v6839_v53  ;;  %v6847_v12 = vadd.f32 %v2921_v29, %v6506_v58  ;;  %v3098_v29 = vmul.f32 0.044715, %v6825_v42 }
 0x564   : > { %v2882_v32 = vpop.f32.mrf.mxu1  ;;  %7691 = vst [vmem:[#allocation73_spill] sm:$0xff] %v6859_v61  ;;  %v6866_v48 = vadd.f32 %v2970_v51, %v6506_v58  ;;  %v6882_v58 = vmul.f32 %v3087_v19, %v6829_v14  ;;  %v3165_v60 = vmul.f32 %v3101_v30, %v6842_v49 }
 0x565   : > { %7690 = vst [vmem:[#allocation72_spill] sm:$0xff] %v6847_v12  ;;  %v2883_v46 = vadd.f32 %v2882_v32, %v6488_v36  ;;  %v6872_v32 = vmul.f32 %v3084_v5, %v6612_v2  ;;  %v3091_v41 = vmul.f32 0.044715, %v6847_v12  ;;  %v3162_v51 = vmul.f32 %v3098_v29, %v6825_v42 }
 0x566   : > { %7692 = vst [vmem:[#allocation74_spill] sm:$0xff] %v6866_v48 }
 0x567   : > { %v2833_v62 = vpop.f32.mrf.mxu0  ;;  %v3106_v56 = vmul.f32 0.044715, %v2883_v46  ;;  %7693 = vst [vmem:[#allocation75_spill] sm:$0xff] %v6872_v32  ;;  %v6888_v32 = vmul.f32 %v3088_v20, %v6839_v53  ;;  %v6893_v0 = vmul.f32 %v3091_v41, %v6847_v12  ;;  %v3166_v20 = vmul.f32 %v3102_v28, %v6855_v18 }
 0x568   : > { %v2834_v59 = vadd.f32 %v2833_v62, %v6488_v36  ;;  %7695 = vst [vmem:[#allocation77_spill] sm:$0xff] %v6882_v58  ;;  %v3042_v54 = vmul.f32 0.5, %v2883_v46 }
 0x569   : > { %v3170_v50 = vmul.f32 %v3106_v56, %v2883_v46  ;;  %7697 = vst [vmem:[#allocation79_spill] sm:$0xff] %v6888_v32 }
 0x56a   : > { %v2923_v43 = vpop.f32.mrf.mxu2  ;;  %v3105_v62 = vmul.f32 0.044715, %v2834_v59  ;;  %7698 = vst [vmem:[#allocation80_spill] sm:$0xff] %v6893_v0  ;;  %v3225_v0 = vmul.f32 %v3161_v1, %v6818_v6  ;;  %v6911_v12 = vmul.f32 0.5, %v2834_v59  ;;  %v3229_v1 = vmul.f32 %v3165_v60, %v6842_v49 }
 0x56b   : > { %v2972_v10 = vpop.f32.mrf.mxu3  ;;  %v6878_v40 = vadd.f32 %v2923_v43, %v6502_v52  ;;  %v3234_v56 = vmul.f32 %v3170_v50, %v2883_v46 }
 0x56c   : > { %v3169_v61 = vmul.f32 %v3105_v62, %v2834_v59  ;;  %v6885_v5 = vadd.f32 %v2972_v10, %v6502_v52  ;;  %v3092_v62 = vmul.f32 0.044715, %v6866_v48 }
 0x56d   : > { %7694 = vst [vmem:[#allocation76_spill] sm:$0xff] %v6878_v40  ;;  %v3298_v32 = vadd.f32 %v3234_v56, %v2883_v46  ;;  %v3095_v30 = vmul.f32 0.044715, %v6878_v40 }
 0x56e   : > { %v3233_v39 = vmul.f32 %v3169_v61, %v2834_v59  ;;  %7696 = vst [vmem:[#allocation78_spill] sm:$0xff] %v6885_v5  ;;  %v2884_v61 = vpop.f32.mrf.mxu1  ;;  %v3096_v58 = vmul.f32 0.044715, %v6885_v5  ;;  %v6909_v28 = vmul.f32 %v3092_v62, %v6866_v48 }
 0x56f   : > { %v2835_v2 = vpop.f32.mrf.mxu0  ;;  %v2885_v50 = vadd.f32 %v2884_v61, %v6496_v45 }
 0x570   : > { %v3297_v29 = vadd.f32 %v3233_v39, %v2834_v59  ;;  %v2836_v19 = vadd.f32 %v2835_v2, %v6496_v45  ;;  %v3362_v2 = vmul.f32 0.7978846, %v3298_v32  ;;  %7699 = vst [vmem:[#allocation81_spill] sm:$0xff] %v6909_v28 }
 0x571   : > { %v3110_v14 = vmul.f32 0.044715, %v2885_v50 }
 0x572   : > { %v2926_v43 = vpop.f32.mrf.mxu2  ;;  %v3361_v53 = vmul.f32 0.7978846, %v3297_v29  ;;  %v3109_v41 = vmul.f32 0.044715, %v2836_v19  ;;  %v6914_v29 = vmul.f32 %v3095_v30, %v6878_v40  ;;  %v3289_v30 = vadd.f32 %v3225_v0, %v6818_v6 }
 0x573   : > { %v6897_v52 = vadd.f32 %v2926_v43, %v6490_v37  ;;  %v2975_v10 = vpop.f32.mrf.mxu3  ;;  %v3174_v61 = vmul.f32 %v3110_v14, %v2885_v50 }
 0x574   : > { %v6904_v39 = vadd.f32 %v2975_v10, %v6490_v37  ;;  %v3173_v56 = vmul.f32 %v3109_v41, %v2836_v19  ;;  %4308 = vtanh.f32 %v3361_v53  ;;  %7700 = vst [vmem:[#allocation82_spill] sm:$0xff] %v6914_v29  ;;  %v6917_v37 = vmul.f32 %v3096_v58, %v6885_v5 }
 0x575   : > { %v3099_v43 = vmul.f32 0.044715, %v6897_v52  ;;  %4310 = vtanh.f32 %v3362_v2  ;;  %v3238_v62 = vmul.f32 %v3174_v61, %v2885_v50  ;;  %v6924_v53 = vmul.f32 0.5, %v2836_v19 }
 0x576   : > { %7701 = vst [vmem:[#allocation83_spill] sm:$0xff] %v6917_v37  ;;  %v3237_v32 = vmul.f32 %v3173_v56, %v2836_v19  ;;  %v3100_v10 = vmul.f32 0.044715, %v6904_v39  ;;  %v3293_v2 = vadd.f32 %v3229_v1, %v6842_v49  ;;  %v3226_v56 = vmul.f32 %v3162_v51, %v6825_v42 }
 0x577   : > { %v6922_v41 = vmul.f32 %v3099_v43, %v6897_v52  ;;  %v3302_v37 = vadd.f32 %v3238_v62, %v2885_v50  ;;  %v3353_v43 = vmul.f32 0.7978846, %v3289_v30  ;;  %v3230_v61 = vmul.f32 %v3166_v20, %v6855_v18 }
 0x578   : > { %v3301_v14 = vadd.f32 %v3237_v32, %v2836_v19  ;;  %v6937_v0 = vmul.f32 %v3100_v10, %v6904_v39  ;;  %v3357_v19 = vmul.f32 0.7978846, %v3293_v2  ;;  %v3290_v32 = vadd.f32 %v3226_v56, %v6825_v42 }
 0x579   : > { %v3366_v48 = vmul.f32 0.7978846, %v3302_v37  ;;  %v3046_v1 = vmul.f32 0.5, %v2885_v50  ;;  %v3033_v51 = vmul.f32 0.5, %v6818_v6  ;;  %4312 = vtanh.f32 %v3353_v43 }
 0x57a   : > { %v2928_v59 = vpop.f32.mrf.mxu2  ;;  %v4309_v5 = vpop.eup %4308  ;;  %v3365_v28 = vmul.f32 0.7978846, %v3301_v14  ;;  %7703 = vst [vmem:[#allocation85_spill] sm:$0xff] %v6937_v0  ;;  %v3294_v20 = vadd.f32 %v3230_v61, %v6855_v18  ;;  %v3037_v10 = vmul.f32 0.5, %v6842_v49  ;;  %v3034_v30 = vmul.f32 0.5, %v6825_v42 }
 0x57b   : > { %v6928_v46 = vadd.f32 %v2928_v59, %v6508_v9  ;;  %v2977_v58 = vpop.f32.mrf.mxu3  ;;  %v4311_v59 = vpop.eup %4310  ;;  %v3354_v14 = vmul.f32 0.7978846, %v3290_v32  ;;  %v3038_v6 = vmul.f32 0.5, %v6855_v18  ;;  %v3217_v56 = vmul.f32 %v6813_v16, %v6741_v34 }
 0x57c   : > { %v6933_v60 = vadd.f32 %v2977_v58, %v6508_v9  ;;  %4314 = vtanh.f32 %v3365_v28  ;;  %v3489_v58 = vadd.f32 1.0, %v4309_v5  ;;  %v3490_v2 = vadd.f32 1.0, %v4311_v59 }
 0x57d   : > { %v3103_v9 = vmul.f32 0.044715, %v6928_v46  ;;  %4316 = vtanh.f32 %v3366_v48  ;;  %v3358_v50 = vmul.f32 0.7978846, %v3294_v20  ;;  %v3221_v28 = vmul.f32 %v6851_v57, %v6775_v35 }
 0x57e   : > { %7702 = vst [vmem:[#allocation84_spill] sm:$0xff] %v6933_v60  ;;  %v3104_v62 = vmul.f32 0.044715, %v6933_v60  ;;  %4318 = vtanh.f32 %v3357_v19  ;;  %v3281_v16 = vadd.f32 %v3217_v56, %v6741_v34  ;;  %v3218_v57 = vmul.f32 %v6832_v38, %v6756_v21 }
 0x57f   : > { %4320 = vtanh.f32 %v3354_v14  ;;  %v6952_v48 = vmul.f32 %v3103_v9, %v6928_v46  ;;  %v4313_v43 = vpop.eup %4312  ;;  %v3285_v61 = vadd.f32 %v3221_v28, %v6775_v35  ;;  %v3553_v59 = vmul.f32 %v3489_v58, %v6911_v12 }
 0x580   : > { %v6955_v42 = vmul.f32 %v3104_v62, %v6933_v60  ;;  %4322 = vtanh.f32 %v3358_v50  ;;  %v3554_v9 = vmul.f32 %v3490_v2, %v3042_v54  ;;  %v3481_v62 = vadd.f32 1.0, %v4313_v43 }
 0x581   : > { %v3349_v38 = vmul.f32 0.7978846, %v3285_v61  ;;  %v3282_v29 = vadd.f32 %v3218_v57, %v6756_v21 }
 0x582   : > { %v2931_v37 = vpop.f32.mrf.mxu2  ;;  %7704 = vst [vmem:[#allocation86_spill] sm:$0xff] %v6955_v42  ;;  %v4315_v19 = vpop.eup %4314 }
 0x583   : > { %v6958_v49 = vadd.f32 %v2931_v37, %v6488_v36  ;;  %v2980_v5 = vpop.f32.mrf.mxu3  ;;  %v4317_v20 = vpop.eup %4316  ;;  %v3493_v50 = vadd.f32 1.0, %v4315_v19  ;;  %v3222_v37 = vmul.f32 %v6869_v13, %v6807_v15 }
 0x584   : > { %v6961_v18 = vadd.f32 %v2980_v5, %v6488_v36  ;;  %v3345_v36 = vmul.f32 0.7978846, %v3281_v16  ;;  %v4319_v56 = vpop.eup %4318  ;;  %v3494_v5 = vadd.f32 1.0, %v4317_v20  ;;  %v3545_v16 = vmul.f32 %v3481_v62, %v3033_v51 }
 0x585   : > { %v3107_v32 = vmul.f32 0.044715, %v6958_v49  ;;  %v4321_v40 = vpop.eup %4320  ;;  %v3557_v54 = vmul.f32 %v3493_v50, %v6924_v53  ;;  %v3485_v58 = vadd.f32 1.0, %v4319_v56  ;;  %v3025_v53 = vmul.f32 0.5, %v6741_v34 }
 0x586   : > { %v3108_v14 = vmul.f32 0.044715, %v6961_v18  ;;  %4324 = vtanh.f32 %v3345_v36  ;;  %v4323_v2 = vpop.eup %4322  ;;  %v3558_v43 = vmul.f32 %v3494_v5, %v3046_v1  ;;  %v3482_v19 = vadd.f32 1.0, %v4321_v40 }
 0x587   : > { %v3171_v28 = vmul.f32 %v3107_v32, %v6958_v49  ;;  %4326 = vtanh.f32 %v3349_v38  ;;  %v3593_v42 = vpack.c.bf16 %v3557_v54, %v3553_v59  ;;  %v3549_v20 = vmul.f32 %v3485_v58, %v3037_v10 }
 0x588   : > { %v3172_v12 = vmul.f32 %v3108_v14, %v6961_v18  ;;  %v3486_v61 = vadd.f32 1.0, %v4323_v2  ;;  %v3594_v60 = vpack.c.bf16 %v3558_v43, %v3554_v9  ;;  %v3546_v0 = vmul.f32 %v3482_v19, %v3034_v30 }
 0x589   : > { %v3235_v13 = vmul.f32 %v3171_v28, %v6958_v49  ;;  %3625 = vmatpush.bf16.msrb.mxu0 %v3593_v42  ;;  %v3029_v51 = vmul.f32 0.5, %v6775_v35  ;;  %v3026_v59 = vmul.f32 0.5, %v6756_v21  ;;  %v3286_v9 = vadd.f32 %v3222_v37, %v6807_v15 }
 0x58a   : > { %v2933_v32 = vpop.f32.mrf.mxu2  ;;  %v3236_v50 = vmul.f32 %v3172_v12, %v6961_v18  ;;  %v3550_v1 = vmul.f32 %v3486_v61, %v3038_v6  ;;  %3644 = vmatpush.bf16.msrb.mxu1 %v3594_v60  ;;  %v3346_v62 = vmul.f32 0.7978846, %v3282_v29  ;;  %v3589_v42 = vpack.c.bf16 %v3549_v20, %v3545_v16 }
 0x58b   : > { %v6978_v57 = vadd.f32 %v2933_v32, %v6496_v45  ;;  %v2982_v14 = vpop.f32.mrf.mxu3  ;;  %v3299_v34 = vadd.f32 %v3235_v13, %v6958_v49  ;;  %v3350_v35 = vmul.f32 0.7978846, %v3286_v9  ;;  %v3209_v29 = vmul.f32 %v6778_v44, %v6700_v26 }
 0x58c   : > { %v6983_v40 = vadd.f32 %v2982_v14, %v6496_v45  ;;  %v4325_v30 = vpop.eup %4324  ;;  %v3590_v56 = vpack.c.bf16 %v3550_v1, %v3546_v0  ;;  %4328 = vtanh.f32 %v3346_v62  ;;  %v3300_v60 = vadd.f32 %v3236_v50, %v6961_v18 }
 0x58d   : > { %v3111_v10 = vmul.f32 0.044715, %v6978_v57  ;;  %v4327_v45 = vpop.eup %4326  ;;  %v3473_v28 = vadd.f32 1.0, %v4325_v30  ;;  %3626 = vmatpush.bf16.msrb.mxu0 %v3589_v42  ;;  %v3213_v37 = vmul.f32 %v6797_v3, %v6722_v25  ;;  %v3030_v38 = vmul.f32 0.5, %v6807_v15 }
 0x58e   : > { %v3112_v36 = vmul.f32 0.044715, %v6983_v40  ;;  %v3477_v21 = vadd.f32 1.0, %v4327_v45  ;;  %3645 = vmatpush.bf16.msrb.mxu1 %v3590_v56  ;;  %4330 = vtanh.f32 %v3350_v35  ;;  %v3273_v58 = vadd.f32 %v3209_v29, %v6700_v26 }
 0x58f   : > { %v3175_v6 = vmul.f32 %v3111_v10, %v6978_v57  ;;  %v3537_v0 = vmul.f32 %v3473_v28, %v3025_v53  ;;  %v3277_v2 = vadd.f32 %v3213_v37, %v6722_v25  ;;  %v7002_v43 = vmul.f32 0.7978846, %v3299_v34 }
 0x590   : > { %v3176_v5 = vmul.f32 %v3112_v36, %v6983_v40  ;;  %v3541_v54 = vmul.f32 %v3477_v21, %v3029_v51  ;;  %v3017_v44 = vmul.f32 0.5, %v6700_v26  ;;  %v3210_v3 = vmul.f32 %v6789_v55, %v6717_v63 }
 0x591   : > { %v3239_v12 = vmul.f32 %v3175_v6, %v6978_v57  ;;  %v3214_v16 = vmul.f32 %v6800_v4, %v6726_v22  ;;  %v7009_v19 = vmul.f32 0.7978846, %v3300_v60  ;;  %v3337_v13 = vmul.f32 0.7978846, %v3273_v58 }
 0x592   : > { %v3585_v15 = vpack.c.bf16 %v3541_v54, %v3537_v0  ;;  %v3341_v32 = vmul.f32 0.7978846, %v3277_v2  ;;  %v4329_v20 = vpop.eup %4328  ;;  %v3240_v61 = vmul.f32 %v3176_v5, %v6983_v40  ;;  %v3021_v14 = vmul.f32 0.5, %v6722_v25  ;;  %v7706_v0 = vld [vmem:[#allocation22_spill] sm:$0xff] }
 0x593   : > { %v3274_v53 = vadd.f32 %v3210_v3, %v6717_v63  ;;  %v3278_v26 = vadd.f32 %v3214_v16, %v6726_v22  ;;  %v3303_v50 = vadd.f32 %v3239_v12, %v6978_v57  ;;  %v3474_v55 = vadd.f32 1.0, %v4329_v20 }
 0x594   : > { %3627 = vmatpush.bf16.msrb.mxu0 %v3585_v15  ;;  %4332 = vtanh.f32 %v3337_v13  ;;  %v3018_v4 = vmul.f32 0.5, %v6717_v63  ;;  %v4331_v1 = vpop.eup %4330  ;;  %v3201_v9 = vmul.f32 %v6707_v24, %v6628_v27  ;;  %v3022_v30 = vmul.f32 0.5, %v6726_v22 }
 0x595   : > { %4334 = vtanh.f32 %v3341_v32  ;;  %v3338_v51 = vmul.f32 0.7978846, %v3274_v53  ;;  %v3342_v10 = vmul.f32 0.7978846, %v3278_v26  ;;  %v3478_v62 = vadd.f32 1.0, %v4331_v1  ;;  %v7707_v26 = vld [vmem:[#allocation44_spill] sm:$0xff] }
 0x596   : > { %v3538_v25 = vmul.f32 %v3474_v55, %v3026_v59  ;;  %v3205_v34 = vmul.f32 %v6736_v8, %v6648_v17  ;;  %v7023_v36 = vadd.f32 %v3240_v61, %v6983_v40  ;;  %v3265_v63 = vadd.f32 %v3201_v9, %v6628_v27 }
 0x597   : > { %4336 = vtanh.f32 %v3338_v51  ;;  %v3202_v42 = vmul.f32 %v6710_v47, %v6631_v33  ;;  %v3542_v56 = vmul.f32 %v3478_v62, %v3030_v38  ;;  %v3206_v59 = vmul.f32 %v6763_v11, %v6682_v7  ;;  %v7705_v11 = vld [vmem:[#allocation48_spill] sm:$0xff] }
 0x598   : > { %4338 = vtanh.f32 %v3342_v10  ;;  %v3269_v24 = vadd.f32 %v3205_v34, %v6648_v17  ;;  %v7031_v22 = vmul.f32 0.7978846, %v3303_v50  ;;  %v3009_v8 = vmul.f32 0.5, %v6628_v27  ;;  %v7708_v50 = vld [vmem:[#allocation36_spill] sm:$0xff] }
 0x599   : > { %v3329_v45 = vmul.f32 0.7978846, %v3265_v63  ;;  %v3266_v6 = vadd.f32 %v3202_v42, %v6631_v33  ;;  %v3586_v35 = vpack.c.bf16 %v3542_v56, %v3538_v25  ;;  %v3270_v21 = vadd.f32 %v3206_v59, %v6682_v7  ;;  %v7711_v56 = vld [vmem:[#allocation40_spill] sm:$0xff] }
 0x59a   : > { %v4333_v28 = vpop.eup %4332  ;;  %v3333_v60 = vmul.f32 0.7978846, %v3269_v24  ;;  %v3193_v47 = vmul.f32 %v6672_v23, %v6593_v31  ;;  %v3197_v38 = vmul.f32 %v7706_v0, %v7705_v11  ;;  %v3013_v3 = vmul.f32 0.5, %v6648_v17  ;;  %v7710_v17 = vld [vmem:[#allocation32_spill] sm:$0xff] }
 0x59b   : > { %v4335_v29 = vpop.eup %4334  ;;  %v3465_v37 = vadd.f32 1.0, %v4333_v28  ;;  %4340 = vtanh.f32 %v3329_v45  ;;  %v3330_v5 = vmul.f32 0.7978846, %v3266_v6  ;;  %3646 = vmatpush.bf16.msrb.mxu1 %v3586_v35  ;;  %v3334_v12 = vmul.f32 0.7978846, %v3270_v21  ;;  %v7712_v28 = vld [vmem:[#allocation54_spill] sm:$0xff] }
 0x59c   : > { %v3469_v27 = vadd.f32 1.0, %v4335_v29  ;;  %4342 = vtanh.f32 %v3333_v60  ;;  %v3257_v54 = vadd.f32 %v3193_v47, %v6593_v31  ;;  %v3261_v23 = vadd.f32 %v3197_v38, %v7705_v11 }
 0x59d   : > { %v4337_v58 = vpop.eup %4336  ;;  %v3529_v2 = vmul.f32 %v3465_v37, %v3017_v44  ;;  %4344 = vtanh.f32 %v3330_v5  ;;  %v3010_v61 = vmul.f32 0.5, %v6631_v33  ;;  %v3194_v55 = vmul.f32 %v7708_v50, %v7707_v26  ;;  %v7709_v44 = vld [vmem:[#allocation46_spill] sm:$0xff] }
 0x59e   : > { %v4339_v16 = vpop.eup %4338  ;;  %v3533_v15 = vmul.f32 %v3469_v27, %v3021_v14  ;;  %v3466_v13 = vadd.f32 1.0, %v4337_v58  ;;  %4346 = vtanh.f32 %v3334_v12  ;;  %v3321_v32 = vmul.f32 0.7978846, %v3257_v54 }
 0x59f   : > { %v3470_v20 = vadd.f32 1.0, %v4339_v16  ;;  %v3325_v53 = vmul.f32 0.7978846, %v3261_v23  ;;  %v3198_v10 = vmul.f32 %v7710_v17, %v7709_v44  ;;  %v3014_v14 = vmul.f32 0.5, %v6682_v7 }
 0x5a0   : > { %v3581_v1 = vpack.c.bf16 %v3533_v15, %v3529_v2  ;;  %v3530_v51 = vmul.f32 %v3466_v13, %v3018_v4  ;;  %4348 = vtanh.f32 %v3321_v32  ;;  %v3258_v25 = vadd.f32 %v3194_v55, %v7707_v26  ;;  %v7714_v13 = vld [vmem:[#allocation30_spill] sm:$0xff] }
 0x5a1   : > { %v4341_v9 = vpop.eup %4340  ;;  %v3534_v62 = vmul.f32 %v3470_v20, %v3022_v30  ;;  %4350 = vtanh.f32 %v3325_v53  ;;  %v3001_v63 = vmul.f32 0.5, %v6593_v31  ;;  %v3262_v42 = vadd.f32 %v3198_v10, %v7709_v44  ;;  %v7713_v30 = vld [vmem:[#allocation65_spill] sm:$0xff]  ;;  %v7716_v53 = vld [vmem:[#allocation58_spill] sm:$0xff] }
 0x5a2   : > { %v4343_v34 = vpop.eup %4342  ;;  %3628 = vmatpush.bf16.msrb.mxu0 %v3581_v1  ;;  %v3457_v33 = vadd.f32 1.0, %v4341_v9  ;;  %v3061_v4 = vmul.f32 0.044715, %v7711_v56  ;;  %v3322_v6 = vmul.f32 0.7978846, %v3258_v25  ;;  %v3185_v35 = vmul.f32 %v7713_v30, %v7712_v28  ;;  %v7718_v25 = vld [vmem:[#allocation64_spill] sm:$0xff] }
 0x5a3   : > { %v4345_v24 = vpop.eup %4344  ;;  %v3582_v59 = vpack.c.bf16 %v3534_v62, %v3530_v51  ;;  %v3461_v45 = vadd.f32 1.0, %v4343_v34  ;;  %v3326_v47 = vmul.f32 0.7978846, %v3262_v42  ;;  %v3005_v27 = vmul.f32 0.5, %v7705_v11  ;;  %v7715_v11 = vld [vmem:[#allocation53_spill] sm:$0xff]  ;;  %v7717_v62 = vld [vmem:[#allocation52_spill] sm:$0xff] }
 0x5a4   : > { %v4347_v7 = vpop.eup %4346  ;;  %v3521_v60 = vmul.f32 %v3457_v33, %v3009_v8  ;;  %v3458_v21 = vadd.f32 1.0, %v4345_v24  ;;  %v3125_v29 = vmul.f32 %v3061_v4, %v7711_v56  ;;  %4352 = vtanh.f32 %v3322_v6 }
 0x5a5   : > { %3647 = vmatpush.bf16.msrb.mxu1 %v3582_v59  ;;  %v3525_v37 = vmul.f32 %v3461_v45, %v3013_v3  ;;  %v3462_v31 = vadd.f32 1.0, %v4347_v7  ;;  %v3249_v5 = vadd.f32 %v3185_v35, %v7712_v28  ;;  %4354 = vtanh.f32 %v3326_v47 }
 0x5a6   : > { %v4349_v0 = vpop.eup %4348  ;;  %v3522_v38 = vmul.f32 %v3458_v21, %v3010_v61  ;;  %v3189_v12 = vmul.f32 %v3125_v29, %v7711_v56  ;;  %v7060_v16 = vmul.f32 0.7978846, %v7023_v36  ;;  %v3062_v32 = vmul.f32 0.044715, %v7714_v13 }
 0x5a7   : > { %v4351_v54 = vpop.eup %4350  ;;  %v3577_v58 = vpack.c.bf16 %v3525_v37, %v3521_v60  ;;  %v3526_v8 = vmul.f32 %v3462_v31, %v3014_v14  ;;  %v3449_v2 = vadd.f32 1.0, %v4349_v0  ;;  %v3313_v23 = vmul.f32 0.7978846, %v3249_v5  ;;  %v7719_v5 = vld [vmem:[#allocation59_spill] sm:$0xff] }
 0x5a8   : > { %v3453_v3 = vadd.f32 1.0, %v4351_v54  ;;  %v3253_v15 = vadd.f32 %v3189_v12, %v7711_v56  ;;  %v3186_v50 = vmul.f32 %v7716_v53, %v7715_v11  ;;  %v3002_v1 = vmul.f32 0.5, %v7707_v26 }
 0x5a9   : > { %3629 = vmatpush.bf16.msrb.mxu0 %v3577_v58  ;;  %v3578_v20 = vpack.c.bf16 %v3526_v8, %v3522_v38  ;;  %v3513_v61 = vmul.f32 %v3449_v2, %v3001_v63  ;;  %4356 = vtanh.f32 %v3313_v23  ;;  %v3126_v17 = vmul.f32 %v3062_v32, %v7714_v13 }
 0x5aa   : > { %v3517_v55 = vmul.f32 %v3453_v3, %v3005_v27  ;;  %v3317_v51 = vmul.f32 0.7978846, %v3253_v15  ;;  %v4353_v36 = vpop.eup %4352  ;;  %v3006_v10 = vmul.f32 0.5, %v7709_v44  ;;  %v3250_v9 = vadd.f32 %v3186_v50, %v7715_v11  ;;  %v7720_v27 = vld [vmem:[#allocation35_spill] sm:$0xff] }
 0x5ab   : > { %3648 = vmatpush.bf16.msrb.mxu1 %v3578_v20  ;;  %v3049_v14 = vmul.f32 0.044715, %v7717_v62  ;;  %v3053_v34 = vmul.f32 0.044715, %v7718_v25  ;;  %v4355_v33 = vpop.eup %4354  ;;  %v3450_v42 = vadd.f32 1.0, %v4353_v36  ;;  %v3190_v4 = vmul.f32 %v3126_v17, %v7714_v13 }
 0x5ac   : > { %v3573_v63 = vpack.c.bf16 %v3517_v55, %v3513_v61  ;;  %4358 = vtanh.f32 %v3317_v51  ;;  %v3454_v26 = vadd.f32 1.0, %v4355_v33  ;;  %v3314_v24 = vmul.f32 0.7978846, %v3250_v9 }
 0x5ad   : > { %v3113_v59 = vmul.f32 %v3049_v14, %v7717_v62  ;;  %v3117_v45 = vmul.f32 %v3053_v34, %v7718_v25  ;;  %v3514_v44 = vmul.f32 %v3450_v42, %v3002_v1  ;;  %v2993_v6 = vmul.f32 0.5, %v7712_v28 }
 0x5ae   : > { %3630 = vmatpush.bf16.msrb.mxu0 %v3573_v63  ;;  %v2997_v30 = vmul.f32 0.5, %v7711_v56  ;;  %v3254_v35 = vadd.f32 %v3190_v4, %v7714_v13  ;;  %v3518_v60 = vmul.f32 %v3454_v26, %v3006_v10  ;;  %4360 = vtanh.f32 %v3314_v24 }
 0x5af   : > { %v4357_v7 = vpop.eup %4356  ;;  %v3177_v21 = vmul.f32 %v3113_v59, %v7717_v62  ;;  %v3181_v47 = vmul.f32 %v3117_v45, %v7718_v25  ;;  %v2994_v37 = vmul.f32 0.5, %v7715_v11  ;;  %v3050_v0 = vmul.f32 0.044715, %v7719_v5 }
 0x5b0   : > { %v3441_v29 = vadd.f32 1.0, %v4357_v7  ;;  %v3318_v31 = vmul.f32 0.7978846, %v3254_v35  ;;  %v3574_v38 = vpack.c.bf16 %v3518_v60, %v3514_v44  ;;  %v3054_v12 = vmul.f32 0.044715, %v7720_v27  ;;  %v7723_v35 = vld [vmem:[#allocation86_spill] sm:$0xff] }
 0x5b1   : > { %v3241_v28 = vadd.f32 %v3177_v21, %v7717_v62  ;;  %v3245_v56 = vadd.f32 %v3181_v47, %v7718_v25  ;;  %v2998_v8 = vmul.f32 0.5, %v7714_v13  ;;  %v3114_v2 = vmul.f32 %v3050_v0, %v7719_v5 }
 0x5b2   : > { %v4359_v54 = vpop.eup %4358  ;;  %v3505_v58 = vmul.f32 %v3441_v29, %v2993_v6  ;;  %4362 = vtanh.f32 %v3318_v31  ;;  %3649 = vmatpush.bf16.msrb.mxu1 %v3574_v38  ;;  %v3118_v32 = vmul.f32 %v3054_v12, %v7720_v27  ;;  %v2985_v20 = vmul.f32 0.5, %v7717_v62 }
 0x5b3   : > { %v3445_v23 = vadd.f32 1.0, %v4359_v54  ;;  %v3305_v3 = vmul.f32 0.7978846, %v3241_v28  ;;  %v3309_v15 = vmul.f32 0.7978846, %v3245_v56  ;;  %v2989_v61 = vmul.f32 0.5, %v7718_v25 }
 0x5b4   : > { %v3178_v11 = vmul.f32 %v3114_v2, %v7719_v5  ;;  %4364 = vtanh.f32 %v7002_v43  ;;  %v4361_v53 = vpop.eup %4360  ;;  %v7093_v13 = vmul.f32 0.5, %v7719_v5  ;;  %v3182_v55 = vmul.f32 %v3118_v32, %v7720_v27 }
 0x5b5   : > { %v3509_v50 = vmul.f32 %v3445_v23, %v2997_v30  ;;  %4366 = vtanh.f32 %v3305_v3  ;;  %v3442_v1 = vadd.f32 1.0, %v4361_v53  ;;  %v7097_v51 = vmul.f32 0.5, %v7720_v27  ;;  %v7722_v30 = vld [vmem:[#allocation84_spill] sm:$0xff] }
 0x5b6   : > { %4368 = vtanh.f32 %v3309_v15  ;;  %v3242_v17 = vadd.f32 %v3178_v11, %v7719_v5  ;;  %v3246_v10 = vadd.f32 %v3182_v55, %v7720_v27  ;;  %v3227_v43 = vmul.f32 %v6922_v41, %v6897_v52  ;;  %v7725_v55 = vld [vmem:[#allocation80_spill] sm:$0xff] }
 0x5b7   : > { %v3569_v36 = vpack.c.bf16 %v3509_v50, %v3505_v58  ;;  %4370 = vtanh.f32 %v7031_v22  ;;  %v3506_v62 = vmul.f32 %v3442_v1, %v2994_v37  ;;  %v3231_v25 = vmul.f32 %v6952_v48, %v6928_v46  ;;  %v7724_v50 = vld [vmem:[#allocation72_spill] sm:$0xff] }
 0x5b8   : > { %v4363_v9 = vpop.eup %4362  ;;  %v3306_v14 = vmul.f32 0.7978846, %v3242_v17  ;;  %4372 = vtanh.f32 %v7009_v19  ;;  %v3310_v33 = vmul.f32 0.7978846, %v3246_v10  ;;  %v3291_v63 = vadd.f32 %v3227_v43, %v6897_v52  ;;  %v7726_v17 = vld [vmem:[#allocation76_spill] sm:$0xff] }
 0x5b9   : > { %3631 = vmatpush.bf16.msrb.mxu0 %v3569_v36  ;;  %v3446_v34 = vadd.f32 1.0, %v4363_v9  ;;  %4374 = vtanh.f32 %v7060_v16  ;;  %v3043_v22 = vmul.f32 0.5, %v6958_v49  ;;  %v3047_v41 = vmul.f32 0.5, %v6978_v57  ;;  %v7721_v16 = vld [vmem:[#allocation85_spill] sm:$0xff]  ;;  %v7727_v36 = vld [vmem:[#allocation82_spill] sm:$0xff] }
 0x5ba   : > { %v4365_v42 = vpop.eup %4364  ;;  %4376 = vtanh.f32 %v3306_v14  ;;  %v3295_v4 = vadd.f32 %v3231_v25, %v6928_v46  ;;  %v3355_v48 = vmul.f32 0.7978846, %v3291_v63  ;;  %v3228_v6 = vmul.f32 %v7721_v16, %v6904_v39 }
 0x5bb   : > { %v4367_v26 = vpop.eup %4366  ;;  %v3510_v19 = vmul.f32 %v3446_v34, %v2998_v8  ;;  %4378 = vtanh.f32 %v3310_v33  ;;  %v3491_v24 = vadd.f32 1.0, %v4365_v42  ;;  %v3232_v7 = vmul.f32 %v7723_v35, %v7722_v30  ;;  %v7733_v35 = vld [vmem:[#allocation73_spill] sm:$0xff] }
 0x5bc   : > { %v4369_v59 = vpop.eup %4368  ;;  %v3433_v45 = vadd.f32 1.0, %v4367_v26  ;;  %v3359_v44 = vmul.f32 0.7978846, %v3295_v4  ;;  %v3044_v57 = vmul.f32 0.5, %v6961_v18  ;;  %4380 = vtanh.f32 %v3355_v48  ;;  %v7729_v4 = vld [vmem:[#allocation81_spill] sm:$0xff]  ;;  %v7730_v48 = vld [vmem:[#allocation78_spill] sm:$0xff] }
 0x5bd   : > { %v4371_v60 = vpop.eup %4370  ;;  %v3570_v49 = vpack.c.bf16 %v3510_v19, %v3506_v62  ;;  %v3437_v21 = vadd.f32 1.0, %v4369_v59  ;;  %v3292_v31 = vadd.f32 %v3228_v6, %v6904_v39  ;;  %v3048_v38 = vmul.f32 0.5, %v6983_v40  ;;  %v7123_v40 = vld [vmem:[%s7324_s2 + $0x10] sm:$0xff]  ;;  %v7732_v6 = vld [vmem:[#allocation13_spill] sm:$0xff] }
 0x5be   : > { %v4373_v47 = vpop.eup %4372  ;;  %v3497_v29 = vmul.f32 %v3433_v45, %v2985_v20  ;;  %v3495_v37 = vadd.f32 1.0, %v4371_v60  ;;  %4382 = vtanh.f32 %v3359_v44  ;;  %v3296_v56 = vadd.f32 %v3232_v7, %v7722_v30  ;;  %v7734_v60 = vld [vmem:[#allocation16_spill] sm:$0xff] }
 0x5bf   : > { %v4375_v5 = vpop.eup %4374  ;;  %3650 = vmatpush.bf16.msrb.mxu1 %v3570_v49  ;;  %v3501_v0 = vmul.f32 %v3437_v21, %v2989_v61  ;;  %v3492_v28 = vadd.f32 1.0, %v4373_v47  ;;  %v3555_v12 = vmul.f32 %v3491_v24, %v3043_v22  ;;  %v3356_v18 = vmul.f32 0.7978846, %v3292_v31 }
 0x5c0   : > { %v4377_v27 = vpop.eup %4376  ;;  %v3559_v54 = vmul.f32 %v3495_v37, %v3047_v41  ;;  %v3496_v58 = vadd.f32 1.0, %v4375_v5  ;;  %v3360_v15 = vmul.f32 0.7978846, %v3296_v56  ;;  %v3219_v1 = vmul.f32 %v7725_v55, %v7724_v50  ;;  %v7741_v55 = vld [vmem:[#allocation14_spill] sm:$0xff] }
 0x5c1   : > { %v4379_v8 = vpop.eup %4378  ;;  %v3565_v2 = vpack.c.bf16 %v3501_v0, %v3497_v29  ;;  %v3434_v23 = vadd.f32 1.0, %v4377_v27  ;;  %v3556_v3 = vmul.f32 %v3492_v28, %v3044_v57  ;;  %4384 = vtanh.f32 %v3356_v18  ;;  %v7737_v18 = vld [vmem:[#allocation75_spill] sm:$0xff] }
 0x5c2   : > { %v3438_v32 = vadd.f32 1.0, %v4379_v8  ;;  %v3595_v20 = vpack.c.bf16 %v3559_v54, %v3555_v12  ;;  %v3560_v11 = vmul.f32 %v3496_v58, %v3048_v38  ;;  %v4381_v61 = vpop.eup %4380  ;;  %4386 = vtanh.f32 %v3360_v15  ;;  %v7736_v58 = vld [vmem:[#allocation51_spill] sm:$0xff] }
 0x5c3   : > { %3632 = vmatpush.bf16.msrb.mxu0 %v3565_v2  ;;  %v3498_v53 = vmul.f32 %v3434_v23, %v7093_v13  ;;  %v3223_v10 = vmul.f32 %v7727_v36, %v7726_v17  ;;  %v3035_v14 = vmul.f32 0.5, %v6897_v52  ;;  %v3483_v25 = vadd.f32 1.0, %v4381_v61  ;;  %v7738_v2 = vld [vmem:[#allocation20_spill] sm:$0xff]  ;;  %v7739_v23 = vld [vmem:[#allocation79_spill] sm:$0xff] }
 0x5c4   : > { %v4383_v43 = vpop.eup %4382  ;;  %v3502_v9 = vmul.f32 %v3438_v32, %v7097_v51  ;;  %3663 = vmatpush.bf16.msrb.mxu2 %v3595_v20  ;;  %v3596_v62 = vpack.c.bf16 %v3560_v11, %v3556_v3  ;;  %v3039_v34 = vmul.f32 0.5, %v6928_v46  ;;  %v3283_v13 = vadd.f32 %v3219_v1, %v7724_v50  ;;  %v7728_v51 = vld [vmem:[#allocation74_spill] sm:$0xff]  ;;  %v7731_v46 = vld [vmem:[#allocation83_spill] sm:$0xff] }
 0x5c5   : > { %v3487_v33 = vadd.f32 1.0, %v4383_v43  ;;  %v3287_v63 = vadd.f32 %v3223_v10, %v7726_v17  ;;  %v3547_v22 = vmul.f32 %v3483_v25, %v3035_v14  ;;  %v3036_v41 = vmul.f32 0.5, %v6904_v39  ;;  %v7735_v39 = vld [vmem:[#allocation77_spill] sm:$0xff] }
 0x5c6   : > { %v3566_v42 = vpack.c.bf16 %v3502_v9, %v3498_v53  ;;  %3682 = vmatpush.bf16.msrb.mxu3 %v3596_v62  ;;  %3633 = vmatmul.bf16.vlgmr.msrb.gmra.mxu0 %v7123_v40  ;;  %v3220_v26 = vmul.f32 %v7729_v4, %v7728_v51  ;;  %v3347_v52 = vmul.f32 0.7978846, %v3283_v13  ;;  %v3224_v59 = vmul.f32 %v7731_v46, %v7730_v48  ;;  %v7742_v9 = vld [vmem:[#allocation10_spill] sm:$0xff]  ;;  %v7743_v62 = vld [vmem:[#allocation12_spill] sm:$0xff] }
 0x5c7   : > { %v3551_v19 = vmul.f32 %v3487_v33, %v3039_v34  ;;  %v3351_v24 = vmul.f32 0.7978846, %v3287_v63  ;;  %v4385_v45 = vpop.eup %4384  ;;  %v3040_v44 = vmul.f32 0.5, %v7722_v30  ;;  %v3211_v7 = vmul.f32 %v7733_v35, %v7732_v6 }
 0x5c8   : > { %3651 = vmatpush.bf16.msrb.mxu1 %v3566_v42  ;;  %v3284_v16 = vadd.f32 %v3220_v26, %v7728_v51  ;;  %v3215_v49 = vmul.f32 %v7735_v39, %v7734_v60  ;;  %v4387_v21 = vpop.eup %4386  ;;  %v3484_v47 = vadd.f32 1.0, %v4385_v45  ;;  %4388 = vtanh.f32 %v3347_v52  ;;  %v7746_v26 = vld [vmem:[#allocation17_spill] sm:$0xff] }
 0x5c9   : > { %v3591_v57 = vpack.c.bf16 %v3551_v19, %v3547_v22  ;;  %v3288_v29 = vadd.f32 %v3224_v59, %v7730_v48  ;;  %v3488_v37 = vadd.f32 1.0, %v4387_v21  ;;  %4390 = vtanh.f32 %v3351_v24  ;;  %v7747_v19 = vld [vmem:[#allocation19_spill] sm:$0xff] }
 0x5ca   : > { %v3348_v31 = vmul.f32 0.7978846, %v3284_v16  ;;  %v3275_v5 = vadd.f32 %v3211_v7, %v7732_v6  ;;  %v3027_v30 = vmul.f32 0.5, %v7724_v50  ;;  %v3031_v0 = vmul.f32 0.5, %v7726_v17  ;;  %v7740_v50 = vld [vmem:[#allocation8_spill] sm:$0xff]  ;;  %v7176_v24 = vld [vmem:[%s7324_s2 + $0x18] sm:$0xff] }
 0x5cb   : > { %3652 = vmatmul.bf16.vlgmr.msrb.gmra.mxu1 %v7123_v40  ;;  %3664 = vmatpush.bf16.msrb.mxu2 %v3591_v57  ;;  %v3352_v38 = vmul.f32 0.7978846, %v3288_v29  ;;  %v3279_v28 = vadd.f32 %v3215_v49, %v7734_v60  ;;  %v3548_v56 = vmul.f32 %v3484_v47, %v3036_v41  ;;  %v3552_v27 = vmul.f32 %v3488_v37, %v3040_v44  ;;  %v7744_v41 = vld [vmem:[#allocation60_spill] sm:$0xff] }
 0x5cc   : > { %4392 = vtanh.f32 %v3348_v31  ;;  %v3339_v12 = vmul.f32 0.7978846, %v3275_v5  ;;  %v3212_v8 = vmul.f32 %v7737_v18, %v7736_v58  ;;  %v3216_v3 = vmul.f32 %v7739_v23, %v7738_v2 }
 0x5cd   : > { %4394 = vtanh.f32 %v3352_v38  ;;  %v3343_v54 = vmul.f32 0.7978846, %v3279_v28  ;;  %v3592_v15 = vpack.c.bf16 %v3552_v27, %v3548_v56  ;;  %v3028_v32 = vmul.f32 0.5, %v7728_v51  ;;  %v7745_v51 = vld [vmem:[#allocation15_spill] sm:$0xff] }
 0x5ce   : > { %v3032_v20 = vmul.f32 0.5, %v7730_v48  ;;  %4396 = vtanh.f32 %v3339_v12  ;;  %v4389_v11 = vpop.eup %4388  ;;  %v3276_v61 = vadd.f32 %v3212_v8, %v7736_v58  ;;  %v3280_v53 = vadd.f32 %v3216_v3, %v7738_v2  ;;  %v4456_v12 = vld [vmem:[%s7325_s3 + $0x8] sm:$0xff]  ;;  %v7750_v8 = vld [vmem:[#allocation7_spill] sm:$0xff]  ;;  %v4457_v3 = vld [vmem:[%s7325_s3 + $0x10] sm:$0xff] }
 0x5cf   : > { %4398 = vtanh.f32 %v3343_v54  ;;  %v3203_v1 = vmul.f32 %v7741_v55, %v7740_v50  ;;  %v4391_v17 = vpop.eup %4390  ;;  %3683 = vmatpush.bf16.msrb.mxu3 %v3592_v15  ;;  %v3475_v36 = vadd.f32 1.0, %v4389_v11  ;;  %v3019_v10 = vmul.f32 0.5, %v7732_v6  ;;  %v7748_v54 = vld [vmem:[#allocation26_spill] sm:$0xff] }
 0x5d0   : > { %v3023_v43 = vmul.f32 0.5, %v7734_v60  ;;  %v3207_v14 = vmul.f32 %v7743_v62, %v7742_v9  ;;  %v3479_v25 = vadd.f32 1.0, %v4391_v17  ;;  %v3340_v34 = vmul.f32 0.7978846, %v3276_v61  ;;  %v7753_v17 = vld [vmem:[#allocation18_spill] sm:$0xff] }
 0x5d1   : > { %v3344_v33 = vmul.f32 0.7978846, %v3280_v53  ;;  %v3267_v13 = vadd.f32 %v3203_v1, %v7740_v50  ;;  %v3539_v42 = vmul.f32 %v3475_v36, %v3027_v30  ;;  %v3204_v4 = vmul.f32 %v7745_v51, %v7744_v41  ;;  %v7752_v1 = vld [vmem:[#allocation55_spill] sm:$0xff] }
 0x5d2   : > { %v4393_v63 = vpop.eup %4392  ;;  %v3271_v22 = vadd.f32 %v3207_v14, %v7742_v9  ;;  %v3208_v52 = vmul.f32 %v7747_v19, %v7746_v26  ;;  %v3543_v46 = vmul.f32 %v3479_v25, %v3031_v0  ;;  %4400 = vtanh.f32 %v3340_v34  ;;  %v7754_v25 = vld [vmem:[#allocation57_spill] sm:$0xff]  ;;  %v7755_v34 = vld [vmem:[#allocation11_spill] sm:$0xff] }
 0x5d3   : > { %v4395_v48 = vpop.eup %4394  ;;  %v3476_v59 = vadd.f32 1.0, %v4393_v63  ;;  %v3331_v45 = vmul.f32 0.7978846, %v3267_v13  ;;  %4402 = vtanh.f32 %v3344_v33  ;;  %v3268_v35 = vadd.f32 %v3204_v4, %v7744_v41 }
 0x5d4   : > { %v4397_v44 = vpop.eup %4396  ;;  %v3480_v16 = vadd.f32 1.0, %v4395_v48  ;;  %v3335_v6 = vmul.f32 0.7978846, %v3271_v22  ;;  %v3587_v60 = vpack.c.bf16 %v3543_v46, %v3539_v42  ;;  %v3272_v47 = vadd.f32 %v3208_v52, %v7746_v26 }
 0x5d5   : > { %v4399_v7 = vpop.eup %4398  ;;  %v3540_v39 = vmul.f32 %v3476_v59, %v3028_v32  ;;  %v3467_v49 = vadd.f32 1.0, %v4397_v44  ;;  %4404 = vtanh.f32 %v3331_v45  ;;  %v3020_v29 = vmul.f32 0.5, %v7736_v58  ;;  %v7749_v58 = vld [vmem:[#allocation6_spill] sm:$0xff]  ;;  %v7756_v45 = vld [vmem:[#allocation45_spill] sm:$0xff] }
 0x5d6   : > { %v3544_v21 = vmul.f32 %v3480_v16, %v3032_v20  ;;  %v3471_v57 = vadd.f32 1.0, %v4399_v7  ;;  %4406 = vtanh.f32 %v3335_v6  ;;  %3638 = vmatmul.bf16.gmra.mxu0 %v7176_v24  ;;  %3665 = vmatpush.bf16.msrb.mxu2 %v3587_v60  ;;  %v3024_v37 = vmul.f32 0.5, %v7738_v2  ;;  %v7751_v2 = vld [vmem:[#allocation4_spill] sm:$0xff] }
 0x5d7   : > { %v3332_v31 = vmul.f32 0.7978846, %v3268_v35  ;;  %v3531_v30 = vmul.f32 %v3467_v49, %v3019_v10  ;;  %v3336_v38 = vmul.f32 0.7978846, %v3272_v47  ;;  %v4498_v28 = vmov 13   ;;  %v4458_v10 = vld [vmem:[%s7325_s3] sm:$0xff] }
 0x5d8   : > { %v3588_v5 = vpack.c.bf16 %v3544_v21, %v3540_v39  ;;  %v3535_v0 = vmul.f32 %v3471_v57, %v3023_v43  ;;  %4144 = vset.pattern.permute.xlu0 %v4498_v28  ;;  %4145 = vset.pattern.permute.xlu1 %v4498_v28  ;;  %v4401_v56 = vpop.eup %4400  ;;  %v3011_v27 = vmul.f32 0.5, %v7740_v50  ;;  %v3195_v18 = vmul.f32 %v7749_v58, %v7748_v54  ;;  %v7759_v49 = vld [vmem:[#allocation5_spill] sm:$0xff]  ;;  %v7760_v47 = vld [vmem:[#allocation38_spill] sm:$0xff] }
 0x5d9   : > { %4408 = vtanh.f32 %v3332_v31  ;;  %3602 = vperm.xlu0 %4144, %v4456_v12   ;;  %v3199_v23 = vmul.f32 %v7751_v2, %v7750_v8  ;;  %3606 = vperm.xlu1 %4145, %v4457_v3   ;;  %v4403_v15 = vpop.eup %4402  ;;  %v3468_v20 = vadd.f32 1.0, %v4401_v56  ;;  %v3015_v11 = vmul.f32 0.5, %v7742_v9  ;;  %v7762_v31 = vld [vmem:[#allocation33_spill] sm:$0xff]  ;;  %v7766_v3 = vld [vmem:[#allocation34_spill] sm:$0xff] }
 0x5da   : > { %3684 = vmatpush.bf16.msrb.mxu3 %v3588_v5  ;;  %v3583_v32 = vpack.c.bf16 %v3535_v0, %v3531_v30  ;;  %4410 = vtanh.f32 %v3336_v38  ;;  %4143 = vset.pattern.permute.xlu2 %v4498_v28  ;;  %v3472_v53 = vadd.f32 1.0, %v4403_v15  ;;  %v3259_v50 = vadd.f32 %v3195_v18, %v7748_v54  ;;  %v7763_v5 = vld [vmem:[#allocation21_spill] sm:$0xff] }
 0x5db   : > { %v4405_v61 = vpop.eup %4404  ;;  %3657 = vmatmul.bf16.gmra.mxu1 %v7176_v24  ;;  %v3263_v55 = vadd.f32 %v3199_v23, %v7750_v8  ;;  %v3196_v36 = vmul.f32 %v7753_v17, %v7752_v1  ;;  %3598 = vperm.xlu2 %4143, %v4458_v10   ;;  %v3532_v9 = vmul.f32 %v3468_v20, %v3020_v29  ;;  %v3012_v14 = vmul.f32 0.5, %v7744_v41  ;;  %v7757_v41 = vld [vmem:[#allocation29_spill] sm:$0xff]  ;;  %v7761_v29 = vld [vmem:[#allocation42_spill] sm:$0xff] }
 0x5dc   : > { %v4407_v43 = vpop.eup %4406  ;;  %3666 = vmatpush.bf16.msrb.mxu2 %v3583_v32  ;;  %v3459_v62 = vadd.f32 1.0, %v4405_v61  ;;  %v3200_v33 = vmul.f32 %v7755_v34, %v7754_v25  ;;  %v3536_v13 = vmul.f32 %v3472_v53, %v3024_v37  ;;  %v3323_v42 = vmul.f32 0.7978846, %v3259_v50  ;;  %v7764_v18 = vld [vmem:[#allocation41_spill] sm:$0xff]  ;;  %v7768_v53 = vld [vmem:[#allocation66_spill] sm:$0xff]  ;;  %v7769_v50 = vld [vmem:[#allocation39_spill] sm:$0xff] }
 0x5dd   : > { %v3463_v63 = vadd.f32 1.0, %v4407_v43  ;;  %v3327_v22 = vmul.f32 0.7978846, %v3263_v55  ;;  %v3016_v4 = vmul.f32 0.5, %v7746_v26  ;;  %v3260_v19 = vadd.f32 %v3196_v36, %v7752_v1  ;;  %v7758_v26 = vld [vmem:[#allocation31_spill] sm:$0xff]  ;;  %v7765_v2 = vld [vmem:[#allocation37_spill] sm:$0xff] }
 0x5de   : > { %v3523_v51 = vmul.f32 %v3459_v62, %v3011_v27  ;;  %v3264_v52 = vadd.f32 %v3200_v33, %v7754_v25  ;;  %v3584_v46 = vpack.c.bf16 %v3536_v13, %v3532_v9  ;;  %4412 = vtanh.f32 %v3323_v42  ;;  %v4459_v27 = vld [vmem:[%s7325_s3 + $0x18] sm:$0xff]  ;;  %v7767_v15 = vld [vmem:[#allocation9_spill] sm:$0xff] }
 0x5df   : > { %v4409_v48 = vpop.eup %4408  ;;  %v3527_v59 = vmul.f32 %v3463_v63, %v3015_v11  ;;  %v3187_v44 = vmul.f32 %v7757_v41, %v7756_v45  ;;  %4414 = vtanh.f32 %v3327_v22  ;;  %v3324_v35 = vmul.f32 0.7978846, %v3260_v19 }
 0x5e0   : > { %v4411_v16 = vpop.eup %4410  ;;  %v3460_v6 = vadd.f32 1.0, %v4409_v48  ;;  %v3328_v7 = vmul.f32 0.7978846, %v3264_v52  ;;  %3685 = vmatpush.bf16.msrb.mxu3 %v3584_v46  ;;  %v3191_v21 = vmul.f32 %v7759_v49, %v7758_v26  ;;  %v3119_v37 = vmul.f32 %v7761_v29, %v7760_v47  ;;  %v7770_v46 = vld [vmem:[#allocation43_spill] sm:$0xff] }
 0x5e1   : > { %v3579_v60 = vpack.c.bf16 %v3527_v59, %v3523_v51  ;;  %v3464_v39 = vadd.f32 1.0, %v4411_v16  ;;  %v3251_v57 = vadd.f32 %v3187_v44, %v7756_v45  ;;  %v3120_v30 = vmul.f32 %v7763_v5, %v7762_v31 }
 0x5e2   : > { %v3524_v0 = vmul.f32 %v3460_v6, %v3012_v14  ;;  %4416 = vtanh.f32 %v3324_v35  ;;  %v3255_v28 = vadd.f32 %v3191_v21, %v7758_v26  ;;  %v3003_v12 = vmul.f32 0.5, %v7748_v54 }
 0x5e3   : > { %3667 = vmatpush.bf16.msrb.mxu2 %v3579_v60  ;;  %v3528_v38 = vmul.f32 %v3464_v39, %v3016_v4  ;;  %4418 = vtanh.f32 %v3328_v7  ;;  %v3315_v56 = vmul.f32 0.7978846, %v3251_v57  ;;  %3610 = vperm.xlu2 %4143, %v4459_v27   ;;  %v3007_v58 = vmul.f32 0.5, %v7750_v8 }
 0x5e4   : > { %v3188_v23 = vmul.f32 %v7765_v2, %v7764_v18  ;;  %v3192_v32 = vmul.f32 %v7767_v15, %v7766_v3  ;;  %v4413_v20 = vpop.eup %4412  ;;  %v3319_v61 = vmul.f32 0.7978846, %v3255_v28  ;;  %v3179_v55 = vmul.f32 %v7769_v50, %v7768_v53 }
 0x5e5   : > { %v3580_v11 = vpack.c.bf16 %v3528_v38, %v3524_v0  ;;  %4420 = vtanh.f32 %v3315_v56  ;;  %v4415_v17 = vpop.eup %4414  ;;  %v3451_v36 = vadd.f32 1.0, %v4413_v20  ;;  %v3183_v8 = vmul.f32 %v3119_v37, %v7760_v47 }
 0x5e6   : > { %v3252_v10 = vadd.f32 %v3188_v23, %v7764_v18  ;;  %v3256_v54 = vadd.f32 %v3192_v32, %v7766_v3  ;;  %v3455_v43 = vadd.f32 1.0, %v4415_v17  ;;  %v3004_v9 = vmul.f32 0.5, %v7752_v1  ;;  %v7771_v1 = vld [vmem:[#allocation28_spill] sm:$0xff] }
 0x5e7   : > { %3686 = vmatpush.bf16.msrb.mxu3 %v3580_v11  ;;  %4422 = vtanh.f32 %v3319_v61  ;;  %v3243_v62 = vadd.f32 %v3179_v55, %v7768_v53  ;;  %v3008_v34 = vmul.f32 0.5, %v7754_v25  ;;  %v3247_v63 = vadd.f32 %v3183_v8, %v7760_v47 }
 0x5e8   : > { %v4417_v14 = vpop.eup %4416  ;;  %v3316_v33 = vmul.f32 0.7978846, %v3252_v10  ;;  %v3320_v13 = vmul.f32 0.7978846, %v3256_v54  ;;  %v3515_v22 = vmul.f32 %v3451_v36, %v3003_v12  ;;  %v3519_v51 = vmul.f32 %v3455_v43, %v3007_v58 }
 0x5e9   : > { %v4419_v42 = vpop.eup %4418  ;;  %v3452_v4 = vadd.f32 1.0, %v4417_v14  ;;  %v3307_v19 = vmul.f32 0.7978846, %v3243_v62  ;;  %v3311_v48 = vmul.f32 0.7978846, %v3247_v63  ;;  %v3180_v59 = vmul.f32 %v7771_v1, %v7770_v46  ;;  %v7775_v1 = vld [vmem:[#allocation67_spill] sm:$0xff] }
 0x5ea   : > { %v3456_v52 = vadd.f32 1.0, %v4419_v42  ;;  %4424 = vtanh.f32 %v3316_v33  ;;  %v3575_v44 = vpack.c.bf16 %v3519_v51, %v3515_v22  ;;  %v3184_v25 = vmul.f32 %v3120_v30, %v7762_v31  ;;  %v7772_v33 = vld [vmem:[#allocation68_spill] sm:$0xff]  ;;  %v7773_v42 = vld [vmem:[#allocation23_spill] sm:$0xff] }
 0x5eb   : > { %v4421_v41 = vpop.eup %4420  ;;  %v3516_v16 = vmul.f32 %v3452_v4, %v3004_v9  ;;  %4426 = vtanh.f32 %v3320_v13  ;;  %v3244_v7 = vadd.f32 %v3180_v59, %v7770_v46  ;;  %v2995_v39 = vmul.f32 0.5, %v7756_v45  ;;  %v7774_v4 = vld [vmem:[#allocation69_spill] sm:$0xff] }
 0x5ec   : > { %v3520_v6 = vmul.f32 %v3456_v52, %v3008_v34  ;;  %v3443_v35 = vadd.f32 1.0, %v4421_v41  ;;  %4428 = vtanh.f32 %v3307_v19  ;;  %3668 = vmatpush.bf16.msrb.mxu2 %v3575_v44  ;;  %v3248_v49 = vadd.f32 %v3184_v25, %v7762_v31 }
 0x5ed   : > { %v4423_v60 = vpop.eup %4422  ;;  %4430 = vtanh.f32 %v3311_v48  ;;  %v2999_v57 = vmul.f32 0.5, %v7758_v26  ;;  %v3308_v37 = vmul.f32 0.7978846, %v3244_v7  ;;  %v2996_v45 = vmul.f32 0.5, %v7764_v18 }
 0x5ee   : > { %v3576_v21 = vpack.c.bf16 %v3520_v6, %v3516_v16  ;;  %v3447_v29 = vadd.f32 1.0, %v4423_v60  ;;  %v3312_v5 = vmul.f32 0.7978846, %v3248_v49  ;;  %v3507_v30 = vmul.f32 %v3443_v35, %v2995_v39  ;;  %v7776_v16 = vld [vmem:[#allocation61_spill] sm:$0xff]  ;;  %v7777_v60 = vld [vmem:[#allocation56_spill] sm:$0xff] }
 0x5ef   : > { %4432 = vtanh.f32 %v3308_v37  ;;  %v3000_v58 = vmul.f32 0.5, %v7766_v3  ;;  %v2987_v26 = vmul.f32 0.5, %v7768_v53  ;;  %v2991_v11 = vmul.f32 0.5, %v7760_v47 }
 0x5f0   : > { %v4425_v0 = vpop.eup %4424  ;;  %3687 = vmatpush.bf16.msrb.mxu3 %v3576_v21  ;;  %v3511_v38 = vmul.f32 %v3447_v29, %v2999_v57  ;;  %4434 = vtanh.f32 %v3312_v5  ;;  %v2988_v3 = vmul.f32 0.5, %v7770_v46  ;;  %v2992_v53 = vmul.f32 0.5, %v7762_v31  ;;  %v7778_v57 = vld [vmem:[#allocation25_spill] sm:$0xff] }
 0x5f1   : > { %v4427_v28 = vpop.eup %4426  ;;  %v3444_v56 = vadd.f32 1.0, %v4425_v0  ;;  %v7779_v0 = vld [vmem:[#allocation70_spill] sm:$0xff] }
 0x5f2   : > { %v4429_v27 = vpop.eup %4428  ;;  %v3571_v12 = vpack.c.bf16 %v3511_v38, %v3507_v30  ;;  %v3448_v2 = vadd.f32 1.0, %v4427_v28 }
 0x5f3   : > { %v4431_v23 = vpop.eup %4430  ;;  %v3435_v15 = vadd.f32 1.0, %v4429_v27  ;;  %v3508_v32 = vmul.f32 %v3444_v56, %v2996_v45  ;;  %v7780_v56 = vld [vmem:[#allocation24_spill] sm:$0xff] }
 0x5f4   : > { %3669 = vmatpush.bf16.msrb.mxu2 %v3571_v12  ;;  %v3512_v20 = vmul.f32 %v3448_v2, %v3000_v58  ;;  %v3439_v61 = vadd.f32 1.0, %v4431_v23  ;;  %v7781_v58 = vld [vmem:[#allocation71_spill] sm:$0xff] }
 0x5f5   : > { %v4433_v50 = vpop.eup %4432  ;;  %v3499_v17 = vmul.f32 %v3435_v15, %v2987_v26  ;;  %v7782_v15 = vld [vmem:[#allocation63_spill] sm:$0xff] }
 0x5f6   : > { %v3572_v55 = vpack.c.bf16 %v3512_v20, %v3508_v32  ;;  %v3503_v36 = vmul.f32 %v3439_v61, %v2991_v11  ;;  %v4435_v10 = vpop.eup %4434  ;;  %v3436_v54 = vadd.f32 1.0, %v4433_v50  ;;  %v7783_v61 = vld [vmem:[#allocation62_spill] sm:$0xff] }
 0x5f7   : > { %v3440_v8 = vadd.f32 1.0, %v4435_v10 }
 0x5f8   : > { %3688 = vmatpush.bf16.msrb.mxu3 %v3572_v55  ;;  %v3567_v18 = vpack.c.bf16 %v3503_v36, %v3499_v17  ;;  %v3500_v43 = vmul.f32 %v3436_v54, %v2988_v3  ;;  %v7784_v36 = vld [vmem:[#allocation27_spill] sm:$0xff]  ;;  %v7785_v3 = vld [vmem:[#allocation49_spill] sm:$0xff] }
 0x5f9   : > { %v3504_v9 = vmul.f32 %v3440_v8, %v2992_v53 }
 0x5fa   : > { %3670 = vmatpush.bf16.msrb.mxu2 %v3567_v18 }
 0x5fb   : > { %v3568_v62 = vpack.c.bf16 %v3504_v9, %v3500_v43  ;;  %v7786_v9 = vld [vmem:[#allocation47_spill] sm:$0xff] }
 0x5fd   : > { %3671 = vmatmul.bf16.vlgmr.msrb.gmra.mxu2 %v7123_v40  ;;  %3689 = vmatpush.bf16.msrb.mxu3 %v3568_v62 }
 0x600   : > { %3690 = vmatmul.bf16.vlgmr.msrb.gmra.mxu3 %v7123_v40 }
 0x60d   : > { %3676 = vmatmul.bf16.gmra.mxu2 %v7176_v24 }
 0x610   : > { %3695 = vmatmul.bf16.gmra.mxu3 %v7176_v24 }
 0x635   : > { %v3599_v47 = vpop.permute.xlu2 %3598 }
 0x63d   : > { %v3611_v7 = vpop.permute.xlu2 %3610 }
 0x643   : > { %v3634_v14 = vpop.f32.mrf.mxu0 }
 0x644   : > { %v3635_v34 = vadd.f32 %v3634_v14, %v3599_v47 }
 0x646   : > { %v3701_v13 = vadd.f32 %v3635_v34, %v7772_v33  ;;  %v7787_v34 = vld [vmem:[#allocation50_spill] sm:$0xff] }
 0x648   : > { %3717 = vst [vmem:[%s7256_s10] sm:$0xff] %v3701_v13  ;;  %v3653_v31 = vpop.f32.mrf.mxu1 }
 0x649   : > { %v3654_v63 = vadd.f32 %v3653_v31, %v3599_v47 }
 0x64b   : > { %v3702_v40 = vadd.f32 %v3654_v63, %v7773_v42  ;;  %v3603_v22 = vpop.permute.xlu0 %3602  ;;  %v3636_v51 = vpop.f32.mrf.mxu0 }
 0x64c   : > { %v3637_v24 = vadd.f32 %v3636_v51, %v3603_v22  ;;  %v3607_v46 = vpop.permute.xlu1 %3606 }
 0x64d   : > { %3718 = vst [vmem:[%s7256_s10 + $0x8] sm:$0xff] %v3702_v40 }
 0x64e   : > { %v3705_v19 = vadd.f32 %v3637_v24, %v7774_v4 }
 0x64f   : > { %v3755_v13 = vld [vmem:[%s7256_s10] sm:$0xff] (%p4554_p5) }
 0x650   : > { %3721 = vst [vmem:[%s7256_s10 + $0x20] sm:$0xff] %v3705_v19  ;;  %v3655_v52 = vpop.f32.mrf.mxu1 }
 0x651   : > { %v3656_v48 = vadd.f32 %v3655_v52, %v3603_v22  ;;  %3756 = vst [vmem:[%s3742_s23] sm:$0xff] (%p4554_p5), %v3755_v13 }
 0x653   : > { %v3706_v59 = vadd.f32 %v3656_v48, %v7775_v1  ;;  %v3639_v41 = vpop.f32.mrf.mxu0 }
 0x654   : > { %v3640_v44 = vadd.f32 %v3639_v41, %v3607_v46  ;;  %v3757_v31 = vld [vmem:[%s7256_s10 + $0x8] sm:$0xff] (%p4554_p5) }
 0x655   : > { %3722 = vst [vmem:[%s7256_s10 + $0x28] sm:$0xff] %v3706_v59 }
 0x656   : > { %v3709_v25 = vadd.f32 %v3640_v44, %v7776_v16  ;;  %3758 = vst [vmem:[%s3742_s23 + $0x8] sm:$0xff] (%p4554_p5), %v3757_v31 }
 0x657   : > { %v3763_v40 = vld [vmem:[%s7256_s10 + $0x20] sm:$0xff] (%p4554_p5) }
 0x658   : > { %3725 = vst [vmem:[%s7256_s10 + $0x40] sm:$0xff] %v3709_v25  ;;  %v3658_v6 = vpop.f32.mrf.mxu1 }
 0x659   : > { %v3659_v35 = vadd.f32 %v3658_v6, %v3607_v46  ;;  %3764 = vst [vmem:[%s3742_s23 + $0x80] sm:$0xff] (%p4554_p5), %v3763_v40 }
 0x65b   : > { %v3710_v39 = vadd.f32 %v3659_v35, %v7777_v60  ;;  %v3641_v49 = vpop.f32.mrf.mxu0 }
 0x65c   : > { %v3642_v21 = vadd.f32 %v3641_v49, %v3611_v7 }
 0x65d   : > { %3726 = vst [vmem:[%s7256_s10 + $0x48] sm:$0xff] %v3710_v39 }
 0x65e   : > { %v3713_v29 = vadd.f32 %v3642_v21, %v7778_v57 }
 0x65f   : > { %v3771_v4 = vld [vmem:[%s7256_s10 + $0x40] sm:$0xff] (%p4554_p5) }
 0x660   : > { %3729 = vst [vmem:[%s7256_s10 + $0x60] sm:$0xff] %v3713_v29  ;;  %v3660_v37 = vpop.f32.mrf.mxu1 }
 0x661   : > { %v3661_v5 = vadd.f32 %v3660_v37, %v3611_v7  ;;  %3772 = vst [vmem:[%s3742_s23 + $0x100] sm:$0xff] (%p4554_p5), %v3771_v4 }
 0x663   : > { %v3714_v30 = vadd.f32 %v3661_v5, %v7779_v0 }
 0x664   : > { %v3773_v19 = vld [vmem:[%s7256_s10 + $0x48] sm:$0xff] (%p4554_p5) }
 0x665   : > { %3730 = vst [vmem:[%s7256_s10 + $0x68] sm:$0xff] %v3714_v30 }
 0x666   : > { %3774 = vst [vmem:[%s3742_s23 + $0x108] sm:$0xff] (%p4554_p5), %v3773_v19 }
 0x66c   : > { %v3781_v1 = vld [vmem:[%s7256_s10 + $0x68] sm:$0xff] (%p4554_p5) }
 0x66d   : > { %3782 = vst [vmem:[%s3742_s23 + $0x188] sm:$0xff] (%p4554_p5), %v3781_v1 }
 0x680   : > { %v3672_v38 = vpop.f32.mrf.mxu2 }
 0x681   : > { %v3673_v28 = vadd.f32 %v3672_v38, %v3599_v47 }
 0x683   : > { %v3703_v27 = vadd.f32 %v3673_v28, %v7780_v56  ;;  %v3691_v12 = vpop.f32.mrf.mxu3 }
 0x684   : > { %v3692_v45 = vadd.f32 %v3691_v12, %v3599_v47 }
 0x685   : > { %3719 = vst [vmem:[%s7256_s10 + $0x10] sm:$0xff] %v3703_v27 }
 0x686   : > { %v3704_v2 = vadd.f32 %v3692_v45, %v7781_v58 }
 0x688   : > { %v3674_v23 = vpop.f32.mrf.mxu2  ;;  %3720 = vst [vmem:[%s7256_s10 + $0x18] sm:$0xff] %v3704_v2 }
 0x689   : > { %v3675_v26 = vadd.f32 %v3674_v23, %v3603_v22 }
 0x68b   : > { %v3707_v32 = vadd.f32 %v3675_v26, %v7782_v15  ;;  %v3693_v20 = vpop.f32.mrf.mxu3 }
 0x68c   : > { %v3694_v11 = vadd.f32 %v3693_v20, %v3603_v22  ;;  %v3759_v63 = vld [vmem:[%s7256_s10 + $0x10] sm:$0xff] (%p4554_p5)  ;;  %v3765_v22 = vld [vmem:[%s7256_s10 + $0x28] sm:$0xff] (%p4554_p5) }
 0x68d   : > { %3723 = vst [vmem:[%s7256_s10 + $0x30] sm:$0xff] %v3707_v32 }
 0x68e   : > { %v3708_v50 = vadd.f32 %v3694_v11, %v7783_v61  ;;  %3760 = vst [vmem:[%s3742_s23 + $0x10] sm:$0xff] (%p4554_p5), %v3759_v63 }
 0x68f   : > { %v3761_v42 = vld [vmem:[%s7256_s10 + $0x18] sm:$0xff] (%p4554_p5)  ;;  %3766 = vst [vmem:[%s3742_s23 + $0x88] sm:$0xff] (%p4554_p5), %v3765_v22 }
 0x690   : > { %v3677_v55 = vpop.f32.mrf.mxu2  ;;  %3724 = vst [vmem:[%s7256_s10 + $0x38] sm:$0xff] %v3708_v50 }
 0x691   : > { %v3678_v17 = vadd.f32 %v3677_v55, %v3607_v46  ;;  %3762 = vst [vmem:[%s3742_s23 + $0x18] sm:$0xff] (%p4554_p5), %v3761_v42 }
 0x693   : > { %v3711_v10 = vadd.f32 %v3678_v17, %v7784_v36  ;;  %v3696_v54 = vpop.f32.mrf.mxu3 }
 0x694   : > { %v3697_v18 = vadd.f32 %v3696_v54, %v3607_v46  ;;  %v3767_v51 = vld [vmem:[%s7256_s10 + $0x30] sm:$0xff] (%p4554_p5)  ;;  %v3779_v46 = vld [vmem:[%s7256_s10 + $0x60] sm:$0xff] (%p4554_p5) }
 0x695   : > { %3727 = vst [vmem:[%s7256_s10 + $0x50] sm:$0xff] %v3711_v10 }
 0x696   : > { %v3712_v53 = vadd.f32 %v3697_v18, %v7785_v3  ;;  %3768 = vst [vmem:[%s3742_s23 + $0x90] sm:$0xff] (%p4554_p5), %v3767_v51 }
 0x697   : > { %v3769_v24 = vld [vmem:[%s7256_s10 + $0x38] sm:$0xff] (%p4554_p5)  ;;  %3780 = vst [vmem:[%s3742_s23 + $0x180] sm:$0xff] (%p4554_p5), %v3779_v46 }
 0x698   : > { %v3679_v8 = vpop.f32.mrf.mxu2  ;;  %3728 = vst [vmem:[%s7256_s10 + $0x58] sm:$0xff] %v3712_v53 }
 0x699   : > { %v3680_v43 = vadd.f32 %v3679_v8, %v3611_v7  ;;  %3770 = vst [vmem:[%s3742_s23 + $0x98] sm:$0xff] (%p4554_p5), %v3769_v24 }
 0x69b   : > { %v3715_v62 = vadd.f32 %v3680_v43, %v7786_v9  ;;  %v3698_v47 = vpop.f32.mrf.mxu3 }
 0x69c   : > { %v3699_v14 = vadd.f32 %v3698_v47, %v3611_v7  ;;  %3739 = sbr.rel (!%p4554_p5) target bundleno = 1705 (0x6a9), region = 63  ;;  %v3775_v52 = vld [vmem:[%s7256_s10 + $0x50] sm:$0xff] (%p4554_p5) }
 0x69d   : > { %3731 = vst [vmem:[%s7256_s10 + $0x70] sm:$0xff] %v3715_v62 }
 0x69e   : > { %v3716_v33 = vadd.f32 %v3699_v14, %v7787_v34  ;;  %3776 = vst [vmem:[%s3742_s23 + $0x110] sm:$0xff] (%p4554_p5), %v3775_v52 }
 0x69f   : > { %v3777_v48 = vld [vmem:[%s7256_s10 + $0x58] sm:$0xff] (%p4554_p5) }
 0x6a0   : > { %3732 = vst [vmem:[%s7256_s10 + $0x78] sm:$0xff] %v3716_v33 }
 0x6a1   : > { %3778 = vst [vmem:[%s3742_s23 + $0x118] sm:$0xff] %v3777_v48 }
 0x6a4   : > { %v3783_v59 = vld [vmem:[%s7256_s10 + $0x70] sm:$0xff] }
 0x6a5   : > { %3784 = vst [vmem:[%s3742_s23 + $0x190] sm:$0xff] %v3783_v59 }
 0x6a7   : > { %v3785_v41 = vld [vmem:[%s7256_s10 + $0x78] sm:$0xff] }
 0x6a8   : > { %3786 = vst [vmem:[%s3742_s23 + $0x198] sm:$0xff] %v3785_v41 }
 0x6a9 PF: > { %p11_p10 = scmp.ge.s32.totalorder %s4541_s19, 6   ;;  %s7788_s15 = smov %s4478_s16 }
 0x6aa   : > { %s7789_s16 = smov %s4552_s22  ;;  %s7790_s17 = smov %s4541_s19 }
 0x6ab   :  { %13 = sbr.rel (!%p11_p10) target bundleno = 2 (0x2), region = 117 }

</bundles_post_ra>
